<compile_context>
chip_gen: v7x
topology: tpu7x:2x2x1
jax: 0.10.0
libtpu: 0.0.40
codegen_flags: <defaults>
</compile_context>

<pallas_src>
import jax
import jax.numpy as jnp
from jax.experimental import pallas as pl
from jax.experimental.pallas import tpu as pltpu

EPS = 1e-5
HIDDEN = 512
NUM_HIDDEN_LAYERS = 4


def _linear_bn_relu(h_bf16, w_ref, gb):
    """bf16 MXU matmul (f32 acc) -> fused one-pass train-mode BN -> ReLU (bf16 out)."""
    z = jnp.dot(h_bf16, w_ref[...], preferred_element_type=jnp.float32)
    inv_n = 1.0 / z.shape[0]
    s1 = jnp.sum(z, axis=0, keepdims=True)
    s2 = jnp.sum(z * z, axis=0, keepdims=True)
    mu = s1 * inv_n
    var = jnp.maximum(s2 * inv_n - mu * mu, 0.0)          # biased batch variance
    gamma = gb[0:1, :]
    beta = gb[1:2, :]
    scale = gamma * jax.lax.rsqrt(var + EPS)
    shift = beta - mu * scale
    # Fused FMA epilogue + ReLU, downcast fused in (next layer's MXU LHS is bf16).
    return jnp.maximum(z * scale + shift, 0.0).astype(jnp.bfloat16)


def domain_classifier_kernel(x_ref, w_hbm_ref, gb_ref, w5_ref, b5_ref, o_ref,
                             wbuf, sem):
    """x_ref: (N,512) f32 VMEM; w_hbm_ref: (4,512,512) bf16 in HBM (pl.ANY);
    gb_ref: (4,2,512) f32 VMEM; w5_ref: (1,512) f32 VMEM; b5_ref: (1,1) f32 SMEM;
    wbuf: (2,512,512) bf16 VMEM scratch; sem: DMA semaphores (2,)."""

    def fetch(layer, slot):
        pltpu.make_async_copy(w_hbm_ref.at[layer], wbuf.at[slot],
                              sem.at[slot]).start()

    # Prime layer 0's weights, then overlap layer i+1's DMA with layer i compute.
    fetch(0, 0)
    h = x_ref[...].astype(jnp.bfloat16)                   # single in-VMEM cast

    for i in range(NUM_HIDDEN_LAYERS):
        slot = i & 1
        pltpu.make_async_copy(w_hbm_ref.at[i], wbuf.at[slot],
                              sem.at[slot]).wait()
        if i + 1 < NUM_HIDDEN_LAYERS:
            fetch(i + 1, 1 - slot)                        # prefetch next layer
        h = _linear_bn_relu(h, wbuf.at[slot], gb_ref[i])

    # Final 512->1: VPU multiply + lane reduce (avoids a 1-wide MXU matmul).
    out = jnp.sum(h.astype(jnp.float32) * w5_ref[...], axis=-1, keepdims=True)
    o_ref[...] = (out + b5_ref[0, 0]).astype(o_ref.dtype)


def pack_params(params):
    """PyTorch-layout params -> stacked kernel args.

    Returns (W_stack (4,512,512) bf16, gb_stack (4,2,512) f32,
             w5 (1,512) f32, b5 (1,1) f32).  Hidden-layer biases b1..b4 are
    dropped: they cancel exactly under train-mode BatchNorm.
    """
    w_list, gb_list = [], []
    for i in range(NUM_HIDDEN_LAYERS):
        w, _b, g, be = params[4 * i: 4 * i + 4]           # w: (out,in)=(512,512)
        w_list.append(jnp.transpose(w).astype(jnp.bfloat16))   # (in,out) bf16
        gb_list.append(jnp.stack([g, be], axis=0))              # (2,512) f32
    w_stack = jnp.stack(w_list, axis=0)                   # (4,512,512) bf16
    gb_stack = jnp.stack(gb_list, axis=0)                 # (4,2,512)   f32
    w5, b5 = params[-2:]                                  # (1,512), (1,)
    return (w_stack, gb_stack,
            w5.astype(jnp.float32),
            b5.reshape(1, 1).astype(jnp.float32))


def domain_classifier(x, params):
    """x: (N, 512) float32; params: PyTorch-layout param list (see init_params)."""
    n = x.shape[0]
    w_stack, gb_stack, w5, b5 = pack_params(params)
    vmem = pl.BlockSpec(memory_space=pltpu.MemorySpace.VMEM)
    return pl.pallas_call(
        domain_classifier_kernel,
        out_shape=jax.ShapeDtypeStruct((n, 1), jnp.float32),
        in_specs=[
            vmem,                                        # x (f32, no wrapper cast)
            pl.BlockSpec(memory_space=pl.ANY),           # stacked weights in HBM
            vmem,                                        # stacked gamma/beta
            vmem,                                        # w5
            pl.BlockSpec(memory_space=pltpu.MemorySpace.SMEM),  # b5 scalar
        ],
        out_specs=vmem,
        scratch_shapes=[
            pltpu.VMEM((2, HIDDEN, HIDDEN), jnp.bfloat16),   # weight double-buffer
            pltpu.SemaphoreType.DMA((2,)),
        ],
        compiler_params=pltpu.CompilerParams(
            vmem_limit_bytes=32 * 1024 * 1024),
    )(x, w_stack, gb_stack, w5, b5)


def init_params(key):
    """PyTorch-shaped params: per layer (W(out,in), b(out,), gamma, beta), then W5, b5.

    BatchNorm gamma/beta are randomized (instead of the trivial 1/0 defaults)
    so the BN math is actually exercised.
    """
    params = []
    keys = jax.random.split(key, 18)
    ki = 0
    for _ in range(NUM_HIDDEN_LAYERS):
        w = jax.random.normal(keys[ki], (HIDDEN, HIDDEN), jnp.float32) * 0.05
        b = jax.random.normal(keys[ki + 1], (HIDDEN,), jnp.float32) * 0.05
        g = 1.0 + 0.1 * jax.random.normal(keys[ki + 2], (HIDDEN,), jnp.float32)
        be = 0.1 * jax.random.normal(keys[ki + 3], (HIDDEN,), jnp.float32)
        params.extend([w, b, g, be])
        ki += 4
    w5 = jax.random.normal(keys[ki], (1, HIDDEN), jnp.float32) * 0.05
    b5 = jax.random.normal(keys[ki + 1], (1,), jnp.float32) * 0.05
    params.extend([w5, b5])
    return params


def reference(x, params):
    """Pure-JAX f32 reference mirroring the PyTorch train-mode forward
    (keeps the hidden-layer Linear biases, which the kernel provably folds away)."""
    h = x
    for i in range(NUM_HIDDEN_LAYERS):
        w, b, g, be = params[4 * i: 4 * i + 4]
        h = h @ w.T + b
        mu = jnp.mean(h, axis=0, keepdims=True)
        var = jnp.mean((h - mu) ** 2, axis=0, keepdims=True)
        h = g * (h - mu) / jnp.sqrt(var + EPS) + be
        h = jnp.maximum(h, 0.0)
    w5, b5 = params[-2:]
    return h @ w5.T + b5


if __name__ == "__main__":
    key = jax.random.PRNGKey(0)
    kx, kp = jax.random.split(key)
    batch = 8  # small batch; BatchNorm1d (train mode) needs N > 1
    x = jax.random.normal(kx, (batch, HIDDEN), jnp.float32)
    params = init_params(kp)

    out = domain_classifier(x, params)
    out = jax.block_until_ready(out)

    ref = reference(x, params)
    assert out.shape == (batch, 1)
    # bf16 weights/activations -> looser tolerance vs the f32 reference.
    assert jnp.allclose(out, ref, atol=5e-2, rtol=5e-2), (
        f"mismatch: max abs err {jnp.max(jnp.abs(out - ref))}"
    )
    print("KERNEL_OK")
</pallas_src>

<mosaic_0001>
module attributes {stable_mosaic.version = 11 : i64} {
  func.func @domain_classifier_kernel(%arg0: memref<8x512xf32, #tpu.memory_space<vmem>>, %arg1: memref<4x512x512xbf16, #tpu.memory_space<any>>, %arg2: memref<4x2x512xf32, #tpu.memory_space<vmem>>, %arg3: memref<1x512xf32, #tpu.memory_space<vmem>>, %arg4: memref<1x1xf32, #tpu.memory_space<smem>>, %arg5: memref<8x1xf32, #tpu.memory_space<vmem>>, %arg6: memref<2x512x512xbf16, #tpu.memory_space<vmem>>, %arg7: memref<2x!tpu.dma_semaphore, #tpu.memory_space<semaphore_mem>>) attributes {dimension_semantics = [], scalar_prefetch = 0 : i64, scratch_operands = 2 : i64, tpu.core_type = #tpu.core_type<tc>} {
    %c0_i32 = arith.constant 0 : i32
    %c0_i32_0 = arith.constant 0 : i32
    %c0_i32_1 = arith.constant 0 : i32
    %c0_i32_2 = arith.constant 0 : i32
    %c0_i32_3 = arith.constant 0 : i32
    %0 = tpu.memref_slice %arg1[%c0_i32, %c0_i32_2, %c0_i32_3] : memref<4x512x512xbf16, #tpu.memory_space<any>> -> memref<1x512x512xbf16, #tpu.memory_space<any>>
    %1 = tpu.memref_squeeze %0 : memref<1x512x512xbf16, #tpu.memory_space<any>> -> memref<512x512xbf16, #tpu.memory_space<any>>
    %c0_i32_4 = arith.constant 0 : i32
    %c0_i32_5 = arith.constant 0 : i32
    %2 = tpu.memref_slice %arg6[%c0_i32_0, %c0_i32_4, %c0_i32_5] : memref<2x512x512xbf16, #tpu.memory_space<vmem>> -> memref<1x512x512xbf16, #tpu.memory_space<vmem>>
    %3 = tpu.memref_squeeze %2 : memref<1x512x512xbf16, #tpu.memory_space<vmem>> -> memref<512x512xbf16, #tpu.memory_space<vmem>>
    %4 = tpu.memref_slice %arg7[%c0_i32_1] : memref<2x!tpu.dma_semaphore, #tpu.memory_space<semaphore_mem>> -> memref<1x!tpu.dma_semaphore, #tpu.memory_space<semaphore_mem>>
    %5 = tpu.memref_squeeze %4 : memref<1x!tpu.dma_semaphore, #tpu.memory_space<semaphore_mem>> -> memref<!tpu.dma_semaphore, #tpu.memory_space<semaphore_mem>>
    tpu.enqueue_dma source(%1 : memref<512x512xbf16, #tpu.memory_space<any>>) target(%3 : memref<512x512xbf16, #tpu.memory_space<vmem>>) target_semaphore(%5 : memref<!tpu.dma_semaphore, #tpu.memory_space<semaphore_mem>>)
    %c0 = arith.constant 0 : index
    %c0_6 = arith.constant 0 : index
    %6 = vector.load %arg0[%c0, %c0_6] : memref<8x512xf32, #tpu.memory_space<vmem>>, vector<8x512xf32>
    %7 = arith.truncf %6 : vector<8x512xf32> to vector<8x512xbf16>
    %c0_i32_7 = arith.constant 0 : i32
    %c0_i32_8 = arith.constant 0 : i32
    %c0_i32_9 = arith.constant 0 : i32
    %c0_i32_10 = arith.constant 0 : i32
    %c0_i32_11 = arith.constant 0 : i32
    %8 = tpu.memref_slice %arg1[%c0_i32_7, %c0_i32_10, %c0_i32_11] : memref<4x512x512xbf16, #tpu.memory_space<any>> -> memref<1x512x512xbf16, #tpu.memory_space<any>>
    %9 = tpu.memref_squeeze %8 : memref<1x512x512xbf16, #tpu.memory_space<any>> -> memref<512x512xbf16, #tpu.memory_space<any>>
    %c0_i32_12 = arith.constant 0 : i32
    %c0_i32_13 = arith.constant 0 : i32
    %10 = tpu.memref_slice %arg6[%c0_i32_8, %c0_i32_12, %c0_i32_13] : memref<2x512x512xbf16, #tpu.memory_space<vmem>> -> memref<1x512x512xbf16, #tpu.memory_space<vmem>>
    %11 = tpu.memref_squeeze %10 : memref<1x512x512xbf16, #tpu.memory_space<vmem>> -> memref<512x512xbf16, #tpu.memory_space<vmem>>
    %12 = tpu.memref_slice %arg7[%c0_i32_9] : memref<2x!tpu.dma_semaphore, #tpu.memory_space<semaphore_mem>> -> memref<1x!tpu.dma_semaphore, #tpu.memory_space<semaphore_mem>>
    %13 = tpu.memref_squeeze %12 : memref<1x!tpu.dma_semaphore, #tpu.memory_space<semaphore_mem>> -> memref<!tpu.dma_semaphore, #tpu.memory_space<semaphore_mem>>
    tpu.wait_dma2 semaphore(%13 : memref<!tpu.dma_semaphore, #tpu.memory_space<semaphore_mem>>) src(%9 : memref<512x512xbf16, #tpu.memory_space<any>>) dst(%11 : memref<512x512xbf16, #tpu.memory_space<vmem>>)
    %c1_i32 = arith.constant 1 : i32
    %c1_i32_14 = arith.constant 1 : i32
    %c1_i32_15 = arith.constant 1 : i32
    %c0_i32_16 = arith.constant 0 : i32
    %c0_i32_17 = arith.constant 0 : i32
    %14 = tpu.memref_slice %arg1[%c1_i32, %c0_i32_16, %c0_i32_17] : memref<4x512x512xbf16, #tpu.memory_space<any>> -> memref<1x512x512xbf16, #tpu.memory_space<any>>
    %15 = tpu.memref_squeeze %14 : memref<1x512x512xbf16, #tpu.memory_space<any>> -> memref<512x512xbf16, #tpu.memory_space<any>>
    %c0_i32_18 = arith.constant 0 : i32
    %c0_i32_19 = arith.constant 0 : i32
    %16 = tpu.memref_slice %arg6[%c1_i32_14, %c0_i32_18, %c0_i32_19] : memref<2x512x512xbf16, #tpu.memory_space<vmem>> -> memref<1x512x512xbf16, #tpu.memory_space<vmem>>
    %17 = tpu.memref_squeeze %16 : memref<1x512x512xbf16, #tpu.memory_space<vmem>> -> memref<512x512xbf16, #tpu.memory_space<vmem>>
    %18 = tpu.memref_slice %arg7[%c1_i32_15] : memref<2x!tpu.dma_semaphore, #tpu.memory_space<semaphore_mem>> -> memref<1x!tpu.dma_semaphore, #tpu.memory_space<semaphore_mem>>
    %19 = tpu.memref_squeeze %18 : memref<1x!tpu.dma_semaphore, #tpu.memory_space<semaphore_mem>> -> memref<!tpu.dma_semaphore, #tpu.memory_space<semaphore_mem>>
    tpu.enqueue_dma source(%15 : memref<512x512xbf16, #tpu.memory_space<any>>) target(%17 : memref<512x512xbf16, #tpu.memory_space<vmem>>) target_semaphore(%19 : memref<!tpu.dma_semaphore, #tpu.memory_space<semaphore_mem>>)
    %c0_20 = arith.constant 0 : index
    %c0_21 = arith.constant 0 : index
    %c0_22 = arith.constant 0 : index
    %20 = vector.load %arg2[%c0_20, %c0_21, %c0_22] : memref<4x2x512xf32, #tpu.memory_space<vmem>>, vector<1x2x512xf32>
    %21 = vector.shape_cast %20 : vector<1x2x512xf32> to vector<2x512xf32>
    %c0_23 = arith.constant 0 : index
    %c0_24 = arith.constant 0 : index
    %c0_25 = arith.constant 0 : index
    %22 = vector.load %arg6[%c0_23, %c0_24, %c0_25] : memref<2x512x512xbf16, #tpu.memory_space<vmem>>, vector<1x512x512xbf16>
    %23 = vector.shape_cast %22 : vector<1x512x512xbf16> to vector<512x512xbf16>
    %cst = arith.constant dense<0.000000e+00> : vector<8x512xf32>
    %24 = tpu.matmul %7, %23, %cst {dimension_numbers = #tpu.dot_dimension_numbers<[1], [0], [0], [1], [0, 0, 1, 1], [], []>} : vector<8x512xbf16>, vector<512x512xbf16>, vector<8x512xf32> -> vector<8x512xf32>
    %cst_26 = arith.constant dense<0.000000e+00> : vector<512xf32>
    %25 = vector.multi_reduction <add>, %24, %cst_26 [0] : vector<8x512xf32> to vector<512xf32>
    %26 = vector.shape_cast %25 : vector<512xf32> to vector<1x512xf32>
    %27 = arith.mulf %24, %24 : vector<8x512xf32>
    %cst_27 = arith.constant dense<0.000000e+00> : vector<512xf32>
    %28 = vector.multi_reduction <add>, %27, %cst_27 [0] : vector<8x512xf32> to vector<512xf32>
    %29 = vector.shape_cast %28 : vector<512xf32> to vector<1x512xf32>
    %cst_28 = arith.constant 1.250000e-01 : f32
    %30 = vector.broadcast %cst_28 : f32 to vector<1x512xf32>
    %31 = arith.mulf %26, %30 : vector<1x512xf32>
    %cst_29 = arith.constant 1.250000e-01 : f32
    %32 = vector.broadcast %cst_29 : f32 to vector<1x512xf32>
    %33 = arith.mulf %29, %32 : vector<1x512xf32>
    %34 = arith.mulf %31, %31 : vector<1x512xf32>
    %35 = arith.subf %33, %34 : vector<1x512xf32>
    %cst_30 = arith.constant 0.000000e+00 : f32
    %36 = vector.broadcast %cst_30 : f32 to vector<1x512xf32>
    %37 = arith.maximumf %35, %36 : vector<1x512xf32>
    %38 = vector.extract_strided_slice %21 {offsets = [0, 0], sizes = [1, 512], strides = [1, 1]} : vector<2x512xf32> to vector<1x512xf32>
    %39 = vector.extract_strided_slice %21 {offsets = [1, 0], sizes = [1, 512], strides = [1, 1]} : vector<2x512xf32> to vector<1x512xf32>
    %cst_31 = arith.constant 9.99999974E-6 : f32
    %40 = vector.broadcast %cst_31 : f32 to vector<1x512xf32>
    %41 = arith.addf %37, %40 : vector<1x512xf32>
    %42 = math.rsqrt %41 : vector<1x512xf32>
    %43 = arith.mulf %38, %42 : vector<1x512xf32>
    %44 = arith.mulf %31, %43 : vector<1x512xf32>
    %45 = arith.subf %39, %44 : vector<1x512xf32>
    %46 = vector.broadcast %43 : vector<1x512xf32> to vector<8x512xf32>
    %47 = arith.mulf %24, %46 : vector<8x512xf32>
    %48 = vector.broadcast %45 : vector<1x512xf32> to vector<8x512xf32>
    %49 = arith.addf %47, %48 : vector<8x512xf32>
    %cst_32 = arith.constant 0.000000e+00 : f32
    %50 = vector.broadcast %cst_32 : f32 to vector<8x512xf32>
    %51 = arith.maximumf %49, %50 : vector<8x512xf32>
    %52 = arith.truncf %51 : vector<8x512xf32> to vector<8x512xbf16>
    %c1_i32_33 = arith.constant 1 : i32
    %c1_i32_34 = arith.constant 1 : i32
    %c1_i32_35 = arith.constant 1 : i32
    %c0_i32_36 = arith.constant 0 : i32
    %c0_i32_37 = arith.constant 0 : i32
    %53 = tpu.memref_slice %arg1[%c1_i32_33, %c0_i32_36, %c0_i32_37] : memref<4x512x512xbf16, #tpu.memory_space<any>> -> memref<1x512x512xbf16, #tpu.memory_space<any>>
    %54 = tpu.memref_squeeze %53 : memref<1x512x512xbf16, #tpu.memory_space<any>> -> memref<512x512xbf16, #tpu.memory_space<any>>
    %c0_i32_38 = arith.constant 0 : i32
    %c0_i32_39 = arith.constant 0 : i32
    %55 = tpu.memref_slice %arg6[%c1_i32_34, %c0_i32_38, %c0_i32_39] : memref<2x512x512xbf16, #tpu.memory_space<vmem>> -> memref<1x512x512xbf16, #tpu.memory_space<vmem>>
    %56 = tpu.memref_squeeze %55 : memref<1x512x512xbf16, #tpu.memory_space<vmem>> -> memref<512x512xbf16, #tpu.memory_space<vmem>>
    %57 = tpu.memref_slice %arg7[%c1_i32_35] : memref<2x!tpu.dma_semaphore, #tpu.memory_space<semaphore_mem>> -> memref<1x!tpu.dma_semaphore, #tpu.memory_space<semaphore_mem>>
    %58 = tpu.memref_squeeze %57 : memref<1x!tpu.dma_semaphore, #tpu.memory_space<semaphore_mem>> -> memref<!tpu.dma_semaphore, #tpu.memory_space<semaphore_mem>>
    tpu.wait_dma2 semaphore(%58 : memref<!tpu.dma_semaphore, #tpu.memory_space<semaphore_mem>>) src(%54 : memref<512x512xbf16, #tpu.memory_space<any>>) dst(%56 : memref<512x512xbf16, #tpu.memory_space<vmem>>)
    %c2_i32 = arith.constant 2 : i32
    %c0_i32_40 = arith.constant 0 : i32
    %c0_i32_41 = arith.constant 0 : i32
    %c0_i32_42 = arith.constant 0 : i32
    %c0_i32_43 = arith.constant 0 : i32
    %59 = tpu.memref_slice %arg1[%c2_i32, %c0_i32_42, %c0_i32_43] : memref<4x512x512xbf16, #tpu.memory_space<any>> -> memref<1x512x512xbf16, #tpu.memory_space<any>>
    %60 = tpu.memref_squeeze %59 : memref<1x512x512xbf16, #tpu.memory_space<any>> -> memref<512x512xbf16, #tpu.memory_space<any>>
    %c0_i32_44 = arith.constant 0 : i32
    %c0_i32_45 = arith.constant 0 : i32
    %61 = tpu.memref_slice %arg6[%c0_i32_40, %c0_i32_44, %c0_i32_45] : memref<2x512x512xbf16, #tpu.memory_space<vmem>> -> memref<1x512x512xbf16, #tpu.memory_space<vmem>>
    %62 = tpu.memref_squeeze %61 : memref<1x512x512xbf16, #tpu.memory_space<vmem>> -> memref<512x512xbf16, #tpu.memory_space<vmem>>
    %63 = tpu.memref_slice %arg7[%c0_i32_41] : memref<2x!tpu.dma_semaphore, #tpu.memory_space<semaphore_mem>> -> memref<1x!tpu.dma_semaphore, #tpu.memory_space<semaphore_mem>>
    %64 = tpu.memref_squeeze %63 : memref<1x!tpu.dma_semaphore, #tpu.memory_space<semaphore_mem>> -> memref<!tpu.dma_semaphore, #tpu.memory_space<semaphore_mem>>
    tpu.enqueue_dma source(%60 : memref<512x512xbf16, #tpu.memory_space<any>>) target(%62 : memref<512x512xbf16, #tpu.memory_space<vmem>>) target_semaphore(%64 : memref<!tpu.dma_semaphore, #tpu.memory_space<semaphore_mem>>)
    %c1 = arith.constant 1 : index
    %c0_46 = arith.constant 0 : index
    %c0_47 = arith.constant 0 : index
    %65 = vector.load %arg2[%c1, %c0_46, %c0_47] : memref<4x2x512xf32, #tpu.memory_space<vmem>>, vector<1x2x512xf32>
    %66 = vector.shape_cast %65 : vector<1x2x512xf32> to vector<2x512xf32>
    %c1_48 = arith.constant 1 : index
    %c0_49 = arith.constant 0 : index
    %c0_50 = arith.constant 0 : index
    %67 = vector.load %arg6[%c1_48, %c0_49, %c0_50] : memref<2x512x512xbf16, #tpu.memory_space<vmem>>, vector<1x512x512xbf16>
    %68 = vector.shape_cast %67 : vector<1x512x512xbf16> to vector<512x512xbf16>
    %cst_51 = arith.constant dense<0.000000e+00> : vector<8x512xf32>
    %69 = tpu.matmul %52, %68, %cst_51 {dimension_numbers = #tpu.dot_dimension_numbers<[1], [0], [0], [1], [0, 0, 1, 1], [], []>} : vector<8x512xbf16>, vector<512x512xbf16>, vector<8x512xf32> -> vector<8x512xf32>
    %cst_52 = arith.constant dense<0.000000e+00> : vector<512xf32>
    %70 = vector.multi_reduction <add>, %69, %cst_52 [0] : vector<8x512xf32> to vector<512xf32>
    %71 = vector.shape_cast %70 : vector<512xf32> to vector<1x512xf32>
    %72 = arith.mulf %69, %69 : vector<8x512xf32>
    %cst_53 = arith.constant dense<0.000000e+00> : vector<512xf32>
    %73 = vector.multi_reduction <add>, %72, %cst_53 [0] : vector<8x512xf32> to vector<512xf32>
    %74 = vector.shape_cast %73 : vector<512xf32> to vector<1x512xf32>
    %cst_54 = arith.constant 1.250000e-01 : f32
    %75 = vector.broadcast %cst_54 : f32 to vector<1x512xf32>
    %76 = arith.mulf %71, %75 : vector<1x512xf32>
    %cst_55 = arith.constant 1.250000e-01 : f32
    %77 = vector.broadcast %cst_55 : f32 to vector<1x512xf32>
    %78 = arith.mulf %74, %77 : vector<1x512xf32>
    %79 = arith.mulf %76, %76 : vector<1x512xf32>
    %80 = arith.subf %78, %79 : vector<1x512xf32>
    %cst_56 = arith.constant 0.000000e+00 : f32
    %81 = vector.broadcast %cst_56 : f32 to vector<1x512xf32>
    %82 = arith.maximumf %80, %81 : vector<1x512xf32>
    %83 = vector.extract_strided_slice %66 {offsets = [0, 0], sizes = [1, 512], strides = [1, 1]} : vector<2x512xf32> to vector<1x512xf32>
    %84 = vector.extract_strided_slice %66 {offsets = [1, 0], sizes = [1, 512], strides = [1, 1]} : vector<2x512xf32> to vector<1x512xf32>
    %cst_57 = arith.constant 9.99999974E-6 : f32
    %85 = vector.broadcast %cst_57 : f32 to vector<1x512xf32>
    %86 = arith.addf %82, %85 : vector<1x512xf32>
    %87 = math.rsqrt %86 : vector<1x512xf32>
    %88 = arith.mulf %83, %87 : vector<1x512xf32>
    %89 = arith.mulf %76, %88 : vector<1x512xf32>
    %90 = arith.subf %84, %89 : vector<1x512xf32>
    %91 = vector.broadcast %88 : vector<1x512xf32> to vector<8x512xf32>
    %92 = arith.mulf %69, %91 : vector<8x512xf32>
    %93 = vector.broadcast %90 : vector<1x512xf32> to vector<8x512xf32>
    %94 = arith.addf %92, %93 : vector<8x512xf32>
    %cst_58 = arith.constant 0.000000e+00 : f32
    %95 = vector.broadcast %cst_58 : f32 to vector<8x512xf32>
    %96 = arith.maximumf %94, %95 : vector<8x512xf32>
    %97 = arith.truncf %96 : vector<8x512xf32> to vector<8x512xbf16>
    %c2_i32_59 = arith.constant 2 : i32
    %c0_i32_60 = arith.constant 0 : i32
    %c0_i32_61 = arith.constant 0 : i32
    %c0_i32_62 = arith.constant 0 : i32
    %c0_i32_63 = arith.constant 0 : i32
    %98 = tpu.memref_slice %arg1[%c2_i32_59, %c0_i32_62, %c0_i32_63] : memref<4x512x512xbf16, #tpu.memory_space<any>> -> memref<1x512x512xbf16, #tpu.memory_space<any>>
    %99 = tpu.memref_squeeze %98 : memref<1x512x512xbf16, #tpu.memory_space<any>> -> memref<512x512xbf16, #tpu.memory_space<any>>
    %c0_i32_64 = arith.constant 0 : i32
    %c0_i32_65 = arith.constant 0 : i32
    %100 = tpu.memref_slice %arg6[%c0_i32_60, %c0_i32_64, %c0_i32_65] : memref<2x512x512xbf16, #tpu.memory_space<vmem>> -> memref<1x512x512xbf16, #tpu.memory_space<vmem>>
    %101 = tpu.memref_squeeze %100 : memref<1x512x512xbf16, #tpu.memory_space<vmem>> -> memref<512x512xbf16, #tpu.memory_space<vmem>>
    %102 = tpu.memref_slice %arg7[%c0_i32_61] : memref<2x!tpu.dma_semaphore, #tpu.memory_space<semaphore_mem>> -> memref<1x!tpu.dma_semaphore, #tpu.memory_space<semaphore_mem>>
    %103 = tpu.memref_squeeze %102 : memref<1x!tpu.dma_semaphore, #tpu.memory_space<semaphore_mem>> -> memref<!tpu.dma_semaphore, #tpu.memory_space<semaphore_mem>>
    tpu.wait_dma2 semaphore(%103 : memref<!tpu.dma_semaphore, #tpu.memory_space<semaphore_mem>>) src(%99 : memref<512x512xbf16, #tpu.memory_space<any>>) dst(%101 : memref<512x512xbf16, #tpu.memory_space<vmem>>)
    %c3_i32 = arith.constant 3 : i32
    %c1_i32_66 = arith.constant 1 : i32
    %c1_i32_67 = arith.constant 1 : i32
    %c0_i32_68 = arith.constant 0 : i32
    %c0_i32_69 = arith.constant 0 : i32
    %104 = tpu.memref_slice %arg1[%c3_i32, %c0_i32_68, %c0_i32_69] : memref<4x512x512xbf16, #tpu.memory_space<any>> -> memref<1x512x512xbf16, #tpu.memory_space<any>>
    %105 = tpu.memref_squeeze %104 : memref<1x512x512xbf16, #tpu.memory_space<any>> -> memref<512x512xbf16, #tpu.memory_space<any>>
    %c0_i32_70 = arith.constant 0 : i32
    %c0_i32_71 = arith.constant 0 : i32
    %106 = tpu.memref_slice %arg6[%c1_i32_66, %c0_i32_70, %c0_i32_71] : memref<2x512x512xbf16, #tpu.memory_space<vmem>> -> memref<1x512x512xbf16, #tpu.memory_space<vmem>>
    %107 = tpu.memref_squeeze %106 : memref<1x512x512xbf16, #tpu.memory_space<vmem>> -> memref<512x512xbf16, #tpu.memory_space<vmem>>
    %108 = tpu.memref_slice %arg7[%c1_i32_67] : memref<2x!tpu.dma_semaphore, #tpu.memory_space<semaphore_mem>> -> memref<1x!tpu.dma_semaphore, #tpu.memory_space<semaphore_mem>>
    %109 = tpu.memref_squeeze %108 : memref<1x!tpu.dma_semaphore, #tpu.memory_space<semaphore_mem>> -> memref<!tpu.dma_semaphore, #tpu.memory_space<semaphore_mem>>
    tpu.enqueue_dma source(%105 : memref<512x512xbf16, #tpu.memory_space<any>>) target(%107 : memref<512x512xbf16, #tpu.memory_space<vmem>>) target_semaphore(%109 : memref<!tpu.dma_semaphore, #tpu.memory_space<semaphore_mem>>)
    %c2 = arith.constant 2 : index
    %c0_72 = arith.constant 0 : index
    %c0_73 = arith.constant 0 : index
    %110 = vector.load %arg2[%c2, %c0_72, %c0_73] : memref<4x2x512xf32, #tpu.memory_space<vmem>>, vector<1x2x512xf32>
    %111 = vector.shape_cast %110 : vector<1x2x512xf32> to vector<2x512xf32>
    %c0_74 = arith.constant 0 : index
    %c0_75 = arith.constant 0 : index
    %c0_76 = arith.constant 0 : index
    %112 = vector.load %arg6[%c0_74, %c0_75, %c0_76] : memref<2x512x512xbf16, #tpu.memory_space<vmem>>, vector<1x512x512xbf16>
    %113 = vector.shape_cast %112 : vector<1x512x512xbf16> to vector<512x512xbf16>
    %cst_77 = arith.constant dense<0.000000e+00> : vector<8x512xf32>
    %114 = tpu.matmul %97, %113, %cst_77 {dimension_numbers = #tpu.dot_dimension_numbers<[1], [0], [0], [1], [0, 0, 1, 1], [], []>} : vector<8x512xbf16>, vector<512x512xbf16>, vector<8x512xf32> -> vector<8x512xf32>
    %cst_78 = arith.constant dense<0.000000e+00> : vector<512xf32>
    %115 = vector.multi_reduction <add>, %114, %cst_78 [0] : vector<8x512xf32> to vector<512xf32>
    %116 = vector.shape_cast %115 : vector<512xf32> to vector<1x512xf32>
    %117 = arith.mulf %114, %114 : vector<8x512xf32>
    %cst_79 = arith.constant dense<0.000000e+00> : vector<512xf32>
    %118 = vector.multi_reduction <add>, %117, %cst_79 [0] : vector<8x512xf32> to vector<512xf32>
    %119 = vector.shape_cast %118 : vector<512xf32> to vector<1x512xf32>
    %cst_80 = arith.constant 1.250000e-01 : f32
    %120 = vector.broadcast %cst_80 : f32 to vector<1x512xf32>
    %121 = arith.mulf %116, %120 : vector<1x512xf32>
    %cst_81 = arith.constant 1.250000e-01 : f32
    %122 = vector.broadcast %cst_81 : f32 to vector<1x512xf32>
    %123 = arith.mulf %119, %122 : vector<1x512xf32>
    %124 = arith.mulf %121, %121 : vector<1x512xf32>
    %125 = arith.subf %123, %124 : vector<1x512xf32>
    %cst_82 = arith.constant 0.000000e+00 : f32
    %126 = vector.broadcast %cst_82 : f32 to vector<1x512xf32>
    %127 = arith.maximumf %125, %126 : vector<1x512xf32>
    %128 = vector.extract_strided_slice %111 {offsets = [0, 0], sizes = [1, 512], strides = [1, 1]} : vector<2x512xf32> to vector<1x512xf32>
    %129 = vector.extract_strided_slice %111 {offsets = [1, 0], sizes = [1, 512], strides = [1, 1]} : vector<2x512xf32> to vector<1x512xf32>
    %cst_83 = arith.constant 9.99999974E-6 : f32
    %130 = vector.broadcast %cst_83 : f32 to vector<1x512xf32>
    %131 = arith.addf %127, %130 : vector<1x512xf32>
    %132 = math.rsqrt %131 : vector<1x512xf32>
    %133 = arith.mulf %128, %132 : vector<1x512xf32>
    %134 = arith.mulf %121, %133 : vector<1x512xf32>
    %135 = arith.subf %129, %134 : vector<1x512xf32>
    %136 = vector.broadcast %133 : vector<1x512xf32> to vector<8x512xf32>
    %137 = arith.mulf %114, %136 : vector<8x512xf32>
    %138 = vector.broadcast %135 : vector<1x512xf32> to vector<8x512xf32>
    %139 = arith.addf %137, %138 : vector<8x512xf32>
    %cst_84 = arith.constant 0.000000e+00 : f32
    %140 = vector.broadcast %cst_84 : f32 to vector<8x512xf32>
    %141 = arith.maximumf %139, %140 : vector<8x512xf32>
    %142 = arith.truncf %141 : vector<8x512xf32> to vector<8x512xbf16>
    %c3_i32_85 = arith.constant 3 : i32
    %c1_i32_86 = arith.constant 1 : i32
    %c1_i32_87 = arith.constant 1 : i32
    %c0_i32_88 = arith.constant 0 : i32
    %c0_i32_89 = arith.constant 0 : i32
    %143 = tpu.memref_slice %arg1[%c3_i32_85, %c0_i32_88, %c0_i32_89] : memref<4x512x512xbf16, #tpu.memory_space<any>> -> memref<1x512x512xbf16, #tpu.memory_space<any>>
    %144 = tpu.memref_squeeze %143 : memref<1x512x512xbf16, #tpu.memory_space<any>> -> memref<512x512xbf16, #tpu.memory_space<any>>
    %c0_i32_90 = arith.constant 0 : i32
    %c0_i32_91 = arith.constant 0 : i32
    %145 = tpu.memref_slice %arg6[%c1_i32_86, %c0_i32_90, %c0_i32_91] : memref<2x512x512xbf16, #tpu.memory_space<vmem>> -> memref<1x512x512xbf16, #tpu.memory_space<vmem>>
    %146 = tpu.memref_squeeze %145 : memref<1x512x512xbf16, #tpu.memory_space<vmem>> -> memref<512x512xbf16, #tpu.memory_space<vmem>>
    %147 = tpu.memref_slice %arg7[%c1_i32_87] : memref<2x!tpu.dma_semaphore, #tpu.memory_space<semaphore_mem>> -> memref<1x!tpu.dma_semaphore, #tpu.memory_space<semaphore_mem>>
    %148 = tpu.memref_squeeze %147 : memref<1x!tpu.dma_semaphore, #tpu.memory_space<semaphore_mem>> -> memref<!tpu.dma_semaphore, #tpu.memory_space<semaphore_mem>>
    tpu.wait_dma2 semaphore(%148 : memref<!tpu.dma_semaphore, #tpu.memory_space<semaphore_mem>>) src(%144 : memref<512x512xbf16, #tpu.memory_space<any>>) dst(%146 : memref<512x512xbf16, #tpu.memory_space<vmem>>)
    %c3 = arith.constant 3 : index
    %c0_92 = arith.constant 0 : index
    %c0_93 = arith.constant 0 : index
    %149 = vector.load %arg2[%c3, %c0_92, %c0_93] : memref<4x2x512xf32, #tpu.memory_space<vmem>>, vector<1x2x512xf32>
    %150 = vector.shape_cast %149 : vector<1x2x512xf32> to vector<2x512xf32>
    %c1_94 = arith.constant 1 : index
    %c0_95 = arith.constant 0 : index
    %c0_96 = arith.constant 0 : index
    %151 = vector.load %arg6[%c1_94, %c0_95, %c0_96] : memref<2x512x512xbf16, #tpu.memory_space<vmem>>, vector<1x512x512xbf16>
    %152 = vector.shape_cast %151 : vector<1x512x512xbf16> to vector<512x512xbf16>
    %cst_97 = arith.constant dense<0.000000e+00> : vector<8x512xf32>
    %153 = tpu.matmul %142, %152, %cst_97 {dimension_numbers = #tpu.dot_dimension_numbers<[1], [0], [0], [1], [0, 0, 1, 1], [], []>} : vector<8x512xbf16>, vector<512x512xbf16>, vector<8x512xf32> -> vector<8x512xf32>
    %cst_98 = arith.constant dense<0.000000e+00> : vector<512xf32>
    %154 = vector.multi_reduction <add>, %153, %cst_98 [0] : vector<8x512xf32> to vector<512xf32>
    %155 = vector.shape_cast %154 : vector<512xf32> to vector<1x512xf32>
    %156 = arith.mulf %153, %153 : vector<8x512xf32>
    %cst_99 = arith.constant dense<0.000000e+00> : vector<512xf32>
    %157 = vector.multi_reduction <add>, %156, %cst_99 [0] : vector<8x512xf32> to vector<512xf32>
    %158 = vector.shape_cast %157 : vector<512xf32> to vector<1x512xf32>
    %cst_100 = arith.constant 1.250000e-01 : f32
    %159 = vector.broadcast %cst_100 : f32 to vector<1x512xf32>
    %160 = arith.mulf %155, %159 : vector<1x512xf32>
    %cst_101 = arith.constant 1.250000e-01 : f32
    %161 = vector.broadcast %cst_101 : f32 to vector<1x512xf32>
    %162 = arith.mulf %158, %161 : vector<1x512xf32>
    %163 = arith.mulf %160, %160 : vector<1x512xf32>
    %164 = arith.subf %162, %163 : vector<1x512xf32>
    %cst_102 = arith.constant 0.000000e+00 : f32
    %165 = vector.broadcast %cst_102 : f32 to vector<1x512xf32>
    %166 = arith.maximumf %164, %165 : vector<1x512xf32>
    %167 = vector.extract_strided_slice %150 {offsets = [0, 0], sizes = [1, 512], strides = [1, 1]} : vector<2x512xf32> to vector<1x512xf32>
    %168 = vector.extract_strided_slice %150 {offsets = [1, 0], sizes = [1, 512], strides = [1, 1]} : vector<2x512xf32> to vector<1x512xf32>
    %cst_103 = arith.constant 9.99999974E-6 : f32
    %169 = vector.broadcast %cst_103 : f32 to vector<1x512xf32>
    %170 = arith.addf %166, %169 : vector<1x512xf32>
    %171 = math.rsqrt %170 : vector<1x512xf32>
    %172 = arith.mulf %167, %171 : vector<1x512xf32>
    %173 = arith.mulf %160, %172 : vector<1x512xf32>
    %174 = arith.subf %168, %173 : vector<1x512xf32>
    %175 = vector.broadcast %172 : vector<1x512xf32> to vector<8x512xf32>
    %176 = arith.mulf %153, %175 : vector<8x512xf32>
    %177 = vector.broadcast %174 : vector<1x512xf32> to vector<8x512xf32>
    %178 = arith.addf %176, %177 : vector<8x512xf32>
    %cst_104 = arith.constant 0.000000e+00 : f32
    %179 = vector.broadcast %cst_104 : f32 to vector<8x512xf32>
    %180 = arith.maximumf %178, %179 : vector<8x512xf32>
    %181 = arith.truncf %180 : vector<8x512xf32> to vector<8x512xbf16>
    %182 = arith.extf %181 : vector<8x512xbf16> to vector<8x512xf32>
    %c0_105 = arith.constant 0 : index
    %c0_106 = arith.constant 0 : index
    %183 = vector.load %arg3[%c0_105, %c0_106] : memref<1x512xf32, #tpu.memory_space<vmem>>, vector<1x512xf32>
    %184 = vector.broadcast %183 : vector<1x512xf32> to vector<8x512xf32>
    %185 = arith.mulf %182, %184 : vector<8x512xf32>
    %cst_107 = arith.constant dense<0.000000e+00> : vector<8xf32>
    %186 = vector.multi_reduction <add>, %185, %cst_107 [1] : vector<8x512xf32> to vector<8xf32>
    %187 = vector.shape_cast %186 : vector<8xf32> to vector<8x1xf32>
    %c0_108 = arith.constant 0 : index
    %c0_109 = arith.constant 0 : index
    %188 = memref.load %arg4[%c0_108, %c0_109] : memref<1x1xf32, #tpu.memory_space<smem>>
    %189 = vector.broadcast %188 : f32 to vector<8x1xf32>
    %190 = arith.addf %187, %189 : vector<8x1xf32>
    %c0_110 = arith.constant 0 : index
    %c0_111 = arith.constant 0 : index
    %191 = vector.load %arg5[%c0_110, %c0_111] : memref<8x1xf32, #tpu.memory_space<vmem>>, vector<8x1xf32>
    tpu.vector_store %arg5[%c0_110, %c0_111], %190 {strides = array<i32>} : memref<8x1xf32, #tpu.memory_space<vmem>>, vector<8x1xf32>,
    return
  }
}

</mosaic_0001>

<bundles_post_ra>
// kernel: tpu_custom_call.1
= control target key start
LH: loop header
LB: loop body
LE: loop exit
PB: predicated region body
PF: predicated region fallthrough
CT: control target
= control target key end

     0   :  { %11 = vsyncpa [#allocation6], 0  ;;  %s2932_s0 = inlined_call_operand.hbm [shape: f32[8,512], index: 0, kind: input, shape index: {}]   ;;  %s2933_s1 = inlined_call_operand.hbm [shape: bf16[4,512,512], index: 1, kind: input, shape index: {}]   ;;  %s2934_s2 = inlined_call_operand.hbm [shape: f32[4,2,512], index: 2, kind: input, shape index: {}]   ;;  %s2935_s3 = inlined_call_operand.hbm [shape: f32[1,512], index: 3, kind: input, shape index: {}]   ;;  %s2936_s4 = inlined_call_operand.<no memory space> [shape: f32[1,1], index: 4, kind: input, shape index: {}]   ;;  %s2937_s5 = inlined_call_operand.vmem [shape: f32[8,1], index: 5, kind: output, shape index: {}]  }
   0x1   :  { %12 = vsyncpa [#allocation8], 0  ;;  %s2505_s18 = smov [#allocation7]   ;;  %s2427_s22 = scalar_lea.hbm %s2934_s2, 512 }
   0x2   :  { %s28_s19 = sshll.u32 %s2505_s18, 4  ;;  %p2428_p0 = scmp.ne.s32.totalorder %s2934_s2, %s2427_s22  ;;  %s29_s19 = int_to_ptr.vmem [resolvable:$true] %s28_s19 }
   0x3   :  { %p2431_p1 = scmp.lt.u32.totalorder %s2427_s22, %s2934_s2 }
   0x5   :  { %p2433_p2 = pnand %p2431_p1, %p2428_p0 }
   0x7   :  { %2436 = shalt.err (!%p2433_p2)
}
   0x8   :  { %s2437_s27 = scalar_lea.vmem %s29_s19, 512  ;;  %p2442_p4 = scmp.lt.s32.totalorder %s29_s19, %s29_s19 }
   0x9   :  { %p2438_p3 = scmp.ne.s32.totalorder %s29_s19, %s2437_s27  ;;  %p2443_p5 = scmp.lt.s32.totalorder %s2437_s27, %s2437_s27 }
   0xb   :  { %p2444_p6 = por %p2443_p5, %p2442_p4 }
   0xd   :  { %p2445_p7 = pnand %p2444_p6, %p2438_p3 }
   0xf   :  { %2448 = shalt.err (!%p2445_p7)
}
  0x10   :  { %s2506_s28 = smov 128   ;;  %s2507_s29 = smov 8  }
  0x11   :  { %34 = dma.hbm_to_vmem [thread:$0]  %s2934_s2, 512, %s29_s19, [#allocation8], %s2506_s28, %s2506_s28, %s2507_s29  }
  0x12   :  { %s2508_s7 = smov [#allocation5]   ;;  %s2509_s9 = smov [#allocation9]  }
  0x13   :  { %s19_s8 = sshll.u32 %s2508_s7, 4  ;;  %s41_s10 = sshll.u32 %s2509_s9, 4  ;;  %s20_s8 = int_to_ptr.vmem [resolvable:$true] %s19_s8  ;;  %s42_s10 = int_to_ptr.vmem [resolvable:$true] %s41_s10 }
  0x14   :  { %s2449_s13 = scalar_lea.hbm %s2932_s0, 512 }
  0x15   :  { %p2450_p8 = scmp.ne.s32.totalorder %s2932_s0, %s2449_s13  ;;  %p2453_p9 = scmp.lt.u32.totalorder %s2449_s13, %s2932_s0 }
  0x17   :  { %p2455_p10 = pnand %p2453_p9, %p2450_p8 }
  0x19   :  { %2458 = shalt.err (!%p2455_p10)
}
  0x1a   :  { %s2459_s2 = scalar_lea.vmem %s20_s8, 512  ;;  %p2464_p12 = scmp.lt.s32.totalorder %s20_s8, %s20_s8 }
  0x1b   :  { %p2460_p11 = scmp.ne.s32.totalorder %s20_s8, %s2459_s2  ;;  %p2465_p13 = scmp.lt.s32.totalorder %s2459_s2, %s2459_s2 }
  0x1d   :  { %p2466_p0 = por %p2465_p13, %p2464_p12 }
  0x1f   :  { %p2467_p1 = pnand %p2466_p0, %p2460_p11 }
  0x21   :  { %2470 = shalt.err (!%p2467_p1)
}
  0x22   :  { %22 = dma.hbm_to_vmem [thread:$0]  %s2932_s0, 512, %s20_s8, [#allocation6]  }
  0x23   :  { %s2471_s22 = scalar_lea.hbm %s2935_s3, 64 }
  0x24   :  { %p2472_p2 = scmp.ne.s32.totalorder %s2935_s3, %s2471_s22  ;;  %p2475_p3 = scmp.lt.u32.totalorder %s2471_s22, %s2935_s3 }
  0x26   :  { %p2477_p4 = pnand %p2475_p3, %p2472_p2 }
  0x28   :  { %2480 = shalt.err (!%p2477_p4)
}
  0x29   :  { %s2481_s27 = scalar_lea.vmem %s42_s10, 64  ;;  %p2486_p6 = scmp.lt.s32.totalorder %s42_s10, %s42_s10 }
  0x2a   :  { %p2482_p5 = scmp.ne.s32.totalorder %s42_s10, %s2481_s27  ;;  %p2487_p7 = scmp.lt.s32.totalorder %s2481_s27, %s2481_s27 }
  0x2c   :  { %p2488_p8 = por %p2487_p7, %p2486_p6 }
  0x2e   :  { %p2489_p9 = pnand %p2488_p8, %p2482_p5 }
  0x30   :  { %2492 = shalt.err (!%p2489_p9)
}
  0x31   :  { %44 = dma.hbm_to_vmem [thread:$0]  %s2935_s3, 64, %s42_s10, [#allocation8]  }
  0x32   :  { %2493 = dma.done.wait [#allocation6], 512  }
  0x33   :  { %2494 = vsyncadd [#allocation6], 4294966784 }
  0x34   :  { %2495 = dma.done.wait [#allocation8], 576  }
  0x35   :  { %2496 = vsyncadd [#allocation8], 4294966720  ;;  %s60_s30 = sld [smem:[#allocation0]]   ;;  %s2510_s6 = smov 512  }
  0x36   :  { %72 = sst [smem:[#allocation11]] %s2510_s6  ;;  %s2511_s7 = smov 4  }
  0x37   :  { %74 = sst [smem:[#allocation11 + $0x1]] %s2510_s6  ;;  %s2512_s8 = smov 64  }
  0x38   :  { %76 = sst [smem:[#allocation11 + $0x2]] %s2511_s7  ;;  %s2513_s9 = smov 2  }
  0x39   :  { %78 = sst [smem:[#allocation11 + $0x3]] %s2512_s8  ;;  %s2514_s3 = smov [#allocation2]  }
  0x3a   :  { %80 = sst [smem:[#allocation11 + $0x4]] %s2506_s28  ;;  %s2598_s10 = sshll.u32 %s2514_s3, 4  ;;  %s69_s10 = int_to_ptr.vmem [resolvable:$true] %s2598_s10 }
  0x3b   :  { %82 = sst [smem:[#allocation11 + $0x5]] %s2513_s9  ;;  %s2334_s11 = sshll.u32 %s60_s30, 26 }
  0x3c   :  { %s2515_s12 = smov 256   ;;  %s2601_s13 = sadd.s32 134217728, %s2334_s11 }
  0x3d   :  { %84 = sst [smem:[#allocation11 + $0x6]] %s2515_s12  ;;  %s2516_s14 = smov [#allocation3]  }
  0x3e   :  { %86 = sst [smem:[#allocation11 + $0x7]] %s2512_s8  ;;  %s2517_s15 = smov [#allocation10]  }
  0x3f   :  { %88 = sst [smem:[#allocation11 + $0x8]] %s2511_s7 }
  0x40   :  { %90 = dma.general %s2933_s1, 16384, %s69_s10, %s2516_s14, %s2517_s15, [#allocation11], %s2601_s13, 0  }
  0x41   :  { %v91_v0 = vld [vmem:[#allocation5] sm:$0xff]  ;;  %v92_v1 = vld [vmem:[#allocation5 + $0x8] sm:$0xff]  ;;  %v93_v2 = vld [vmem:[#allocation5 + $0x10] sm:$0xff] }
  0x42   :  { %v94_v3 = vld [vmem:[#allocation5 + $0x18] sm:$0xff]  ;;  %v2613_v4 = vpack.c.bf16 %v91_v0, %v91_v0  ;;  %v96_v5 = vpack.c.bf16 %v92_v1, %v92_v1  ;;  %v2615_v6 = vpack.c.bf16 %v93_v2, %v93_v2 }
  0x43   :  { %v2617_v7 = vpack.c.bf16 %v94_v3, %v94_v3 }
  0x44   :  { %2497 = dma.done.wait [#allocation3], 16384 }
  0x45   :  { %2498 = vsyncadd [#allocation3], 4294950912  ;;  %301 = vmatprep.mubr.bf16.mxu0 %v96_v5  ;;  %383 = vmatprep.mubr.bf16.mxu1 %v96_v5  ;;  %121 = sst [smem:[#allocation13]] %s2510_s6  ;;  %s2518_s2 = smov [#allocation2 + $0x400]  }
  0x46   :  { %123 = sst [smem:[#allocation13 + $0x1]] %s2510_s6  ;;  %s2621_s18 = sshll.u32 %s2518_s2, 4  ;;  %s118_s18 = int_to_ptr.vmem [resolvable:$true] %s2621_s18 }
  0x47   :  { %125 = sst [smem:[#allocation13 + $0x2]] %s2511_s7  ;;  %s103_s21 = scalar_lea.hbm %s2933_s1, 16384 }
  0x48   :  { %127 = sst [smem:[#allocation13 + $0x3]] %s2512_s8  ;;  %s2519_s22 = smov [#allocation3 + $0x1]  }
  0x49   :  { %129 = sst [smem:[#allocation13 + $0x4]] %s2506_s28  ;;  %s2520_s23 = smov [#allocation12]  }
  0x4a   :  { %131 = sst [smem:[#allocation13 + $0x5]] %s2513_s9 }
  0x4b   :  { %133 = sst [smem:[#allocation13 + $0x6]] %s2515_s12 }
  0x4c   :  { %135 = sst [smem:[#allocation13 + $0x7]] %s2512_s8 }
  0x4d   :  { %137 = sst [smem:[#allocation13 + $0x8]] %s2511_s7 }
  0x4e   :  { %139 = dma.general %s103_s21, 16384, %s118_s18, %s2519_s22, %s2520_s23, [#allocation13], %s2601_s13, 0  }
  0x4f   :  { %v142_v8 = vld [vmem:[#allocation2 + $0x8] sm:$0xff]  ;;  %v144_v9 = vld [vmem:[#allocation2 + $0x18] sm:$0xff]  ;;  %v141_v10 = vld [vmem:[#allocation2] sm:$0xff] }
  0x50   :  { %269 = vmatprep.subr.bf16.mxu0 %v142_v8  ;;  %351 = vmatprep.subr.bf16.mxu1 %v144_v9  ;;  %v143_v11 = vld [vmem:[#allocation2 + $0x10] sm:$0xff]  ;;  %v146_v12 = vld [vmem:[#allocation2 + $0x28] sm:$0xff]  ;;  %v148_v13 = vld [vmem:[#allocation2 + $0x38] sm:$0xff] }
  0x51   :  { %270 = vmatpush1.bf16.msra.mxu0 %v141_v10  ;;  %352 = vmatpush1.bf16.msra.mxu1 %v143_v11  ;;  %v145_v14 = vld [vmem:[#allocation2 + $0x20] sm:$0xff]  ;;  %v147_v15 = vld [vmem:[#allocation2 + $0x30] sm:$0xff]  ;;  %v150_v16 = vld [vmem:[#allocation2 + $0x48] sm:$0xff] }
  0x52   :  { %271 = vmatprep.subr.bf16.mxu0 %v146_v12  ;;  %353 = vmatprep.subr.bf16.mxu1 %v148_v13  ;;  %v152_v17 = vld [vmem:[#allocation2 + $0x58] sm:$0xff]  ;;  %v149_v18 = vld [vmem:[#allocation2 + $0x40] sm:$0xff]  ;;  %v151_v19 = vld [vmem:[#allocation2 + $0x50] sm:$0xff] }
  0x53   :  { %v154_v20 = vld [vmem:[#allocation2 + $0x68] sm:$0xff]  ;;  %v156_v21 = vld [vmem:[#allocation2 + $0x78] sm:$0xff]  ;;  %v153_v22 = vld [vmem:[#allocation2 + $0x60] sm:$0xff] }
  0x54   :  { %v155_v23 = vld [vmem:[#allocation2 + $0x70] sm:$0xff]  ;;  %v158_v24 = vld [vmem:[#allocation2 + $0x88] sm:$0xff]  ;;  %v160_v25 = vld [vmem:[#allocation2 + $0x98] sm:$0xff] }
  0x55   :  { %272 = vmatpush1.bf16.msra.mxu0 %v145_v14  ;;  %354 = vmatpush1.bf16.msra.mxu1 %v147_v15  ;;  %v157_v26 = vld [vmem:[#allocation2 + $0x80] sm:$0xff]  ;;  %v159_v27 = vld [vmem:[#allocation2 + $0x90] sm:$0xff]  ;;  %v162_v28 = vld [vmem:[#allocation2 + $0xa8] sm:$0xff] }
  0x56   :  { %273 = vmatprep.subr.bf16.mxu0 %v150_v16  ;;  %355 = vmatprep.subr.bf16.mxu1 %v152_v17  ;;  %v164_v29 = vld [vmem:[#allocation2 + $0xb8] sm:$0xff]  ;;  %v161_v30 = vld [vmem:[#allocation2 + $0xa0] sm:$0xff]  ;;  %v163_v31 = vld [vmem:[#allocation2 + $0xb0] sm:$0xff] }
  0x57   :  { %v166_v32 = vld [vmem:[#allocation2 + $0xc8] sm:$0xff]  ;;  %v168_v33 = vld [vmem:[#allocation2 + $0xd8] sm:$0xff]  ;;  %v165_v34 = vld [vmem:[#allocation2 + $0xc0] sm:$0xff] }
  0x58   :  { %v167_v35 = vld [vmem:[#allocation2 + $0xd0] sm:$0xff]  ;;  %v170_v36 = vld [vmem:[#allocation2 + $0xe8] sm:$0xff]  ;;  %v172_v37 = vld [vmem:[#allocation2 + $0xf8] sm:$0xff] }
  0x59   :  { %274 = vmatpush1.bf16.msra.mxu0 %v149_v18  ;;  %356 = vmatpush1.bf16.msra.mxu1 %v151_v19  ;;  %v169_v38 = vld [vmem:[#allocation2 + $0xe0] sm:$0xff]  ;;  %v171_v39 = vld [vmem:[#allocation2 + $0xf0] sm:$0xff]  ;;  %v174_v40 = vld [vmem:[#allocation2 + $0x108] sm:$0xff] }
  0x5a   :  { %275 = vmatprep.subr.bf16.mxu0 %v154_v20  ;;  %357 = vmatprep.subr.bf16.mxu1 %v156_v21  ;;  %v176_v41 = vld [vmem:[#allocation2 + $0x118] sm:$0xff]  ;;  %v173_v42 = vld [vmem:[#allocation2 + $0x100] sm:$0xff]  ;;  %v175_v43 = vld [vmem:[#allocation2 + $0x110] sm:$0xff] }
  0x5b   :  { %v178_v44 = vld [vmem:[#allocation2 + $0x128] sm:$0xff]  ;;  %v180_v45 = vld [vmem:[#allocation2 + $0x138] sm:$0xff]  ;;  %v177_v46 = vld [vmem:[#allocation2 + $0x120] sm:$0xff] }
  0x5c   :  { %v179_v47 = vld [vmem:[#allocation2 + $0x130] sm:$0xff]  ;;  %v182_v48 = vld [vmem:[#allocation2 + $0x148] sm:$0xff]  ;;  %v184_v49 = vld [vmem:[#allocation2 + $0x158] sm:$0xff] }
  0x5d   :  { %276 = vmatpush1.bf16.msra.mxu0 %v153_v22  ;;  %358 = vmatpush1.bf16.msra.mxu1 %v155_v23  ;;  %v181_v50 = vld [vmem:[#allocation2 + $0x140] sm:$0xff]  ;;  %v183_v51 = vld [vmem:[#allocation2 + $0x150] sm:$0xff]  ;;  %v186_v52 = vld [vmem:[#allocation2 + $0x168] sm:$0xff] }
  0x5e   :  { %277 = vmatprep.subr.bf16.mxu0 %v158_v24  ;;  %359 = vmatprep.subr.bf16.mxu1 %v160_v25  ;;  %v188_v53 = vld [vmem:[#allocation2 + $0x178] sm:$0xff]  ;;  %v185_v54 = vld [vmem:[#allocation2 + $0x160] sm:$0xff]  ;;  %v187_v55 = vld [vmem:[#allocation2 + $0x170] sm:$0xff] }
  0x5f   :  { %v190_v56 = vld [vmem:[#allocation2 + $0x188] sm:$0xff]  ;;  %v192_v57 = vld [vmem:[#allocation2 + $0x198] sm:$0xff]  ;;  %v189_v58 = vld [vmem:[#allocation2 + $0x180] sm:$0xff] }
  0x60   :  { %v191_v59 = vld [vmem:[#allocation2 + $0x190] sm:$0xff]  ;;  %v194_v60 = vld [vmem:[#allocation2 + $0x1a8] sm:$0xff]  ;;  %v196_v61 = vld [vmem:[#allocation2 + $0x1b8] sm:$0xff] }
  0x61   :  { %278 = vmatpush1.bf16.msra.mxu0 %v157_v26  ;;  %360 = vmatpush1.bf16.msra.mxu1 %v159_v27  ;;  %v193_v62 = vld [vmem:[#allocation2 + $0x1a0] sm:$0xff]  ;;  %v195_v63 = vld [vmem:[#allocation2 + $0x1b0] sm:$0xff]  ;;  %v198_v0 = vld [vmem:[#allocation2 + $0x1c8] sm:$0xff] }
  0x62   :  { %279 = vmatprep.subr.bf16.mxu0 %v162_v28  ;;  %361 = vmatprep.subr.bf16.mxu1 %v164_v29  ;;  %v200_v1 = vld [vmem:[#allocation2 + $0x1d8] sm:$0xff]  ;;  %v197_v2 = vld [vmem:[#allocation2 + $0x1c0] sm:$0xff]  ;;  %v199_v3 = vld [vmem:[#allocation2 + $0x1d0] sm:$0xff] }
  0x63   :  { %v202_v5 = vld [vmem:[#allocation2 + $0x1e8] sm:$0xff]  ;;  %v204_v8 = vld [vmem:[#allocation2 + $0x1f8] sm:$0xff]  ;;  %v201_v9 = vld [vmem:[#allocation2 + $0x1e0] sm:$0xff] }
  0x64   :  { %v203_v10 = vld [vmem:[#allocation2 + $0x1f0] sm:$0xff]  ;;  %v206_v11 = vld [vmem:[#allocation2 + $0x208] sm:$0xff]  ;;  %v208_v12 = vld [vmem:[#allocation2 + $0x218] sm:$0xff] }
  0x65   :  { %280 = vmatpush1.bf16.msra.mxu0 %v161_v30  ;;  %362 = vmatpush1.bf16.msra.mxu1 %v163_v31  ;;  %v205_v13 = vld [vmem:[#allocation2 + $0x200] sm:$0xff]  ;;  %v207_v14 = vld [vmem:[#allocation2 + $0x210] sm:$0xff]  ;;  %v210_v15 = vld [vmem:[#allocation2 + $0x228] sm:$0xff] }
  0x66   :  { %281 = vmatprep.subr.bf16.mxu0 %v166_v32  ;;  %363 = vmatprep.subr.bf16.mxu1 %v168_v33  ;;  %v212_v16 = vld [vmem:[#allocation2 + $0x238] sm:$0xff]  ;;  %v209_v17 = vld [vmem:[#allocation2 + $0x220] sm:$0xff]  ;;  %v211_v18 = vld [vmem:[#allocation2 + $0x230] sm:$0xff] }
  0x67   :  { %v214_v19 = vld [vmem:[#allocation2 + $0x248] sm:$0xff]  ;;  %v216_v20 = vld [vmem:[#allocation2 + $0x258] sm:$0xff]  ;;  %v213_v21 = vld [vmem:[#allocation2 + $0x240] sm:$0xff] }
  0x68   :  { %v215_v22 = vld [vmem:[#allocation2 + $0x250] sm:$0xff]  ;;  %v218_v23 = vld [vmem:[#allocation2 + $0x268] sm:$0xff]  ;;  %v217_v24 = vld [vmem:[#allocation2 + $0x260] sm:$0xff] }
  0x69   :  { %282 = vmatpush1.bf16.msra.mxu0 %v165_v34  ;;  %364 = vmatpush1.bf16.msra.mxu1 %v167_v35  ;;  %v219_v25 = vld [vmem:[#allocation2 + $0x270] sm:$0xff]  ;;  %v222_v26 = vld [vmem:[#allocation2 + $0x288] sm:$0xff]  ;;  %v224_v27 = vld [vmem:[#allocation2 + $0x298] sm:$0xff] }
  0x6a   :  { %283 = vmatprep.subr.bf16.mxu0 %v170_v36  ;;  %365 = vmatprep.subr.bf16.mxu1 %v172_v37  ;;  %v223_v28 = vld [vmem:[#allocation2 + $0x290] sm:$0xff]  ;;  %v226_v29 = vld [vmem:[#allocation2 + $0x2a8] sm:$0xff]  ;;  %v228_v30 = vld [vmem:[#allocation2 + $0x2b8] sm:$0xff] }
  0x6b   :  { %v225_v31 = vld [vmem:[#allocation2 + $0x2a0] sm:$0xff]  ;;  %v227_v32 = vld [vmem:[#allocation2 + $0x2b0] sm:$0xff]  ;;  %v230_v33 = vld [vmem:[#allocation2 + $0x2c8] sm:$0xff] }
  0x6c   :  { %v232_v34 = vld [vmem:[#allocation2 + $0x2d8] sm:$0xff]  ;;  %v229_v35 = vld [vmem:[#allocation2 + $0x2c0] sm:$0xff]  ;;  %v231_v36 = vld [vmem:[#allocation2 + $0x2d0] sm:$0xff] }
  0x6d   :  { %284 = vmatpush1.bf16.msra.mxu0 %v169_v38  ;;  %366 = vmatpush1.bf16.msra.mxu1 %v171_v39  ;;  %v234_v37 = vld [vmem:[#allocation2 + $0x2e8] sm:$0xff]  ;;  %v236_v38 = vld [vmem:[#allocation2 + $0x2f8] sm:$0xff]  ;;  %v233_v39 = vld [vmem:[#allocation2 + $0x2e0] sm:$0xff] }
  0x6e   :  { %285 = vmatprep.subr.bf16.mxu0 %v174_v40  ;;  %367 = vmatprep.subr.bf16.mxu1 %v176_v41  ;;  %v235_v40 = vld [vmem:[#allocation2 + $0x2f0] sm:$0xff]  ;;  %v238_v41 = vld [vmem:[#allocation2 + $0x308] sm:$0xff] }
  0x71   :  { %286 = vmatpush1.bf16.msra.mxu0 %v173_v42  ;;  %368 = vmatpush1.bf16.msra.mxu1 %v175_v43  ;;  %v240_v42 = vld [vmem:[#allocation2 + $0x318] sm:$0xff]  ;;  %v237_v43 = vld [vmem:[#allocation2 + $0x300] sm:$0xff] }
  0x72   :  { %287 = vmatprep.subr.bf16.mxu0 %v178_v44  ;;  %369 = vmatprep.subr.bf16.mxu1 %v180_v45  ;;  %v239_v44 = vld [vmem:[#allocation2 + $0x310] sm:$0xff]  ;;  %v242_v45 = vld [vmem:[#allocation2 + $0x328] sm:$0xff] }
  0x75   :  { %288 = vmatpush1.bf16.msra.mxu0 %v177_v46  ;;  %370 = vmatpush1.bf16.msra.mxu1 %v179_v47  ;;  %v244_v46 = vld [vmem:[#allocation2 + $0x338] sm:$0xff]  ;;  %v241_v47 = vld [vmem:[#allocation2 + $0x320] sm:$0xff] }
  0x76   :  { %289 = vmatprep.subr.bf16.mxu0 %v182_v48  ;;  %371 = vmatprep.subr.bf16.mxu1 %v184_v49  ;;  %v243_v48 = vld [vmem:[#allocation2 + $0x330] sm:$0xff]  ;;  %v246_v49 = vld [vmem:[#allocation2 + $0x348] sm:$0xff] }
  0x79   :  { %290 = vmatpush1.bf16.msra.mxu0 %v181_v50  ;;  %372 = vmatpush1.bf16.msra.mxu1 %v183_v51  ;;  %v248_v50 = vld [vmem:[#allocation2 + $0x358] sm:$0xff]  ;;  %v245_v51 = vld [vmem:[#allocation2 + $0x340] sm:$0xff] }
  0x7a   :  { %291 = vmatprep.subr.bf16.mxu0 %v186_v52  ;;  %373 = vmatprep.subr.bf16.mxu1 %v188_v53  ;;  %v247_v52 = vld [vmem:[#allocation2 + $0x350] sm:$0xff]  ;;  %v250_v53 = vld [vmem:[#allocation2 + $0x368] sm:$0xff] }
  0x7d   :  { %292 = vmatpush1.bf16.msra.mxu0 %v185_v54  ;;  %374 = vmatpush1.bf16.msra.mxu1 %v187_v55  ;;  %v252_v54 = vld [vmem:[#allocation2 + $0x378] sm:$0xff]  ;;  %v249_v55 = vld [vmem:[#allocation2 + $0x360] sm:$0xff] }
  0x7e   :  { %293 = vmatprep.subr.bf16.mxu0 %v190_v56  ;;  %375 = vmatprep.subr.bf16.mxu1 %v192_v57  ;;  %v251_v56 = vld [vmem:[#allocation2 + $0x370] sm:$0xff]  ;;  %v254_v57 = vld [vmem:[#allocation2 + $0x388] sm:$0xff] }
  0x81   :  { %294 = vmatpush1.bf16.msra.mxu0 %v189_v58  ;;  %376 = vmatpush1.bf16.msra.mxu1 %v191_v59  ;;  %v256_v58 = vld [vmem:[#allocation2 + $0x398] sm:$0xff]  ;;  %v253_v59 = vld [vmem:[#allocation2 + $0x380] sm:$0xff] }
  0x82   :  { %295 = vmatprep.subr.bf16.mxu0 %v194_v60  ;;  %377 = vmatprep.subr.bf16.mxu1 %v196_v61  ;;  %v255_v60 = vld [vmem:[#allocation2 + $0x390] sm:$0xff]  ;;  %v258_v61 = vld [vmem:[#allocation2 + $0x3a8] sm:$0xff] }
  0x85   :  { %296 = vmatpush1.bf16.msra.mxu0 %v193_v62  ;;  %378 = vmatpush1.bf16.msra.mxu1 %v195_v63  ;;  %v260_v62 = vld [vmem:[#allocation2 + $0x3b8] sm:$0xff]  ;;  %v257_v63 = vld [vmem:[#allocation2 + $0x3a0] sm:$0xff] }
  0x86   :  { %297 = vmatprep.subr.bf16.mxu0 %v198_v0  ;;  %379 = vmatprep.subr.bf16.mxu1 %v200_v1  ;;  %v259_v0 = vld [vmem:[#allocation2 + $0x3b0] sm:$0xff]  ;;  %v262_v1 = vld [vmem:[#allocation2 + $0x3c8] sm:$0xff] }
  0x89   :  { %298 = vmatpush1.bf16.msra.mxu0 %v197_v2  ;;  %380 = vmatpush1.bf16.msra.mxu1 %v199_v3  ;;  %v264_v2 = vld [vmem:[#allocation2 + $0x3d8] sm:$0xff]  ;;  %v261_v3 = vld [vmem:[#allocation2 + $0x3c0] sm:$0xff] }
  0x8a   :  { %299 = vmatprep.subr.bf16.mxu0 %v202_v5  ;;  %381 = vmatprep.subr.bf16.mxu1 %v204_v8  ;;  %v263_v5 = vld [vmem:[#allocation2 + $0x3d0] sm:$0xff]  ;;  %v266_v8 = vld [vmem:[#allocation2 + $0x3e8] sm:$0xff] }
  0x8d   :  { %300 = vmatpush1.bf16.msra.mxu0 %v201_v9  ;;  %382 = vmatpush1.bf16.msra.mxu1 %v203_v10  ;;  %v268_v9 = vld [vmem:[#allocation2 + $0x3f8] sm:$0xff]  ;;  %v265_v10 = vld [vmem:[#allocation2 + $0x3e0] sm:$0xff] }
  0x8e   :  { %310 = vmatprep.subr.bf16.mxu0 %v206_v11  ;;  %392 = vmatprep.subr.bf16.mxu1 %v208_v12  ;;  %v267_v11 = vld [vmem:[#allocation2 + $0x3f0] sm:$0xff] }
  0x90   :  { %302 = vmatmul.mubr.bf16.vlgmr.msra.gmra.mrb[0].mxu0 %v2613_v4  ;;  %384 = vmatmul.mubr.bf16.vlgmr.msra.gmra.mrb[0].mxu1 %v2613_v4  ;;  %v220_v4 = vld [vmem:[#allocation2 + $0x278] sm:$0xff] }
  0x91   :  { %311 = vmatpush1.bf16.msra.mxu0 %v205_v13  ;;  %393 = vmatpush1.bf16.msra.mxu1 %v207_v14 }
  0x92   :  { %312 = vmatprep.subr.bf16.mxu0 %v210_v15  ;;  %394 = vmatprep.subr.bf16.mxu1 %v212_v16 }
  0x93   :  { %342 = vmatprep.mubr.bf16.mxu0 %v2617_v7  ;;  %424 = vmatprep.mubr.bf16.mxu1 %v2617_v7  ;;  %v221_v7 = vld [vmem:[#allocation2 + $0x280] sm:$0xff] }
  0x95   :  { %313 = vmatpush1.bf16.msra.mxu0 %v209_v17  ;;  %395 = vmatpush1.bf16.msra.mxu1 %v211_v18 }
  0x96   :  { %314 = vmatprep.subr.bf16.mxu0 %v214_v19  ;;  %396 = vmatprep.subr.bf16.mxu1 %v216_v20 }
  0x99   :  { %315 = vmatpush1.bf16.msra.mxu0 %v213_v21  ;;  %397 = vmatpush1.bf16.msra.mxu1 %v215_v22 }
  0x9a   :  { %316 = vmatprep.subr.bf16.mxu0 %v218_v23  ;;  %398 = vmatprep.subr.bf16.mxu1 %v220_v4 }
  0x9d   :  { %317 = vmatpush1.bf16.msra.mxu0 %v217_v24  ;;  %399 = vmatpush1.bf16.msra.mxu1 %v219_v25 }
  0x9e   :  { %318 = vmatprep.subr.bf16.mxu0 %v222_v26  ;;  %400 = vmatprep.subr.bf16.mxu1 %v224_v27 }
  0xa1   :  { %319 = vmatpush1.bf16.msra.mxu0 %v221_v7  ;;  %401 = vmatpush1.bf16.msra.mxu1 %v223_v28 }
  0xa2   :  { %320 = vmatprep.subr.bf16.mxu0 %v226_v29  ;;  %402 = vmatprep.subr.bf16.mxu1 %v228_v30 }
  0xa5   :  { %321 = vmatpush1.bf16.msra.mxu0 %v225_v31  ;;  %403 = vmatpush1.bf16.msra.mxu1 %v227_v32 }
  0xa6   :  { %322 = vmatprep.subr.bf16.mxu0 %v230_v33  ;;  %404 = vmatprep.subr.bf16.mxu1 %v232_v34 }
  0xa9   :  { %323 = vmatpush1.bf16.msra.mxu0 %v229_v35  ;;  %405 = vmatpush1.bf16.msra.mxu1 %v231_v36 }
  0xaa   :  { %324 = vmatprep.subr.bf16.mxu0 %v234_v37  ;;  %406 = vmatprep.subr.bf16.mxu1 %v236_v38 }
  0xad   :  { %325 = vmatpush1.bf16.msra.mxu0 %v233_v39  ;;  %407 = vmatpush1.bf16.msra.mxu1 %v235_v40 }
  0xae   :  { %326 = vmatprep.subr.bf16.mxu0 %v238_v41  ;;  %408 = vmatprep.subr.bf16.mxu1 %v240_v42 }
  0xb1   :  { %327 = vmatpush1.bf16.msra.mxu0 %v237_v43  ;;  %409 = vmatpush1.bf16.msra.mxu1 %v239_v44 }
  0xb2   :  { %328 = vmatprep.subr.bf16.mxu0 %v242_v45  ;;  %410 = vmatprep.subr.bf16.mxu1 %v244_v46 }
  0xb5   :  { %329 = vmatpush1.bf16.msra.mxu0 %v241_v47  ;;  %411 = vmatpush1.bf16.msra.mxu1 %v243_v48 }
  0xb6   :  { %330 = vmatprep.subr.bf16.mxu0 %v246_v49  ;;  %412 = vmatprep.subr.bf16.mxu1 %v248_v50 }
  0xb9   :  { %331 = vmatpush1.bf16.msra.mxu0 %v245_v51  ;;  %413 = vmatpush1.bf16.msra.mxu1 %v247_v52 }
  0xba   :  { %332 = vmatprep.subr.bf16.mxu0 %v250_v53  ;;  %414 = vmatprep.subr.bf16.mxu1 %v252_v54 }
  0xbd   :  { %333 = vmatpush1.bf16.msra.mxu0 %v249_v55  ;;  %415 = vmatpush1.bf16.msra.mxu1 %v251_v56 }
  0xbe   :  { %334 = vmatprep.subr.bf16.mxu0 %v254_v57  ;;  %416 = vmatprep.subr.bf16.mxu1 %v256_v58 }
  0xc1   :  { %335 = vmatpush1.bf16.msra.mxu0 %v253_v59  ;;  %417 = vmatpush1.bf16.msra.mxu1 %v255_v60 }
  0xc2   :  { %336 = vmatprep.subr.bf16.mxu0 %v258_v61  ;;  %418 = vmatprep.subr.bf16.mxu1 %v260_v62 }
  0xc5   :  { %337 = vmatpush1.bf16.msra.mxu0 %v257_v63  ;;  %419 = vmatpush1.bf16.msra.mxu1 %v259_v0 }
  0xc6   :  { %338 = vmatprep.subr.bf16.mxu0 %v262_v1  ;;  %420 = vmatprep.subr.bf16.mxu1 %v264_v2 }
  0xc9   :  { %339 = vmatpush1.bf16.msra.mxu0 %v261_v3  ;;  %421 = vmatpush1.bf16.msra.mxu1 %v263_v5 }
  0xca   :  { %340 = vmatprep.subr.bf16.mxu0 %v266_v8  ;;  %422 = vmatprep.subr.bf16.mxu1 %v268_v9 }
  0xcd   :  { %341 = vmatpush1.bf16.msra.mxu0 %v265_v10  ;;  %423 = vmatpush1.bf16.msra.mxu1 %v267_v11 }
  0xd0   :  { %343 = vmatmul.mubr.bf16.vlgmr.msra.gmra.mrb[0].mxu0 %v2615_v6  ;;  %425 = vmatmul.mubr.bf16.vlgmr.msra.gmra.mrb[0].mxu1 %v2615_v6 }
 0x1a3   :  { %v2644_v12 = vpop.f32.mrb[0].mxu0  ;;  %v2646_v13 = vpop.f32.mrb[0].mxu1 }
 0x1a4   :  { %v433_v14 = vrot.slane %v2644_v12, 4  ;;  %v457_v15 = vmul.f32 %v2644_v12, %v2644_v12  ;;  %v445_v16 = vrot.slane %v2646_v13, 4  ;;  %v459_v17 = vmul.f32 %v2646_v13, %v2646_v13  ;;  %v2654_v18 = vpop.f32.mrb[1].mxu0  ;;  %v2656_v19 = vpop.f32.mrb[1].mxu1 }
 0x1a5   :  { %v439_v6 = vrot.slane %v2654_v18, 4  ;;  %v458_v20 = vmul.f32 %v2654_v18, %v2654_v18  ;;  %v451_v21 = vrot.slane %v2656_v19, 4  ;;  %v460_v22 = vmul.f32 %v2656_v19, %v2656_v19  ;;  %v348_v23 = vpop.f32.mrb[2].mxu0  ;;  %v430_v4 = vpop.f32.mrb[2].mxu1 }
 0x1a6   :  { %v434_v24 = vadd.f32 %v433_v14, %v2644_v12  ;;  %v461_v25 = vrot.slane %v457_v15, 4  ;;  %v446_v26 = vadd.f32 %v445_v16, %v2646_v13  ;;  %v473_v27 = vrot.slane %v459_v17, 4  ;;  %v349_v7 = vpop.f32.mrb[3].mxu0  ;;  %v431_v28 = vpop.f32.mrb[3].mxu1 }
 0x1a7   :  { %v440_v29 = vadd.f32 %v439_v6, %v2654_v18  ;;  %v467_v30 = vrot.slane %v458_v20, 4  ;;  %v452_v31 = vadd.f32 %v451_v21, %v2656_v19  ;;  %v479_v32 = vrot.slane %v460_v22, 4 }
 0x1a8   :  { %v435_v33 = vrot.slane %v434_v24, 2  ;;  %v462_v34 = vadd.f32 %v461_v25, %v457_v15  ;;  %v447_v35 = vrot.slane %v446_v26, 2  ;;  %v474_v36 = vadd.f32 %v473_v27, %v459_v17 }
 0x1a9   :  { %v441_v37 = vrot.slane %v440_v29, 2  ;;  %v468_v38 = vadd.f32 %v467_v30, %v458_v20  ;;  %v453_v39 = vrot.slane %v452_v31, 2  ;;  %v480_v40 = vadd.f32 %v479_v32, %v460_v22 }
 0x1aa   :  { %v436_v41 = vadd.f32 %v435_v33, %v434_v24  ;;  %v463_v42 = vrot.slane %v462_v34, 2  ;;  %v448_v43 = vadd.f32 %v447_v35, %v446_v26  ;;  %v475_v44 = vrot.slane %v474_v36, 2 }
 0x1ab   :  { %v442_v45 = vadd.f32 %v441_v37, %v440_v29  ;;  %v469_v46 = vrot.slane %v468_v38, 2  ;;  %v454_v47 = vadd.f32 %v453_v39, %v452_v31  ;;  %v481_v48 = vrot.slane %v480_v40, 2 }
 0x1ac   :  { %v437_v49 = vrot.slane %v436_v41, 1  ;;  %v464_v50 = vadd.f32 %v463_v42, %v462_v34  ;;  %v449_v51 = vrot.slane %v448_v43, 1  ;;  %v476_v52 = vadd.f32 %v475_v44, %v474_v36 }
 0x1ad   :  { %v443_v53 = vrot.slane %v442_v45, 1  ;;  %v470_v54 = vadd.f32 %v469_v46, %v468_v38  ;;  %v455_v55 = vrot.slane %v454_v47, 1  ;;  %v482_v56 = vadd.f32 %v481_v48, %v480_v40 }
 0x1ae   :  { %v438_v57 = vadd.f32 %v437_v49, %v436_v41  ;;  %v465_v58 = vrot.slane %v464_v50, 1  ;;  %v450_v59 = vadd.f32 %v449_v51, %v448_v43  ;;  %v477_v60 = vrot.slane %v476_v52, 1 }
 0x1af   :  { %v444_v61 = vadd.f32 %v443_v53, %v442_v45  ;;  %v471_v62 = vrot.slane %v470_v54, 1  ;;  %v456_v63 = vadd.f32 %v455_v55, %v454_v47  ;;  %v483_v0 = vrot.slane %v482_v56, 1  ;;  %v140_v47 = vld [vmem:[#allocation7] sm:$0xff] }
 0x1b0   :  { %v466_v1 = vadd.f32 %v465_v58, %v464_v50  ;;  %v485_v2 = vmul.f32 0.125, %v438_v57  ;;  %v478_v3 = vadd.f32 %v477_v60, %v476_v52  ;;  %v487_v5 = vmul.f32 0.125, %v450_v59 }
 0x1b1   :  { %v472_v8 = vadd.f32 %v471_v62, %v470_v54  ;;  %v486_v9 = vmul.f32 0.125, %v444_v61  ;;  %v484_v10 = vadd.f32 %v483_v0, %v482_v56  ;;  %v488_v11 = vmul.f32 0.125, %v456_v63 }
 0x1b2   :  { %v489_v14 = vmul.f32 0.125, %v466_v1  ;;  %v493_v15 = vmul.f32 %v485_v2, %v485_v2  ;;  %v491_v16 = vmul.f32 0.125, %v478_v3  ;;  %v495_v17 = vmul.f32 %v487_v5, %v487_v5 }
 0x1b3   :  { %v490_v6 = vmul.f32 0.125, %v472_v8  ;;  %v494_v20 = vmul.f32 %v486_v9, %v486_v9  ;;  %v492_v21 = vmul.f32 0.125, %v484_v10  ;;  %v496_v22 = vmul.f32 %v488_v11, %v488_v11 }
 0x1b4   :  { %v497_v23 = vsub.f32 %v489_v14, %v493_v15  ;;  %v499_v4 = vsub.f32 %v491_v16, %v495_v17  ;;  %v2521_v33 = vmov 1983009808   ;;  %v522_v35 = vlaneseq }
 0x1b5   :  { %v498_v24 = vsub.f32 %v490_v6, %v494_v20  ;;  %v500_v25 = vsub.f32 %v492_v21, %v496_v22  ;;  %v520_v34 = vunpack.c.l.s4 %v2521_v33 }
 0x1b6   :  { %v501_v26 = vmax.f32 %v497_v23, 0.0  ;;  %v503_v27 = vmax.f32 %v499_v4, 0.0  ;;  %v523_v37 = vshrl.u32 %v522_v35, 7 }
 0x1b7   :  { %v502_v7 = vmax.f32 %v498_v24, 0.0  ;;  %v504_v28 = vmax.f32 %v500_v25, 0.0  ;;  %v521_v36 = vunpack.c.0.s8 %v520_v34 }
 0x1b8   :  { %v505_v29 = vadd.f32 1e-05, %v501_v26  ;;  %v507_v30 = vadd.f32 1e-05, %v503_v27  ;;  %v2672_v48 = vsub.s32 0, %v523_v37  ;;  %v2674_v50 = vsub.s32 2, %v523_v37 }
 0x1b9   :  { %v506_v31 = vadd.f32 1e-05, %v502_v7  ;;  %v508_v32 = vadd.f32 1e-05, %v504_v28  ;;  %v2668_v40 = vsub.s32 %v521_v36, %v523_v37  ;;  %v2676_v51 = vsub.s32 4, %v523_v37 }
 0x1ba   :  { %2395 = vrsqrt.f32 %v505_v29  ;;  %v2678_v52 = vsub.s32 6, %v523_v37  ;;  %v2694_v16 = vsub.s32 1, %v523_v37  ;;  %v2696_v6 = vsub.s32 3, %v523_v37 }
 0x1bb   :  { %2397 = vrsqrt.f32 %v507_v30  ;;  %v2698_v20 = vsub.s32 5, %v523_v37  ;;  %v2700_v21 = vsub.s32 7, %v523_v37 }
 0x1bc   :  { %2399 = vrsqrt.f32 %v506_v31 }
 0x1bd   :  { %2401 = vrsqrt.f32 %v508_v32 }
 0x1c4   :  { %v2396_v38 = vpop.eup %2395 }
 0x1c5   :  { %v2398_v39 = vpop.eup %2397 }
 0x1c6   :  { %v2400_v41 = vpop.eup %2399 }
 0x1c7   :  { %v2402_v42 = vpop.eup %2401  ;;  %v517_v43 = vcombine.low %v2396_v38, %v2400_v41 }
 0x1c8   :  { %v518_v44 = vcombine.low %v2398_v39, %v2402_v42 }
 0x1c9   :  { %v525_v45 = vrot.slane %v517_v43, %v2668_v40 }
 0x1ca   :  { %v532_v46 = vrot.slane %v518_v44, %v2668_v40 }
 0x1cc   :  { %v533_v49 = vcombine.low %v525_v45, %v532_v46 }
 0x1ce   :  { %v535_v53 = vmul.f32 %v533_v49, %v140_v47 }
 0x1d0   :  { %v540_v54 = vrot.slane %v535_v53, %v2672_v48  ;;  %v544_v55 = vrot.slane %v535_v53, %v2674_v50  ;;  %v548_v56 = vrot.slane %v535_v53, %v2676_v51  ;;  %v552_v57 = vrot.slane %v535_v53, %v2678_v52 }
 0x1d2   :  { %v557_v58 = vmul.f32 %v540_v54, %v485_v2  ;;  %v558_v59 = vmul.f32 %v544_v55, %v486_v9  ;;  %v559_v60 = vmul.f32 %v548_v56, %v487_v5  ;;  %v560_v61 = vmul.f32 %v552_v57, %v488_v11 }
 0x1d3   :  { %v588_v62 = vrot.slane %v540_v54, %v2672_v48  ;;  %v592_v63 = vrot.slane %v544_v55, %v2672_v48  ;;  %v596_v0 = vrot.slane %v548_v56, %v2672_v48  ;;  %v600_v1 = vrot.slane %v552_v57, %v2672_v48 }
 0x1d4   :  { %v565_v3 = vcombine.low %v557_v58, %v558_v59  ;;  %v566_v8 = vcombine.low %v559_v60, %v560_v61 }
 0x1d5   :  { %v601_v10 = vmul.f32 %v588_v62, %v2644_v12  ;;  %v602_v14 = vmul.f32 %v592_v63, %v2654_v18  ;;  %v603_v15 = vmul.f32 %v596_v0, %v2646_v13  ;;  %v604_v2 = vmul.f32 %v600_v1, %v2656_v19 }
 0x1d6   :  { %v573_v5 = vrot.slane %v565_v3, %v2668_v40  ;;  %v580_v9 = vrot.slane %v566_v8, %v2668_v40 }
 0x1d8   :  { %v581_v11 = vcombine.low %v573_v5, %v580_v9 }
 0x1da   :  { %v582_v17 = vrot.slane %v581_v11, 7 }
 0x1dc   :  { %v584_v12 = vsub.f32 %v140_v47, %v582_v17 }
 0x1de   :  { %v609_v18 = vrot.slane %v584_v12, %v2694_v16  ;;  %v613_v13 = vrot.slane %v584_v12, %v2696_v6  ;;  %v617_v19 = vrot.slane %v584_v12, %v2698_v20  ;;  %v621_v22 = vrot.slane %v584_v12, %v2700_v21 }
 0x1e0   :  { %v629_v23 = vrot.slane %v609_v18, %v2694_v16  ;;  %v633_v4 = vrot.slane %v613_v13, %v2694_v16  ;;  %v637_v24 = vrot.slane %v617_v19, %v2694_v16  ;;  %v641_v25 = vrot.slane %v621_v22, %v2694_v16 }
 0x1e2   :  { %v642_v26 = vadd.f32 %v629_v23, %v601_v10  ;;  %v643_v27 = vadd.f32 %v633_v4, %v602_v14  ;;  %v644_v7 = vadd.f32 %v637_v24, %v603_v15  ;;  %v645_v28 = vadd.f32 %v641_v25, %v604_v2 }
 0x1e4   :  { %v646_v29 = vmax.f32 %v642_v26, 0.0  ;;  %v647_v30 = vmax.f32 %v643_v27, 0.0  ;;  %v648_v31 = vmax.f32 %v644_v7, 0.0  ;;  %v649_v32 = vmax.f32 %v645_v28, 0.0 }
 0x1e6   :  { %v2710_v33 = vpack.c.bf16 %v646_v29, %v646_v29  ;;  %v651_v34 = vpack.c.bf16 %v647_v30, %v647_v30  ;;  %v2712_v35 = vpack.c.bf16 %v648_v31, %v648_v31  ;;  %v2714_v36 = vpack.c.bf16 %v649_v32, %v649_v32 }
 0x1e7   :  { %2499 = dma.done.wait [#allocation3 + $0x1], 16384 }
 0x1e8   :  { %2500 = vsyncadd [#allocation3 + $0x1], 4294950912  ;;  %853 = vmatprep.mubr.bf16.mxu0 %v651_v34  ;;  %935 = vmatprep.mubr.bf16.mxu1 %v651_v34  ;;  %672 = sst [smem:[#allocation15]] %s2510_s6  ;;  %s656_s26 = scalar_lea.hbm %s2933_s1, 32768 }
 0x1e9   :  { %674 = sst [smem:[#allocation15 + $0x1]] %s2510_s6  ;;  %s2522_s27 = smov [#allocation14]  }
 0x1ea   :  { %676 = sst [smem:[#allocation15 + $0x2]] %s2511_s7 }
 0x1eb   :  { %678 = sst [smem:[#allocation15 + $0x3]] %s2512_s8 }
 0x1ec   :  { %680 = sst [smem:[#allocation15 + $0x4]] %s2506_s28 }
 0x1ed   :  { %682 = sst [smem:[#allocation15 + $0x5]] %s2513_s9 }
 0x1ee   :  { %684 = sst [smem:[#allocation15 + $0x6]] %s2515_s12 }
 0x1ef   :  { %686 = sst [smem:[#allocation15 + $0x7]] %s2512_s8 }
 0x1f0   :  { %688 = sst [smem:[#allocation15 + $0x8]] %s2511_s7 }
 0x1f1   :  { %690 = dma.general %s656_s26, 16384, %s69_s10, %s2516_s14, %s2522_s27, [#allocation15], %s2601_s13, 0  }
 0x1f2   :  { %v694_v37 = vld [vmem:[#allocation2 + $0x408] sm:$0xff]  ;;  %v696_v38 = vld [vmem:[#allocation2 + $0x418] sm:$0xff]  ;;  %v693_v39 = vld [vmem:[#allocation2 + $0x400] sm:$0xff] }
 0x1f3   :  { %821 = vmatprep.subr.bf16.mxu0 %v694_v37  ;;  %903 = vmatprep.subr.bf16.mxu1 %v696_v38  ;;  %v695_v41 = vld [vmem:[#allocation2 + $0x410] sm:$0xff]  ;;  %v698_v42 = vld [vmem:[#allocation2 + $0x428] sm:$0xff]  ;;  %v700_v43 = vld [vmem:[#allocation2 + $0x438] sm:$0xff] }
 0x1f4   :  { %822 = vmatpush1.bf16.msra.mxu0 %v693_v39  ;;  %904 = vmatpush1.bf16.msra.mxu1 %v695_v41  ;;  %v697_v44 = vld [vmem:[#allocation2 + $0x420] sm:$0xff]  ;;  %v699_v45 = vld [vmem:[#allocation2 + $0x430] sm:$0xff]  ;;  %v702_v46 = vld [vmem:[#allocation2 + $0x448] sm:$0xff] }
 0x1f5   :  { %823 = vmatprep.subr.bf16.mxu0 %v698_v42  ;;  %905 = vmatprep.subr.bf16.mxu1 %v700_v43  ;;  %v704_v47 = vld [vmem:[#allocation2 + $0x458] sm:$0xff]  ;;  %v701_v49 = vld [vmem:[#allocation2 + $0x440] sm:$0xff]  ;;  %v703_v53 = vld [vmem:[#allocation2 + $0x450] sm:$0xff] }
 0x1f6   :  { %v706_v54 = vld [vmem:[#allocation2 + $0x468] sm:$0xff]  ;;  %v708_v55 = vld [vmem:[#allocation2 + $0x478] sm:$0xff]  ;;  %v705_v56 = vld [vmem:[#allocation2 + $0x460] sm:$0xff] }
 0x1f7   :  { %v707_v57 = vld [vmem:[#allocation2 + $0x470] sm:$0xff]  ;;  %v710_v58 = vld [vmem:[#allocation2 + $0x488] sm:$0xff]  ;;  %v712_v59 = vld [vmem:[#allocation2 + $0x498] sm:$0xff] }
 0x1f8   :  { %824 = vmatpush1.bf16.msra.mxu0 %v697_v44  ;;  %906 = vmatpush1.bf16.msra.mxu1 %v699_v45  ;;  %v709_v60 = vld [vmem:[#allocation2 + $0x480] sm:$0xff]  ;;  %v711_v61 = vld [vmem:[#allocation2 + $0x490] sm:$0xff]  ;;  %v714_v62 = vld [vmem:[#allocation2 + $0x4a8] sm:$0xff] }
 0x1f9   :  { %825 = vmatprep.subr.bf16.mxu0 %v702_v46  ;;  %907 = vmatprep.subr.bf16.mxu1 %v704_v47  ;;  %v716_v63 = vld [vmem:[#allocation2 + $0x4b8] sm:$0xff]  ;;  %v713_v0 = vld [vmem:[#allocation2 + $0x4a0] sm:$0xff]  ;;  %v715_v1 = vld [vmem:[#allocation2 + $0x4b0] sm:$0xff] }
 0x1fa   :  { %v718_v3 = vld [vmem:[#allocation2 + $0x4c8] sm:$0xff]  ;;  %v720_v8 = vld [vmem:[#allocation2 + $0x4d8] sm:$0xff]  ;;  %v717_v10 = vld [vmem:[#allocation2 + $0x4c0] sm:$0xff] }
 0x1fb   :  { %v719_v14 = vld [vmem:[#allocation2 + $0x4d0] sm:$0xff]  ;;  %v722_v15 = vld [vmem:[#allocation2 + $0x4e8] sm:$0xff]  ;;  %v724_v2 = vld [vmem:[#allocation2 + $0x4f8] sm:$0xff] }
 0x1fc   :  { %826 = vmatpush1.bf16.msra.mxu0 %v701_v49  ;;  %908 = vmatpush1.bf16.msra.mxu1 %v703_v53  ;;  %v721_v5 = vld [vmem:[#allocation2 + $0x4e0] sm:$0xff]  ;;  %v723_v9 = vld [vmem:[#allocation2 + $0x4f0] sm:$0xff]  ;;  %v726_v11 = vld [vmem:[#allocation2 + $0x508] sm:$0xff] }
 0x1fd   :  { %827 = vmatprep.subr.bf16.mxu0 %v706_v54  ;;  %909 = vmatprep.subr.bf16.mxu1 %v708_v55  ;;  %v728_v17 = vld [vmem:[#allocation2 + $0x518] sm:$0xff]  ;;  %v725_v12 = vld [vmem:[#allocation2 + $0x500] sm:$0xff]  ;;  %v727_v18 = vld [vmem:[#allocation2 + $0x510] sm:$0xff] }
 0x1fe   :  { %v730_v13 = vld [vmem:[#allocation2 + $0x528] sm:$0xff]  ;;  %v732_v19 = vld [vmem:[#allocation2 + $0x538] sm:$0xff]  ;;  %v729_v22 = vld [vmem:[#allocation2 + $0x520] sm:$0xff] }
 0x1ff   :  { %v731_v23 = vld [vmem:[#allocation2 + $0x530] sm:$0xff]  ;;  %v734_v4 = vld [vmem:[#allocation2 + $0x548] sm:$0xff]  ;;  %v736_v24 = vld [vmem:[#allocation2 + $0x558] sm:$0xff] }
 0x200   :  { %828 = vmatpush1.bf16.msra.mxu0 %v705_v56  ;;  %910 = vmatpush1.bf16.msra.mxu1 %v707_v57  ;;  %v733_v25 = vld [vmem:[#allocation2 + $0x540] sm:$0xff]  ;;  %v735_v26 = vld [vmem:[#allocation2 + $0x550] sm:$0xff]  ;;  %v738_v27 = vld [vmem:[#allocation2 + $0x568] sm:$0xff] }
 0x201   :  { %829 = vmatprep.subr.bf16.mxu0 %v710_v58  ;;  %911 = vmatprep.subr.bf16.mxu1 %v712_v59  ;;  %v740_v7 = vld [vmem:[#allocation2 + $0x578] sm:$0xff]  ;;  %v737_v28 = vld [vmem:[#allocation2 + $0x560] sm:$0xff]  ;;  %v739_v29 = vld [vmem:[#allocation2 + $0x570] sm:$0xff] }
 0x202   :  { %v742_v30 = vld [vmem:[#allocation2 + $0x588] sm:$0xff]  ;;  %v744_v31 = vld [vmem:[#allocation2 + $0x598] sm:$0xff]  ;;  %v741_v32 = vld [vmem:[#allocation2 + $0x580] sm:$0xff] }
 0x203   :  { %v743_v34 = vld [vmem:[#allocation2 + $0x590] sm:$0xff]  ;;  %v746_v37 = vld [vmem:[#allocation2 + $0x5a8] sm:$0xff]  ;;  %v748_v38 = vld [vmem:[#allocation2 + $0x5b8] sm:$0xff] }
 0x204   :  { %830 = vmatpush1.bf16.msra.mxu0 %v709_v60  ;;  %912 = vmatpush1.bf16.msra.mxu1 %v711_v61  ;;  %v745_v39 = vld [vmem:[#allocation2 + $0x5a0] sm:$0xff]  ;;  %v747_v41 = vld [vmem:[#allocation2 + $0x5b0] sm:$0xff]  ;;  %v750_v42 = vld [vmem:[#allocation2 + $0x5c8] sm:$0xff] }
 0x205   :  { %831 = vmatprep.subr.bf16.mxu0 %v714_v62  ;;  %913 = vmatprep.subr.bf16.mxu1 %v716_v63  ;;  %v752_v43 = vld [vmem:[#allocation2 + $0x5d8] sm:$0xff]  ;;  %v749_v44 = vld [vmem:[#allocation2 + $0x5c0] sm:$0xff]  ;;  %v751_v45 = vld [vmem:[#allocation2 + $0x5d0] sm:$0xff] }
 0x206   :  { %v754_v46 = vld [vmem:[#allocation2 + $0x5e8] sm:$0xff]  ;;  %v756_v47 = vld [vmem:[#allocation2 + $0x5f8] sm:$0xff]  ;;  %v753_v49 = vld [vmem:[#allocation2 + $0x5e0] sm:$0xff] }
 0x207   :  { %v755_v53 = vld [vmem:[#allocation2 + $0x5f0] sm:$0xff]  ;;  %v758_v54 = vld [vmem:[#allocation2 + $0x608] sm:$0xff]  ;;  %v760_v55 = vld [vmem:[#allocation2 + $0x618] sm:$0xff] }
 0x208   :  { %832 = vmatpush1.bf16.msra.mxu0 %v713_v0  ;;  %914 = vmatpush1.bf16.msra.mxu1 %v715_v1  ;;  %v757_v56 = vld [vmem:[#allocation2 + $0x600] sm:$0xff]  ;;  %v759_v57 = vld [vmem:[#allocation2 + $0x610] sm:$0xff]  ;;  %v762_v58 = vld [vmem:[#allocation2 + $0x628] sm:$0xff] }
 0x209   :  { %833 = vmatprep.subr.bf16.mxu0 %v718_v3  ;;  %915 = vmatprep.subr.bf16.mxu1 %v720_v8  ;;  %v764_v59 = vld [vmem:[#allocation2 + $0x638] sm:$0xff]  ;;  %v761_v60 = vld [vmem:[#allocation2 + $0x620] sm:$0xff]  ;;  %v763_v61 = vld [vmem:[#allocation2 + $0x630] sm:$0xff] }
 0x20a   :  { %v766_v62 = vld [vmem:[#allocation2 + $0x648] sm:$0xff]  ;;  %v768_v63 = vld [vmem:[#allocation2 + $0x658] sm:$0xff]  ;;  %v765_v0 = vld [vmem:[#allocation2 + $0x640] sm:$0xff] }
 0x20b   :  { %v767_v1 = vld [vmem:[#allocation2 + $0x650] sm:$0xff]  ;;  %v770_v3 = vld [vmem:[#allocation2 + $0x668] sm:$0xff]  ;;  %v769_v8 = vld [vmem:[#allocation2 + $0x660] sm:$0xff] }
 0x20c   :  { %834 = vmatpush1.bf16.msra.mxu0 %v717_v10  ;;  %916 = vmatpush1.bf16.msra.mxu1 %v719_v14  ;;  %v771_v10 = vld [vmem:[#allocation2 + $0x670] sm:$0xff]  ;;  %v774_v14 = vld [vmem:[#allocation2 + $0x688] sm:$0xff] }
 0x20d   :  { %835 = vmatprep.subr.bf16.mxu0 %v722_v15  ;;  %917 = vmatprep.subr.bf16.mxu1 %v724_v2  ;;  %v776_v15 = vld [vmem:[#allocation2 + $0x698] sm:$0xff]  ;;  %v775_v2 = vld [vmem:[#allocation2 + $0x690] sm:$0xff] }
 0x210   :  { %836 = vmatpush1.bf16.msra.mxu0 %v721_v5  ;;  %918 = vmatpush1.bf16.msra.mxu1 %v723_v9  ;;  %v778_v5 = vld [vmem:[#allocation2 + $0x6a8] sm:$0xff]  ;;  %v780_v9 = vld [vmem:[#allocation2 + $0x6b8] sm:$0xff] }
 0x211   :  { %837 = vmatprep.subr.bf16.mxu0 %v726_v11  ;;  %919 = vmatprep.subr.bf16.mxu1 %v728_v17  ;;  %v777_v11 = vld [vmem:[#allocation2 + $0x6a0] sm:$0xff]  ;;  %v779_v17 = vld [vmem:[#allocation2 + $0x6b0] sm:$0xff] }
 0x214   :  { %838 = vmatpush1.bf16.msra.mxu0 %v725_v12  ;;  %920 = vmatpush1.bf16.msra.mxu1 %v727_v18  ;;  %v782_v12 = vld [vmem:[#allocation2 + $0x6c8] sm:$0xff]  ;;  %v784_v18 = vld [vmem:[#allocation2 + $0x6d8] sm:$0xff] }
 0x215   :  { %839 = vmatprep.subr.bf16.mxu0 %v730_v13  ;;  %921 = vmatprep.subr.bf16.mxu1 %v732_v19  ;;  %v781_v13 = vld [vmem:[#allocation2 + $0x6c0] sm:$0xff]  ;;  %v783_v19 = vld [vmem:[#allocation2 + $0x6d0] sm:$0xff] }
 0x218   :  { %840 = vmatpush1.bf16.msra.mxu0 %v729_v22  ;;  %922 = vmatpush1.bf16.msra.mxu1 %v731_v23  ;;  %v786_v22 = vld [vmem:[#allocation2 + $0x6e8] sm:$0xff]  ;;  %v788_v23 = vld [vmem:[#allocation2 + $0x6f8] sm:$0xff] }
 0x219   :  { %841 = vmatprep.subr.bf16.mxu0 %v734_v4  ;;  %923 = vmatprep.subr.bf16.mxu1 %v736_v24  ;;  %v785_v4 = vld [vmem:[#allocation2 + $0x6e0] sm:$0xff]  ;;  %v787_v24 = vld [vmem:[#allocation2 + $0x6f0] sm:$0xff] }
 0x21c   :  { %842 = vmatpush1.bf16.msra.mxu0 %v733_v25  ;;  %924 = vmatpush1.bf16.msra.mxu1 %v735_v26  ;;  %v790_v25 = vld [vmem:[#allocation2 + $0x708] sm:$0xff]  ;;  %v792_v26 = vld [vmem:[#allocation2 + $0x718] sm:$0xff] }
 0x21d   :  { %843 = vmatprep.subr.bf16.mxu0 %v738_v27  ;;  %925 = vmatprep.subr.bf16.mxu1 %v740_v7  ;;  %v789_v27 = vld [vmem:[#allocation2 + $0x700] sm:$0xff]  ;;  %v791_v7 = vld [vmem:[#allocation2 + $0x710] sm:$0xff] }
 0x220   :  { %844 = vmatpush1.bf16.msra.mxu0 %v737_v28  ;;  %926 = vmatpush1.bf16.msra.mxu1 %v739_v29  ;;  %v794_v28 = vld [vmem:[#allocation2 + $0x728] sm:$0xff]  ;;  %v796_v29 = vld [vmem:[#allocation2 + $0x738] sm:$0xff] }
 0x221   :  { %845 = vmatprep.subr.bf16.mxu0 %v742_v30  ;;  %927 = vmatprep.subr.bf16.mxu1 %v744_v31  ;;  %v793_v30 = vld [vmem:[#allocation2 + $0x720] sm:$0xff]  ;;  %v795_v31 = vld [vmem:[#allocation2 + $0x730] sm:$0xff] }
 0x224   :  { %846 = vmatpush1.bf16.msra.mxu0 %v741_v32  ;;  %928 = vmatpush1.bf16.msra.mxu1 %v743_v34  ;;  %v798_v32 = vld [vmem:[#allocation2 + $0x748] sm:$0xff]  ;;  %v800_v34 = vld [vmem:[#allocation2 + $0x758] sm:$0xff] }
 0x225   :  { %847 = vmatprep.subr.bf16.mxu0 %v746_v37  ;;  %929 = vmatprep.subr.bf16.mxu1 %v748_v38  ;;  %v797_v37 = vld [vmem:[#allocation2 + $0x740] sm:$0xff]  ;;  %v799_v38 = vld [vmem:[#allocation2 + $0x750] sm:$0xff] }
 0x228   :  { %848 = vmatpush1.bf16.msra.mxu0 %v745_v39  ;;  %930 = vmatpush1.bf16.msra.mxu1 %v747_v41  ;;  %v802_v39 = vld [vmem:[#allocation2 + $0x768] sm:$0xff]  ;;  %v804_v41 = vld [vmem:[#allocation2 + $0x778] sm:$0xff] }
 0x229   :  { %849 = vmatprep.subr.bf16.mxu0 %v750_v42  ;;  %931 = vmatprep.subr.bf16.mxu1 %v752_v43  ;;  %v801_v42 = vld [vmem:[#allocation2 + $0x760] sm:$0xff]  ;;  %v803_v43 = vld [vmem:[#allocation2 + $0x770] sm:$0xff] }
 0x22c   :  { %850 = vmatpush1.bf16.msra.mxu0 %v749_v44  ;;  %932 = vmatpush1.bf16.msra.mxu1 %v751_v45  ;;  %v806_v44 = vld [vmem:[#allocation2 + $0x788] sm:$0xff]  ;;  %v808_v45 = vld [vmem:[#allocation2 + $0x798] sm:$0xff] }
 0x22d   :  { %851 = vmatprep.subr.bf16.mxu0 %v754_v46  ;;  %933 = vmatprep.subr.bf16.mxu1 %v756_v47  ;;  %v805_v46 = vld [vmem:[#allocation2 + $0x780] sm:$0xff]  ;;  %v807_v47 = vld [vmem:[#allocation2 + $0x790] sm:$0xff] }
 0x230   :  { %852 = vmatpush1.bf16.msra.mxu0 %v753_v49  ;;  %934 = vmatpush1.bf16.msra.mxu1 %v755_v53  ;;  %v810_v49 = vld [vmem:[#allocation2 + $0x7a8] sm:$0xff]  ;;  %v812_v53 = vld [vmem:[#allocation2 + $0x7b8] sm:$0xff] }
 0x231   :  { %862 = vmatprep.subr.bf16.mxu0 %v758_v54  ;;  %944 = vmatprep.subr.bf16.mxu1 %v760_v55  ;;  %v809_v54 = vld [vmem:[#allocation2 + $0x7a0] sm:$0xff]  ;;  %v811_v55 = vld [vmem:[#allocation2 + $0x7b0] sm:$0xff] }
 0x233   :  { %854 = vmatmul.mubr.bf16.vlgmr.msra.gmra.mrb[4].mxu0 %v2710_v33  ;;  %936 = vmatmul.mubr.bf16.vlgmr.msra.gmra.mrb[4].mxu1 %v2710_v33  ;;  %v772_v33 = vld [vmem:[#allocation2 + $0x678] sm:$0xff] }
 0x234   :  { %863 = vmatpush1.bf16.msra.mxu0 %v757_v56  ;;  %945 = vmatpush1.bf16.msra.mxu1 %v759_v57  ;;  %v814_v56 = vld [vmem:[#allocation2 + $0x7c8] sm:$0xff]  ;;  %v816_v57 = vld [vmem:[#allocation2 + $0x7d8] sm:$0xff] }
 0x235   :  { %864 = vmatprep.subr.bf16.mxu0 %v762_v58  ;;  %946 = vmatprep.subr.bf16.mxu1 %v764_v59  ;;  %v813_v58 = vld [vmem:[#allocation2 + $0x7c0] sm:$0xff]  ;;  %v815_v59 = vld [vmem:[#allocation2 + $0x7d0] sm:$0xff] }
 0x236   :  { %894 = vmatprep.mubr.bf16.mxu0 %v2714_v36  ;;  %976 = vmatprep.mubr.bf16.mxu1 %v2714_v36  ;;  %v773_v36 = vld [vmem:[#allocation2 + $0x680] sm:$0xff] }
 0x238   :  { %865 = vmatpush1.bf16.msra.mxu0 %v761_v60  ;;  %947 = vmatpush1.bf16.msra.mxu1 %v763_v61  ;;  %v818_v60 = vld [vmem:[#allocation2 + $0x7e8] sm:$0xff]  ;;  %v820_v61 = vld [vmem:[#allocation2 + $0x7f8] sm:$0xff] }
 0x239   :  { %866 = vmatprep.subr.bf16.mxu0 %v766_v62  ;;  %948 = vmatprep.subr.bf16.mxu1 %v768_v63  ;;  %v817_v62 = vld [vmem:[#allocation2 + $0x7e0] sm:$0xff]  ;;  %v819_v63 = vld [vmem:[#allocation2 + $0x7f0] sm:$0xff] }
 0x23c   :  { %867 = vmatpush1.bf16.msra.mxu0 %v765_v0  ;;  %949 = vmatpush1.bf16.msra.mxu1 %v767_v1 }
 0x23d   :  { %868 = vmatprep.subr.bf16.mxu0 %v770_v3  ;;  %950 = vmatprep.subr.bf16.mxu1 %v772_v33 }
 0x240   :  { %869 = vmatpush1.bf16.msra.mxu0 %v769_v8  ;;  %951 = vmatpush1.bf16.msra.mxu1 %v771_v10 }
 0x241   :  { %870 = vmatprep.subr.bf16.mxu0 %v774_v14  ;;  %952 = vmatprep.subr.bf16.mxu1 %v776_v15 }
 0x244   :  { %871 = vmatpush1.bf16.msra.mxu0 %v773_v36  ;;  %953 = vmatpush1.bf16.msra.mxu1 %v775_v2 }
 0x245   :  { %872 = vmatprep.subr.bf16.mxu0 %v778_v5  ;;  %954 = vmatprep.subr.bf16.mxu1 %v780_v9 }
 0x248   :  { %873 = vmatpush1.bf16.msra.mxu0 %v777_v11  ;;  %955 = vmatpush1.bf16.msra.mxu1 %v779_v17 }
 0x249   :  { %874 = vmatprep.subr.bf16.mxu0 %v782_v12  ;;  %956 = vmatprep.subr.bf16.mxu1 %v784_v18 }
 0x24c   :  { %875 = vmatpush1.bf16.msra.mxu0 %v781_v13  ;;  %957 = vmatpush1.bf16.msra.mxu1 %v783_v19 }
 0x24d   :  { %876 = vmatprep.subr.bf16.mxu0 %v786_v22  ;;  %958 = vmatprep.subr.bf16.mxu1 %v788_v23 }
 0x250   :  { %877 = vmatpush1.bf16.msra.mxu0 %v785_v4  ;;  %959 = vmatpush1.bf16.msra.mxu1 %v787_v24 }
 0x251   :  { %878 = vmatprep.subr.bf16.mxu0 %v790_v25  ;;  %960 = vmatprep.subr.bf16.mxu1 %v792_v26 }
 0x254   :  { %879 = vmatpush1.bf16.msra.mxu0 %v789_v27  ;;  %961 = vmatpush1.bf16.msra.mxu1 %v791_v7 }
 0x255   :  { %880 = vmatprep.subr.bf16.mxu0 %v794_v28  ;;  %962 = vmatprep.subr.bf16.mxu1 %v796_v29 }
 0x258   :  { %881 = vmatpush1.bf16.msra.mxu0 %v793_v30  ;;  %963 = vmatpush1.bf16.msra.mxu1 %v795_v31 }
 0x259   :  { %882 = vmatprep.subr.bf16.mxu0 %v798_v32  ;;  %964 = vmatprep.subr.bf16.mxu1 %v800_v34 }
 0x25c   :  { %883 = vmatpush1.bf16.msra.mxu0 %v797_v37  ;;  %965 = vmatpush1.bf16.msra.mxu1 %v799_v38 }
 0x25d   :  { %884 = vmatprep.subr.bf16.mxu0 %v802_v39  ;;  %966 = vmatprep.subr.bf16.mxu1 %v804_v41 }
 0x260   :  { %885 = vmatpush1.bf16.msra.mxu0 %v801_v42  ;;  %967 = vmatpush1.bf16.msra.mxu1 %v803_v43 }
 0x261   :  { %886 = vmatprep.subr.bf16.mxu0 %v806_v44  ;;  %968 = vmatprep.subr.bf16.mxu1 %v808_v45 }
 0x264   :  { %887 = vmatpush1.bf16.msra.mxu0 %v805_v46  ;;  %969 = vmatpush1.bf16.msra.mxu1 %v807_v47 }
 0x265   :  { %888 = vmatprep.subr.bf16.mxu0 %v810_v49  ;;  %970 = vmatprep.subr.bf16.mxu1 %v812_v53 }
 0x268   :  { %889 = vmatpush1.bf16.msra.mxu0 %v809_v54  ;;  %971 = vmatpush1.bf16.msra.mxu1 %v811_v55 }
 0x269   :  { %890 = vmatprep.subr.bf16.mxu0 %v814_v56  ;;  %972 = vmatprep.subr.bf16.mxu1 %v816_v57 }
 0x26c   :  { %891 = vmatpush1.bf16.msra.mxu0 %v813_v58  ;;  %973 = vmatpush1.bf16.msra.mxu1 %v815_v59 }
 0x26d   :  { %892 = vmatprep.subr.bf16.mxu0 %v818_v60  ;;  %974 = vmatprep.subr.bf16.mxu1 %v820_v61 }
 0x270   :  { %893 = vmatpush1.bf16.msra.mxu0 %v817_v62  ;;  %975 = vmatpush1.bf16.msra.mxu1 %v819_v63 }
 0x273   :  { %895 = vmatmul.mubr.bf16.vlgmr.msra.gmra.mrb[4].mxu0 %v2712_v35  ;;  %977 = vmatmul.mubr.bf16.vlgmr.msra.gmra.mrb[4].mxu1 %v2712_v35 }
 0x346   :  { %v2738_v0 = vpop.f32.mrb[4].mxu0  ;;  %v2740_v1 = vpop.f32.mrb[4].mxu1 }
 0x347   :  { %v985_v3 = vrot.slane %v2738_v0, 4  ;;  %v1009_v33 = vmul.f32 %v2738_v0, %v2738_v0  ;;  %v997_v8 = vrot.slane %v2740_v1, 4  ;;  %v1011_v10 = vmul.f32 %v2740_v1, %v2740_v1  ;;  %v2748_v14 = vpop.f32.mrb[5].mxu0  ;;  %v2750_v15 = vpop.f32.mrb[5].mxu1 }
 0x348   :  { %v991_v35 = vrot.slane %v2748_v14, 4  ;;  %v1010_v36 = vmul.f32 %v2748_v14, %v2748_v14  ;;  %v1003_v2 = vrot.slane %v2750_v15, 4  ;;  %v1012_v5 = vmul.f32 %v2750_v15, %v2750_v15  ;;  %v900_v9 = vpop.f32.mrb[6].mxu0  ;;  %v982_v11 = vpop.f32.mrb[6].mxu1 }
 0x349   :  { %v986_v17 = vadd.f32 %v985_v3, %v2738_v0  ;;  %v1013_v12 = vrot.slane %v1009_v33, 4  ;;  %v998_v18 = vadd.f32 %v997_v8, %v2740_v1  ;;  %v1025_v13 = vrot.slane %v1011_v10, 4  ;;  %v901_v19 = vpop.f32.mrb[7].mxu0  ;;  %v983_v22 = vpop.f32.mrb[7].mxu1 }
 0x34a   :  { %v992_v23 = vadd.f32 %v991_v35, %v2748_v14  ;;  %v1019_v4 = vrot.slane %v1010_v36, 4  ;;  %v1004_v24 = vadd.f32 %v1003_v2, %v2750_v15  ;;  %v1031_v25 = vrot.slane %v1012_v5, 4 }
 0x34b   :  { %v987_v26 = vrot.slane %v986_v17, 2  ;;  %v1014_v27 = vadd.f32 %v1013_v12, %v1009_v33  ;;  %v999_v7 = vrot.slane %v998_v18, 2  ;;  %v1026_v28 = vadd.f32 %v1025_v13, %v1011_v10 }
 0x34c   :  { %v993_v29 = vrot.slane %v992_v23, 2  ;;  %v1020_v30 = vadd.f32 %v1019_v4, %v1010_v36  ;;  %v1005_v31 = vrot.slane %v1004_v24, 2  ;;  %v1032_v32 = vadd.f32 %v1031_v25, %v1012_v5 }
 0x34d   :  { %v988_v34 = vadd.f32 %v987_v26, %v986_v17  ;;  %v1015_v37 = vrot.slane %v1014_v27, 2  ;;  %v1000_v38 = vadd.f32 %v999_v7, %v998_v18  ;;  %v1027_v39 = vrot.slane %v1026_v28, 2 }
 0x34e   :  { %v994_v41 = vadd.f32 %v993_v29, %v992_v23  ;;  %v1021_v42 = vrot.slane %v1020_v30, 2  ;;  %v1006_v43 = vadd.f32 %v1005_v31, %v1004_v24  ;;  %v1033_v44 = vrot.slane %v1032_v32, 2 }
 0x34f   :  { %v989_v45 = vrot.slane %v988_v34, 1  ;;  %v1016_v46 = vadd.f32 %v1015_v37, %v1014_v27  ;;  %v1001_v47 = vrot.slane %v1000_v38, 1  ;;  %v1028_v49 = vadd.f32 %v1027_v39, %v1026_v28 }
 0x350   :  { %v995_v53 = vrot.slane %v994_v41, 1  ;;  %v1022_v54 = vadd.f32 %v1021_v42, %v1020_v30  ;;  %v1007_v55 = vrot.slane %v1006_v43, 1  ;;  %v1034_v56 = vadd.f32 %v1033_v44, %v1032_v32 }
 0x351   :  { %v990_v57 = vadd.f32 %v989_v45, %v988_v34  ;;  %v1017_v58 = vrot.slane %v1016_v46, 1  ;;  %v1002_v59 = vadd.f32 %v1001_v47, %v1000_v38  ;;  %v1029_v60 = vrot.slane %v1028_v49, 1 }
 0x352   :  { %v996_v61 = vadd.f32 %v995_v53, %v994_v41  ;;  %v1023_v62 = vrot.slane %v1022_v54, 1  ;;  %v1008_v63 = vadd.f32 %v1007_v55, %v1006_v43  ;;  %v1035_v3 = vrot.slane %v1034_v56, 1 }
 0x353   :  { %v1018_v33 = vadd.f32 %v1017_v58, %v1016_v46  ;;  %v1037_v8 = vmul.f32 0.125, %v990_v57  ;;  %v1030_v10 = vadd.f32 %v1029_v60, %v1028_v49  ;;  %v1039_v35 = vmul.f32 0.125, %v1002_v59  ;;  %v692_v46 = vld [vmem:[#allocation7 + $0x8] sm:$0xff] }
 0x354   :  { %v1024_v36 = vadd.f32 %v1023_v62, %v1022_v54  ;;  %v1038_v2 = vmul.f32 0.125, %v996_v61  ;;  %v1036_v5 = vadd.f32 %v1035_v3, %v1034_v56  ;;  %v1040_v9 = vmul.f32 0.125, %v1008_v63 }
 0x355   :  { %v1041_v11 = vmul.f32 0.125, %v1018_v33  ;;  %v1045_v17 = vmul.f32 %v1037_v8, %v1037_v8  ;;  %v1043_v12 = vmul.f32 0.125, %v1030_v10  ;;  %v1047_v18 = vmul.f32 %v1039_v35, %v1039_v35 }
 0x356   :  { %v1042_v13 = vmul.f32 0.125, %v1024_v36  ;;  %v1046_v19 = vmul.f32 %v1038_v2, %v1038_v2  ;;  %v1044_v22 = vmul.f32 0.125, %v1036_v5  ;;  %v1048_v23 = vmul.f32 %v1040_v9, %v1040_v9 }
 0x357   :  { %v1049_v4 = vsub.f32 %v1041_v11, %v1045_v17  ;;  %v1051_v24 = vsub.f32 %v1043_v12, %v1047_v18 }
 0x358   :  { %v1050_v25 = vsub.f32 %v1042_v13, %v1046_v19  ;;  %v1052_v26 = vsub.f32 %v1044_v22, %v1048_v23 }
 0x359   :  { %v1053_v27 = vmax.f32 %v1049_v4, 0.0  ;;  %v1055_v7 = vmax.f32 %v1051_v24, 0.0 }
 0x35a   :  { %v1054_v28 = vmax.f32 %v1050_v25, 0.0  ;;  %v1056_v29 = vmax.f32 %v1052_v26, 0.0 }
 0x35b   :  { %v1057_v30 = vadd.f32 1e-05, %v1053_v27  ;;  %v1059_v31 = vadd.f32 1e-05, %v1055_v7 }
 0x35c   :  { %v1058_v32 = vadd.f32 1e-05, %v1054_v28  ;;  %v1060_v34 = vadd.f32 1e-05, %v1056_v29 }
 0x35d   :  { %2403 = vrsqrt.f32 %v1057_v30 }
 0x35e   :  { %2405 = vrsqrt.f32 %v1059_v31 }
 0x35f   :  { %2407 = vrsqrt.f32 %v1058_v32 }
 0x360   :  { %2409 = vrsqrt.f32 %v1060_v34 }
 0x367   :  { %v2404_v37 = vpop.eup %2403 }
 0x368   :  { %v2406_v38 = vpop.eup %2405 }
 0x369   :  { %v2408_v39 = vpop.eup %2407 }
 0x36a   :  { %v2410_v41 = vpop.eup %2409  ;;  %v1069_v42 = vcombine.low %v2404_v37, %v2408_v39 }
 0x36b   :  { %v1070_v43 = vcombine.low %v2406_v38, %v2410_v41 }
 0x36c   :  { %v1077_v44 = vrot.slane %v1069_v42, %v2668_v40 }
 0x36d   :  { %v1084_v45 = vrot.slane %v1070_v43, %v2668_v40 }
 0x36f   :  { %v1085_v47 = vcombine.low %v1077_v44, %v1084_v45 }
 0x371   :  { %v1087_v49 = vmul.f32 %v1085_v47, %v692_v46 }
 0x373   :  { %v1092_v53 = vrot.slane %v1087_v49, %v2672_v48  ;;  %v1096_v54 = vrot.slane %v1087_v49, %v2674_v50  ;;  %v1100_v55 = vrot.slane %v1087_v49, %v2676_v51  ;;  %v1104_v56 = vrot.slane %v1087_v49, %v2678_v52 }
 0x375   :  { %v1109_v57 = vmul.f32 %v1092_v53, %v1037_v8  ;;  %v1110_v58 = vmul.f32 %v1096_v54, %v1038_v2  ;;  %v1111_v59 = vmul.f32 %v1100_v55, %v1039_v35  ;;  %v1112_v60 = vmul.f32 %v1104_v56, %v1040_v9 }
 0x376   :  { %v1140_v61 = vrot.slane %v1092_v53, %v2672_v48  ;;  %v1144_v62 = vrot.slane %v1096_v54, %v2672_v48  ;;  %v1148_v63 = vrot.slane %v1100_v55, %v2672_v48  ;;  %v1152_v3 = vrot.slane %v1104_v56, %v2672_v48 }
 0x377   :  { %v1117_v33 = vcombine.low %v1109_v57, %v1110_v58  ;;  %v1118_v10 = vcombine.low %v1111_v59, %v1112_v60 }
 0x378   :  { %v1153_v36 = vmul.f32 %v1140_v61, %v2738_v0  ;;  %v1154_v5 = vmul.f32 %v1144_v62, %v2748_v14  ;;  %v1155_v11 = vmul.f32 %v1148_v63, %v2740_v1  ;;  %v1156_v8 = vmul.f32 %v1152_v3, %v2750_v15 }
 0x379   :  { %v1125_v35 = vrot.slane %v1117_v33, %v2668_v40  ;;  %v1132_v2 = vrot.slane %v1118_v10, %v2668_v40 }
 0x37b   :  { %v1133_v9 = vcombine.low %v1125_v35, %v1132_v2 }
 0x37d   :  { %v1134_v17 = vrot.slane %v1133_v9, 7 }
 0x37f   :  { %v1136_v12 = vsub.f32 %v692_v46, %v1134_v17 }
 0x381   :  { %v1161_v18 = vrot.slane %v1136_v12, %v2694_v16  ;;  %v1165_v13 = vrot.slane %v1136_v12, %v2696_v6  ;;  %v1169_v19 = vrot.slane %v1136_v12, %v2698_v20  ;;  %v1173_v0 = vrot.slane %v1136_v12, %v2700_v21 }
 0x383   :  { %v1181_v14 = vrot.slane %v1161_v18, %v2694_v16  ;;  %v1185_v1 = vrot.slane %v1165_v13, %v2694_v16  ;;  %v1189_v15 = vrot.slane %v1169_v19, %v2694_v16  ;;  %v1193_v22 = vrot.slane %v1173_v0, %v2694_v16 }
 0x385   :  { %v1194_v23 = vadd.f32 %v1181_v14, %v1153_v36  ;;  %v1195_v4 = vadd.f32 %v1185_v1, %v1154_v5  ;;  %v1196_v24 = vadd.f32 %v1189_v15, %v1155_v11  ;;  %v1197_v25 = vadd.f32 %v1193_v22, %v1156_v8 }
 0x387   :  { %v1198_v26 = vmax.f32 %v1194_v23, 0.0  ;;  %v1199_v27 = vmax.f32 %v1195_v4, 0.0  ;;  %v1200_v7 = vmax.f32 %v1196_v24, 0.0  ;;  %v1201_v28 = vmax.f32 %v1197_v25, 0.0 }
 0x389   :  { %v2786_v29 = vpack.c.bf16 %v1198_v26, %v1198_v26  ;;  %v1203_v30 = vpack.c.bf16 %v1199_v27, %v1199_v27  ;;  %v2788_v31 = vpack.c.bf16 %v1200_v7, %v1200_v7  ;;  %v2790_v32 = vpack.c.bf16 %v1201_v28, %v1201_v28 }
 0x38a   :  { %2501 = dma.done.wait [#allocation3], 16384 }
 0x38b   :  { %2502 = vsyncadd [#allocation3], 4294950912  ;;  %1405 = vmatprep.mubr.bf16.mxu0 %v1203_v30  ;;  %1487 = vmatprep.mubr.bf16.mxu1 %v1203_v30  ;;  %1224 = sst [smem:[#allocation17]] %s2510_s6  ;;  %s1208_s30 = scalar_lea.hbm %s2933_s1, 49152 }
 0x38c   :  { %1226 = sst [smem:[#allocation17 + $0x1]] %s2510_s6  ;;  %s2523_s3 = smov [#allocation16]  }
 0x38d   :  { %1228 = sst [smem:[#allocation17 + $0x2]] %s2511_s7 }
 0x38e   :  { %1230 = sst [smem:[#allocation17 + $0x3]] %s2512_s8 }
 0x38f   :  { %1232 = sst [smem:[#allocation17 + $0x4]] %s2506_s28 }
 0x390   :  { %1234 = sst [smem:[#allocation17 + $0x5]] %s2513_s9 }
 0x391   :  { %1236 = sst [smem:[#allocation17 + $0x6]] %s2515_s12 }
 0x392   :  { %1238 = sst [smem:[#allocation17 + $0x7]] %s2512_s8 }
 0x393   :  { %1240 = sst [smem:[#allocation17 + $0x8]] %s2511_s7 }
 0x394   :  { %1242 = dma.general %s1208_s30, 16384, %s118_s18, %s2519_s22, %s2523_s3, [#allocation17], %s2601_s13, 0  }
 0x395   :  { %v1246_v34 = vld [vmem:[#allocation2 + $0x8] sm:$0xff]  ;;  %v1248_v37 = vld [vmem:[#allocation2 + $0x18] sm:$0xff]  ;;  %v1245_v38 = vld [vmem:[#allocation2] sm:$0xff] }
 0x396   :  { %1373 = vmatprep.subr.bf16.mxu0 %v1246_v34  ;;  %1455 = vmatprep.subr.bf16.mxu1 %v1248_v37  ;;  %v1247_v39 = vld [vmem:[#allocation2 + $0x10] sm:$0xff]  ;;  %v1250_v41 = vld [vmem:[#allocation2 + $0x28] sm:$0xff]  ;;  %v1252_v42 = vld [vmem:[#allocation2 + $0x38] sm:$0xff] }
 0x397   :  { %1374 = vmatpush1.bf16.msra.mxu0 %v1245_v38  ;;  %1456 = vmatpush1.bf16.msra.mxu1 %v1247_v39  ;;  %v1249_v43 = vld [vmem:[#allocation2 + $0x20] sm:$0xff]  ;;  %v1251_v44 = vld [vmem:[#allocation2 + $0x30] sm:$0xff]  ;;  %v1254_v45 = vld [vmem:[#allocation2 + $0x48] sm:$0xff] }
 0x398   :  { %1375 = vmatprep.subr.bf16.mxu0 %v1250_v41  ;;  %1457 = vmatprep.subr.bf16.mxu1 %v1252_v42  ;;  %v1256_v46 = vld [vmem:[#allocation2 + $0x58] sm:$0xff]  ;;  %v1253_v47 = vld [vmem:[#allocation2 + $0x40] sm:$0xff]  ;;  %v1255_v49 = vld [vmem:[#allocation2 + $0x50] sm:$0xff] }
 0x399   :  { %v1258_v53 = vld [vmem:[#allocation2 + $0x68] sm:$0xff]  ;;  %v1260_v54 = vld [vmem:[#allocation2 + $0x78] sm:$0xff]  ;;  %v1257_v55 = vld [vmem:[#allocation2 + $0x60] sm:$0xff] }
 0x39a   :  { %v1259_v56 = vld [vmem:[#allocation2 + $0x70] sm:$0xff]  ;;  %v1262_v57 = vld [vmem:[#allocation2 + $0x88] sm:$0xff]  ;;  %v1264_v58 = vld [vmem:[#allocation2 + $0x98] sm:$0xff] }
 0x39b   :  { %1376 = vmatpush1.bf16.msra.mxu0 %v1249_v43  ;;  %1458 = vmatpush1.bf16.msra.mxu1 %v1251_v44  ;;  %v1261_v59 = vld [vmem:[#allocation2 + $0x80] sm:$0xff]  ;;  %v1263_v60 = vld [vmem:[#allocation2 + $0x90] sm:$0xff]  ;;  %v1266_v61 = vld [vmem:[#allocation2 + $0xa8] sm:$0xff] }
 0x39c   :  { %1377 = vmatprep.subr.bf16.mxu0 %v1254_v45  ;;  %1459 = vmatprep.subr.bf16.mxu1 %v1256_v46  ;;  %v1268_v62 = vld [vmem:[#allocation2 + $0xb8] sm:$0xff]  ;;  %v1265_v63 = vld [vmem:[#allocation2 + $0xa0] sm:$0xff]  ;;  %v1267_v3 = vld [vmem:[#allocation2 + $0xb0] sm:$0xff] }
 0x39d   :  { %v1270_v33 = vld [vmem:[#allocation2 + $0xc8] sm:$0xff]  ;;  %v1272_v10 = vld [vmem:[#allocation2 + $0xd8] sm:$0xff]  ;;  %v1269_v36 = vld [vmem:[#allocation2 + $0xc0] sm:$0xff] }
 0x39e   :  { %v1271_v5 = vld [vmem:[#allocation2 + $0xd0] sm:$0xff]  ;;  %v1274_v11 = vld [vmem:[#allocation2 + $0xe8] sm:$0xff]  ;;  %v1276_v8 = vld [vmem:[#allocation2 + $0xf8] sm:$0xff] }
 0x39f   :  { %1378 = vmatpush1.bf16.msra.mxu0 %v1253_v47  ;;  %1460 = vmatpush1.bf16.msra.mxu1 %v1255_v49  ;;  %v1273_v35 = vld [vmem:[#allocation2 + $0xe0] sm:$0xff]  ;;  %v1275_v2 = vld [vmem:[#allocation2 + $0xf0] sm:$0xff]  ;;  %v1278_v9 = vld [vmem:[#allocation2 + $0x108] sm:$0xff] }
 0x3a0   :  { %1379 = vmatprep.subr.bf16.mxu0 %v1258_v53  ;;  %1461 = vmatprep.subr.bf16.mxu1 %v1260_v54  ;;  %v1280_v17 = vld [vmem:[#allocation2 + $0x118] sm:$0xff]  ;;  %v1277_v12 = vld [vmem:[#allocation2 + $0x100] sm:$0xff]  ;;  %v1279_v18 = vld [vmem:[#allocation2 + $0x110] sm:$0xff] }
 0x3a1   :  { %v1282_v13 = vld [vmem:[#allocation2 + $0x128] sm:$0xff]  ;;  %v1284_v19 = vld [vmem:[#allocation2 + $0x138] sm:$0xff]  ;;  %v1281_v0 = vld [vmem:[#allocation2 + $0x120] sm:$0xff] }
 0x3a2   :  { %v1283_v14 = vld [vmem:[#allocation2 + $0x130] sm:$0xff]  ;;  %v1286_v1 = vld [vmem:[#allocation2 + $0x148] sm:$0xff]  ;;  %v1288_v15 = vld [vmem:[#allocation2 + $0x158] sm:$0xff] }
 0x3a3   :  { %1380 = vmatpush1.bf16.msra.mxu0 %v1257_v55  ;;  %1462 = vmatpush1.bf16.msra.mxu1 %v1259_v56  ;;  %v1285_v22 = vld [vmem:[#allocation2 + $0x140] sm:$0xff]  ;;  %v1287_v23 = vld [vmem:[#allocation2 + $0x150] sm:$0xff]  ;;  %v1290_v4 = vld [vmem:[#allocation2 + $0x168] sm:$0xff] }
 0x3a4   :  { %1381 = vmatprep.subr.bf16.mxu0 %v1262_v57  ;;  %1463 = vmatprep.subr.bf16.mxu1 %v1264_v58  ;;  %v1292_v24 = vld [vmem:[#allocation2 + $0x178] sm:$0xff]  ;;  %v1289_v25 = vld [vmem:[#allocation2 + $0x160] sm:$0xff]  ;;  %v1291_v26 = vld [vmem:[#allocation2 + $0x170] sm:$0xff] }
 0x3a5   :  { %v1294_v27 = vld [vmem:[#allocation2 + $0x188] sm:$0xff]  ;;  %v1296_v7 = vld [vmem:[#allocation2 + $0x198] sm:$0xff]  ;;  %v1293_v28 = vld [vmem:[#allocation2 + $0x180] sm:$0xff] }
 0x3a6   :  { %v1295_v30 = vld [vmem:[#allocation2 + $0x190] sm:$0xff]  ;;  %v1298_v34 = vld [vmem:[#allocation2 + $0x1a8] sm:$0xff]  ;;  %v1300_v37 = vld [vmem:[#allocation2 + $0x1b8] sm:$0xff] }
 0x3a7   :  { %1382 = vmatpush1.bf16.msra.mxu0 %v1261_v59  ;;  %1464 = vmatpush1.bf16.msra.mxu1 %v1263_v60  ;;  %v1297_v38 = vld [vmem:[#allocation2 + $0x1a0] sm:$0xff]  ;;  %v1299_v39 = vld [vmem:[#allocation2 + $0x1b0] sm:$0xff]  ;;  %v1302_v41 = vld [vmem:[#allocation2 + $0x1c8] sm:$0xff] }
 0x3a8   :  { %1383 = vmatprep.subr.bf16.mxu0 %v1266_v61  ;;  %1465 = vmatprep.subr.bf16.mxu1 %v1268_v62  ;;  %v1304_v42 = vld [vmem:[#allocation2 + $0x1d8] sm:$0xff]  ;;  %v1301_v43 = vld [vmem:[#allocation2 + $0x1c0] sm:$0xff]  ;;  %v1303_v44 = vld [vmem:[#allocation2 + $0x1d0] sm:$0xff] }
 0x3a9   :  { %v1306_v45 = vld [vmem:[#allocation2 + $0x1e8] sm:$0xff]  ;;  %v1308_v46 = vld [vmem:[#allocation2 + $0x1f8] sm:$0xff]  ;;  %v1305_v47 = vld [vmem:[#allocation2 + $0x1e0] sm:$0xff] }
 0x3aa   :  { %v1307_v49 = vld [vmem:[#allocation2 + $0x1f0] sm:$0xff]  ;;  %v1310_v53 = vld [vmem:[#allocation2 + $0x208] sm:$0xff]  ;;  %v1312_v54 = vld [vmem:[#allocation2 + $0x218] sm:$0xff] }
 0x3ab   :  { %1384 = vmatpush1.bf16.msra.mxu0 %v1265_v63  ;;  %1466 = vmatpush1.bf16.msra.mxu1 %v1267_v3  ;;  %v1309_v55 = vld [vmem:[#allocation2 + $0x200] sm:$0xff]  ;;  %v1311_v56 = vld [vmem:[#allocation2 + $0x210] sm:$0xff]  ;;  %v1314_v57 = vld [vmem:[#allocation2 + $0x228] sm:$0xff] }
 0x3ac   :  { %1385 = vmatprep.subr.bf16.mxu0 %v1270_v33  ;;  %1467 = vmatprep.subr.bf16.mxu1 %v1272_v10  ;;  %v1316_v58 = vld [vmem:[#allocation2 + $0x238] sm:$0xff]  ;;  %v1313_v59 = vld [vmem:[#allocation2 + $0x220] sm:$0xff]  ;;  %v1315_v60 = vld [vmem:[#allocation2 + $0x230] sm:$0xff] }
 0x3ad   :  { %v1318_v61 = vld [vmem:[#allocation2 + $0x248] sm:$0xff]  ;;  %v1320_v62 = vld [vmem:[#allocation2 + $0x258] sm:$0xff]  ;;  %v1317_v63 = vld [vmem:[#allocation2 + $0x240] sm:$0xff] }
 0x3ae   :  { %v1319_v3 = vld [vmem:[#allocation2 + $0x250] sm:$0xff]  ;;  %v1322_v33 = vld [vmem:[#allocation2 + $0x268] sm:$0xff]  ;;  %v1321_v10 = vld [vmem:[#allocation2 + $0x260] sm:$0xff] }
 0x3af   :  { %1386 = vmatpush1.bf16.msra.mxu0 %v1269_v36  ;;  %1468 = vmatpush1.bf16.msra.mxu1 %v1271_v5  ;;  %v1323_v36 = vld [vmem:[#allocation2 + $0x270] sm:$0xff]  ;;  %v1326_v5 = vld [vmem:[#allocation2 + $0x288] sm:$0xff] }
 0x3b0   :  { %1387 = vmatprep.subr.bf16.mxu0 %v1274_v11  ;;  %1469 = vmatprep.subr.bf16.mxu1 %v1276_v8  ;;  %v1328_v11 = vld [vmem:[#allocation2 + $0x298] sm:$0xff]  ;;  %v1327_v8 = vld [vmem:[#allocation2 + $0x290] sm:$0xff] }
 0x3b3   :  { %1388 = vmatpush1.bf16.msra.mxu0 %v1273_v35  ;;  %1470 = vmatpush1.bf16.msra.mxu1 %v1275_v2  ;;  %v1330_v35 = vld [vmem:[#allocation2 + $0x2a8] sm:$0xff]  ;;  %v1332_v2 = vld [vmem:[#allocation2 + $0x2b8] sm:$0xff] }
 0x3b4   :  { %1389 = vmatprep.subr.bf16.mxu0 %v1278_v9  ;;  %1471 = vmatprep.subr.bf16.mxu1 %v1280_v17  ;;  %v1329_v9 = vld [vmem:[#allocation2 + $0x2a0] sm:$0xff]  ;;  %v1331_v17 = vld [vmem:[#allocation2 + $0x2b0] sm:$0xff] }
 0x3b7   :  { %1390 = vmatpush1.bf16.msra.mxu0 %v1277_v12  ;;  %1472 = vmatpush1.bf16.msra.mxu1 %v1279_v18  ;;  %v1334_v12 = vld [vmem:[#allocation2 + $0x2c8] sm:$0xff]  ;;  %v1336_v18 = vld [vmem:[#allocation2 + $0x2d8] sm:$0xff] }
 0x3b8   :  { %1391 = vmatprep.subr.bf16.mxu0 %v1282_v13  ;;  %1473 = vmatprep.subr.bf16.mxu1 %v1284_v19  ;;  %v1333_v13 = vld [vmem:[#allocation2 + $0x2c0] sm:$0xff]  ;;  %v1335_v19 = vld [vmem:[#allocation2 + $0x2d0] sm:$0xff] }
 0x3bb   :  { %1392 = vmatpush1.bf16.msra.mxu0 %v1281_v0  ;;  %1474 = vmatpush1.bf16.msra.mxu1 %v1283_v14  ;;  %v1338_v0 = vld [vmem:[#allocation2 + $0x2e8] sm:$0xff]  ;;  %v1340_v14 = vld [vmem:[#allocation2 + $0x2f8] sm:$0xff] }
 0x3bc   :  { %1393 = vmatprep.subr.bf16.mxu0 %v1286_v1  ;;  %1475 = vmatprep.subr.bf16.mxu1 %v1288_v15  ;;  %v1337_v1 = vld [vmem:[#allocation2 + $0x2e0] sm:$0xff]  ;;  %v1339_v15 = vld [vmem:[#allocation2 + $0x2f0] sm:$0xff] }
 0x3bf   :  { %1394 = vmatpush1.bf16.msra.mxu0 %v1285_v22  ;;  %1476 = vmatpush1.bf16.msra.mxu1 %v1287_v23  ;;  %v1342_v22 = vld [vmem:[#allocation2 + $0x308] sm:$0xff]  ;;  %v1344_v23 = vld [vmem:[#allocation2 + $0x318] sm:$0xff] }
 0x3c0   :  { %1395 = vmatprep.subr.bf16.mxu0 %v1290_v4  ;;  %1477 = vmatprep.subr.bf16.mxu1 %v1292_v24  ;;  %v1341_v4 = vld [vmem:[#allocation2 + $0x300] sm:$0xff]  ;;  %v1343_v24 = vld [vmem:[#allocation2 + $0x310] sm:$0xff] }
 0x3c3   :  { %1396 = vmatpush1.bf16.msra.mxu0 %v1289_v25  ;;  %1478 = vmatpush1.bf16.msra.mxu1 %v1291_v26  ;;  %v1346_v25 = vld [vmem:[#allocation2 + $0x328] sm:$0xff]  ;;  %v1348_v26 = vld [vmem:[#allocation2 + $0x338] sm:$0xff] }
 0x3c4   :  { %1397 = vmatprep.subr.bf16.mxu0 %v1294_v27  ;;  %1479 = vmatprep.subr.bf16.mxu1 %v1296_v7  ;;  %v1345_v27 = vld [vmem:[#allocation2 + $0x320] sm:$0xff]  ;;  %v1347_v7 = vld [vmem:[#allocation2 + $0x330] sm:$0xff] }
 0x3c7   :  { %1398 = vmatpush1.bf16.msra.mxu0 %v1293_v28  ;;  %1480 = vmatpush1.bf16.msra.mxu1 %v1295_v30  ;;  %v1350_v28 = vld [vmem:[#allocation2 + $0x348] sm:$0xff]  ;;  %v1352_v30 = vld [vmem:[#allocation2 + $0x358] sm:$0xff] }
 0x3c8   :  { %1399 = vmatprep.subr.bf16.mxu0 %v1298_v34  ;;  %1481 = vmatprep.subr.bf16.mxu1 %v1300_v37  ;;  %v1349_v34 = vld [vmem:[#allocation2 + $0x340] sm:$0xff]  ;;  %v1351_v37 = vld [vmem:[#allocation2 + $0x350] sm:$0xff] }
 0x3cb   :  { %1400 = vmatpush1.bf16.msra.mxu0 %v1297_v38  ;;  %1482 = vmatpush1.bf16.msra.mxu1 %v1299_v39  ;;  %v1354_v38 = vld [vmem:[#allocation2 + $0x368] sm:$0xff]  ;;  %v1356_v39 = vld [vmem:[#allocation2 + $0x378] sm:$0xff] }
 0x3cc   :  { %1401 = vmatprep.subr.bf16.mxu0 %v1302_v41  ;;  %1483 = vmatprep.subr.bf16.mxu1 %v1304_v42  ;;  %v1353_v41 = vld [vmem:[#allocation2 + $0x360] sm:$0xff]  ;;  %v1355_v42 = vld [vmem:[#allocation2 + $0x370] sm:$0xff] }
 0x3cf   :  { %1402 = vmatpush1.bf16.msra.mxu0 %v1301_v43  ;;  %1484 = vmatpush1.bf16.msra.mxu1 %v1303_v44  ;;  %v1358_v43 = vld [vmem:[#allocation2 + $0x388] sm:$0xff]  ;;  %v1360_v44 = vld [vmem:[#allocation2 + $0x398] sm:$0xff] }
 0x3d0   :  { %1403 = vmatprep.subr.bf16.mxu0 %v1306_v45  ;;  %1485 = vmatprep.subr.bf16.mxu1 %v1308_v46  ;;  %v1357_v45 = vld [vmem:[#allocation2 + $0x380] sm:$0xff]  ;;  %v1359_v46 = vld [vmem:[#allocation2 + $0x390] sm:$0xff] }
 0x3d3   :  { %1404 = vmatpush1.bf16.msra.mxu0 %v1305_v47  ;;  %1486 = vmatpush1.bf16.msra.mxu1 %v1307_v49  ;;  %v1362_v47 = vld [vmem:[#allocation2 + $0x3a8] sm:$0xff]  ;;  %v1364_v49 = vld [vmem:[#allocation2 + $0x3b8] sm:$0xff] }
 0x3d4   :  { %1414 = vmatprep.subr.bf16.mxu0 %v1310_v53  ;;  %1496 = vmatprep.subr.bf16.mxu1 %v1312_v54  ;;  %v1361_v53 = vld [vmem:[#allocation2 + $0x3a0] sm:$0xff]  ;;  %v1363_v54 = vld [vmem:[#allocation2 + $0x3b0] sm:$0xff] }
 0x3d6   :  { %1406 = vmatmul.mubr.bf16.vlgmr.msra.gmra.mrb[8].mxu0 %v2786_v29  ;;  %1488 = vmatmul.mubr.bf16.vlgmr.msra.gmra.mrb[8].mxu1 %v2786_v29  ;;  %v1324_v29 = vld [vmem:[#allocation2 + $0x278] sm:$0xff] }
 0x3d7   :  { %1415 = vmatpush1.bf16.msra.mxu0 %v1309_v55  ;;  %1497 = vmatpush1.bf16.msra.mxu1 %v1311_v56  ;;  %v1366_v55 = vld [vmem:[#allocation2 + $0x3c8] sm:$0xff]  ;;  %v1368_v56 = vld [vmem:[#allocation2 + $0x3d8] sm:$0xff] }
 0x3d8   :  { %1416 = vmatprep.subr.bf16.mxu0 %v1314_v57  ;;  %1498 = vmatprep.subr.bf16.mxu1 %v1316_v58  ;;  %v1365_v57 = vld [vmem:[#allocation2 + $0x3c0] sm:$0xff]  ;;  %v1367_v58 = vld [vmem:[#allocation2 + $0x3d0] sm:$0xff] }
 0x3d9   :  { %1446 = vmatprep.mubr.bf16.mxu0 %v2790_v32  ;;  %1528 = vmatprep.mubr.bf16.mxu1 %v2790_v32  ;;  %v1325_v32 = vld [vmem:[#allocation2 + $0x280] sm:$0xff] }
 0x3db   :  { %1417 = vmatpush1.bf16.msra.mxu0 %v1313_v59  ;;  %1499 = vmatpush1.bf16.msra.mxu1 %v1315_v60  ;;  %v1370_v59 = vld [vmem:[#allocation2 + $0x3e8] sm:$0xff]  ;;  %v1372_v60 = vld [vmem:[#allocation2 + $0x3f8] sm:$0xff] }
 0x3dc   :  { %1418 = vmatprep.subr.bf16.mxu0 %v1318_v61  ;;  %1500 = vmatprep.subr.bf16.mxu1 %v1320_v62  ;;  %v1369_v61 = vld [vmem:[#allocation2 + $0x3e0] sm:$0xff]  ;;  %v1371_v62 = vld [vmem:[#allocation2 + $0x3f0] sm:$0xff] }
 0x3df   :  { %1419 = vmatpush1.bf16.msra.mxu0 %v1317_v63  ;;  %1501 = vmatpush1.bf16.msra.mxu1 %v1319_v3 }
 0x3e0   :  { %1420 = vmatprep.subr.bf16.mxu0 %v1322_v33  ;;  %1502 = vmatprep.subr.bf16.mxu1 %v1324_v29 }
 0x3e3   :  { %1421 = vmatpush1.bf16.msra.mxu0 %v1321_v10  ;;  %1503 = vmatpush1.bf16.msra.mxu1 %v1323_v36 }
 0x3e4   :  { %1422 = vmatprep.subr.bf16.mxu0 %v1326_v5  ;;  %1504 = vmatprep.subr.bf16.mxu1 %v1328_v11 }
 0x3e7   :  { %1423 = vmatpush1.bf16.msra.mxu0 %v1325_v32  ;;  %1505 = vmatpush1.bf16.msra.mxu1 %v1327_v8 }
 0x3e8   :  { %1424 = vmatprep.subr.bf16.mxu0 %v1330_v35  ;;  %1506 = vmatprep.subr.bf16.mxu1 %v1332_v2 }
 0x3eb   :  { %1425 = vmatpush1.bf16.msra.mxu0 %v1329_v9  ;;  %1507 = vmatpush1.bf16.msra.mxu1 %v1331_v17 }
 0x3ec   :  { %1426 = vmatprep.subr.bf16.mxu0 %v1334_v12  ;;  %1508 = vmatprep.subr.bf16.mxu1 %v1336_v18 }
 0x3ef   :  { %1427 = vmatpush1.bf16.msra.mxu0 %v1333_v13  ;;  %1509 = vmatpush1.bf16.msra.mxu1 %v1335_v19 }
 0x3f0   :  { %1428 = vmatprep.subr.bf16.mxu0 %v1338_v0  ;;  %1510 = vmatprep.subr.bf16.mxu1 %v1340_v14 }
 0x3f3   :  { %1429 = vmatpush1.bf16.msra.mxu0 %v1337_v1  ;;  %1511 = vmatpush1.bf16.msra.mxu1 %v1339_v15 }
 0x3f4   :  { %1430 = vmatprep.subr.bf16.mxu0 %v1342_v22  ;;  %1512 = vmatprep.subr.bf16.mxu1 %v1344_v23 }
 0x3f7   :  { %1431 = vmatpush1.bf16.msra.mxu0 %v1341_v4  ;;  %1513 = vmatpush1.bf16.msra.mxu1 %v1343_v24 }
 0x3f8   :  { %1432 = vmatprep.subr.bf16.mxu0 %v1346_v25  ;;  %1514 = vmatprep.subr.bf16.mxu1 %v1348_v26 }
 0x3fb   :  { %1433 = vmatpush1.bf16.msra.mxu0 %v1345_v27  ;;  %1515 = vmatpush1.bf16.msra.mxu1 %v1347_v7 }
 0x3fc   :  { %1434 = vmatprep.subr.bf16.mxu0 %v1350_v28  ;;  %1516 = vmatprep.subr.bf16.mxu1 %v1352_v30 }
 0x3ff   :  { %1435 = vmatpush1.bf16.msra.mxu0 %v1349_v34  ;;  %1517 = vmatpush1.bf16.msra.mxu1 %v1351_v37 }
 0x400   :  { %1436 = vmatprep.subr.bf16.mxu0 %v1354_v38  ;;  %1518 = vmatprep.subr.bf16.mxu1 %v1356_v39 }
 0x403   :  { %1437 = vmatpush1.bf16.msra.mxu0 %v1353_v41  ;;  %1519 = vmatpush1.bf16.msra.mxu1 %v1355_v42 }
 0x404   :  { %1438 = vmatprep.subr.bf16.mxu0 %v1358_v43  ;;  %1520 = vmatprep.subr.bf16.mxu1 %v1360_v44 }
 0x407   :  { %1439 = vmatpush1.bf16.msra.mxu0 %v1357_v45  ;;  %1521 = vmatpush1.bf16.msra.mxu1 %v1359_v46 }
 0x408   :  { %1440 = vmatprep.subr.bf16.mxu0 %v1362_v47  ;;  %1522 = vmatprep.subr.bf16.mxu1 %v1364_v49 }
 0x40b   :  { %1441 = vmatpush1.bf16.msra.mxu0 %v1361_v53  ;;  %1523 = vmatpush1.bf16.msra.mxu1 %v1363_v54 }
 0x40c   :  { %1442 = vmatprep.subr.bf16.mxu0 %v1366_v55  ;;  %1524 = vmatprep.subr.bf16.mxu1 %v1368_v56 }
 0x40f   :  { %1443 = vmatpush1.bf16.msra.mxu0 %v1365_v57  ;;  %1525 = vmatpush1.bf16.msra.mxu1 %v1367_v58 }
 0x410   :  { %1444 = vmatprep.subr.bf16.mxu0 %v1370_v59  ;;  %1526 = vmatprep.subr.bf16.mxu1 %v1372_v60 }
 0x413   :  { %1445 = vmatpush1.bf16.msra.mxu0 %v1369_v61  ;;  %1527 = vmatpush1.bf16.msra.mxu1 %v1371_v62 }
 0x416   :  { %1447 = vmatmul.mubr.bf16.vlgmr.msra.gmra.mrb[8].mxu0 %v2788_v31  ;;  %1529 = vmatmul.mubr.bf16.vlgmr.msra.gmra.mrb[8].mxu1 %v2788_v31 }
 0x4e9   :  { %v2814_v63 = vpop.f32.mrb[8].mxu0  ;;  %v2816_v3 = vpop.f32.mrb[8].mxu1 }
 0x4ea   :  { %v1537_v33 = vrot.slane %v2814_v63, 4  ;;  %v1561_v29 = vmul.f32 %v2814_v63, %v2814_v63  ;;  %v1549_v10 = vrot.slane %v2816_v3, 4  ;;  %v1563_v36 = vmul.f32 %v2816_v3, %v2816_v3  ;;  %v2824_v5 = vpop.f32.mrb[9].mxu0  ;;  %v2826_v11 = vpop.f32.mrb[9].mxu1 }
 0x4eb   :  { %v1543_v31 = vrot.slane %v2824_v5, 4  ;;  %v1562_v32 = vmul.f32 %v2824_v5, %v2824_v5  ;;  %v1555_v8 = vrot.slane %v2826_v11, 4  ;;  %v1564_v35 = vmul.f32 %v2826_v11, %v2826_v11  ;;  %v1452_v2 = vpop.f32.mrb[10].mxu0  ;;  %v1534_v9 = vpop.f32.mrb[10].mxu1 }
 0x4ec   :  { %v1538_v17 = vadd.f32 %v1537_v33, %v2814_v63  ;;  %v1565_v12 = vrot.slane %v1561_v29, 4  ;;  %v1550_v18 = vadd.f32 %v1549_v10, %v2816_v3  ;;  %v1577_v13 = vrot.slane %v1563_v36, 4  ;;  %v1453_v19 = vpop.f32.mrb[11].mxu0  ;;  %v1535_v0 = vpop.f32.mrb[11].mxu1 }
 0x4ed   :  { %v1544_v14 = vadd.f32 %v1543_v31, %v2824_v5  ;;  %v1571_v1 = vrot.slane %v1562_v32, 4  ;;  %v1556_v15 = vadd.f32 %v1555_v8, %v2826_v11  ;;  %v1583_v22 = vrot.slane %v1564_v35, 4 }
 0x4ee   :  { %v1539_v23 = vrot.slane %v1538_v17, 2  ;;  %v1566_v4 = vadd.f32 %v1565_v12, %v1561_v29  ;;  %v1551_v24 = vrot.slane %v1550_v18, 2  ;;  %v1578_v25 = vadd.f32 %v1577_v13, %v1563_v36 }
 0x4ef   :  { %v1545_v26 = vrot.slane %v1544_v14, 2  ;;  %v1572_v27 = vadd.f32 %v1571_v1, %v1562_v32  ;;  %v1557_v7 = vrot.slane %v1556_v15, 2  ;;  %v1584_v28 = vadd.f32 %v1583_v22, %v1564_v35 }
 0x4f0   :  { %v1540_v30 = vadd.f32 %v1539_v23, %v1538_v17  ;;  %v1567_v34 = vrot.slane %v1566_v4, 2  ;;  %v1552_v37 = vadd.f32 %v1551_v24, %v1550_v18  ;;  %v1579_v38 = vrot.slane %v1578_v25, 2 }
 0x4f1   :  { %v1546_v39 = vadd.f32 %v1545_v26, %v1544_v14  ;;  %v1573_v41 = vrot.slane %v1572_v27, 2  ;;  %v1558_v42 = vadd.f32 %v1557_v7, %v1556_v15  ;;  %v1585_v43 = vrot.slane %v1584_v28, 2 }
 0x4f2   :  { %v1541_v44 = vrot.slane %v1540_v30, 1  ;;  %v1568_v45 = vadd.f32 %v1567_v34, %v1566_v4  ;;  %v1553_v46 = vrot.slane %v1552_v37, 1  ;;  %v1580_v47 = vadd.f32 %v1579_v38, %v1578_v25 }
 0x4f3   :  { %v1547_v49 = vrot.slane %v1546_v39, 1  ;;  %v1574_v53 = vadd.f32 %v1573_v41, %v1572_v27  ;;  %v1559_v54 = vrot.slane %v1558_v42, 1  ;;  %v1586_v55 = vadd.f32 %v1585_v43, %v1584_v28 }
 0x4f4   :  { %v1542_v56 = vadd.f32 %v1541_v44, %v1540_v30  ;;  %v1569_v57 = vrot.slane %v1568_v45, 1  ;;  %v1554_v58 = vadd.f32 %v1553_v46, %v1552_v37  ;;  %v1581_v59 = vrot.slane %v1580_v47, 1 }
 0x4f5   :  { %v1548_v60 = vadd.f32 %v1547_v49, %v1546_v39  ;;  %v1575_v61 = vrot.slane %v1574_v53, 1  ;;  %v1560_v62 = vadd.f32 %v1559_v54, %v1558_v42  ;;  %v1587_v33 = vrot.slane %v1586_v55, 1 }
 0x4f6   :  { %v1570_v29 = vadd.f32 %v1569_v57, %v1568_v45  ;;  %v1589_v10 = vmul.f32 0.125, %v1542_v56  ;;  %v1582_v36 = vadd.f32 %v1581_v59, %v1580_v47  ;;  %v1591_v31 = vmul.f32 0.125, %v1554_v58  ;;  %v1244_v45 = vld [vmem:[#allocation7 + $0x10] sm:$0xff] }
 0x4f7   :  { %v1576_v32 = vadd.f32 %v1575_v61, %v1574_v53  ;;  %v1590_v8 = vmul.f32 0.125, %v1548_v60  ;;  %v1588_v35 = vadd.f32 %v1587_v33, %v1586_v55  ;;  %v1592_v2 = vmul.f32 0.125, %v1560_v62 }
 0x4f8   :  { %v1593_v9 = vmul.f32 0.125, %v1570_v29  ;;  %v1597_v17 = vmul.f32 %v1589_v10, %v1589_v10  ;;  %v1595_v12 = vmul.f32 0.125, %v1582_v36  ;;  %v1599_v18 = vmul.f32 %v1591_v31, %v1591_v31 }
 0x4f9   :  { %v1594_v13 = vmul.f32 0.125, %v1576_v32  ;;  %v1598_v19 = vmul.f32 %v1590_v8, %v1590_v8  ;;  %v1596_v0 = vmul.f32 0.125, %v1588_v35  ;;  %v1600_v14 = vmul.f32 %v1592_v2, %v1592_v2 }
 0x4fa   :  { %v1601_v1 = vsub.f32 %v1593_v9, %v1597_v17  ;;  %v1603_v15 = vsub.f32 %v1595_v12, %v1599_v18 }
 0x4fb   :  { %v1602_v22 = vsub.f32 %v1594_v13, %v1598_v19  ;;  %v1604_v23 = vsub.f32 %v1596_v0, %v1600_v14 }
 0x4fc   :  { %v1605_v4 = vmax.f32 %v1601_v1, 0.0  ;;  %v1607_v24 = vmax.f32 %v1603_v15, 0.0 }
 0x4fd   :  { %v1606_v25 = vmax.f32 %v1602_v22, 0.0  ;;  %v1608_v26 = vmax.f32 %v1604_v23, 0.0 }
 0x4fe   :  { %v1609_v27 = vadd.f32 1e-05, %v1605_v4  ;;  %v1611_v7 = vadd.f32 1e-05, %v1607_v24 }
 0x4ff   :  { %v1610_v28 = vadd.f32 1e-05, %v1606_v25  ;;  %v1612_v30 = vadd.f32 1e-05, %v1608_v26 }
 0x500   :  { %2411 = vrsqrt.f32 %v1609_v27 }
 0x501   :  { %2413 = vrsqrt.f32 %v1611_v7 }
 0x502   :  { %2415 = vrsqrt.f32 %v1610_v28 }
 0x503   :  { %2417 = vrsqrt.f32 %v1612_v30 }
 0x50a   :  { %v2412_v34 = vpop.eup %2411 }
 0x50b   :  { %v2414_v37 = vpop.eup %2413 }
 0x50c   :  { %v2416_v38 = vpop.eup %2415 }
 0x50d   :  { %v2418_v39 = vpop.eup %2417  ;;  %v1621_v41 = vcombine.low %v2412_v34, %v2416_v38 }
 0x50e   :  { %v1622_v42 = vcombine.low %v2414_v37, %v2418_v39 }
 0x50f   :  { %v1629_v43 = vrot.slane %v1621_v41, %v2668_v40 }
 0x510   :  { %v1636_v44 = vrot.slane %v1622_v42, %v2668_v40 }
 0x512   :  { %v1637_v46 = vcombine.low %v1629_v43, %v1636_v44 }
 0x514   :  { %v1639_v47 = vmul.f32 %v1637_v46, %v1244_v45 }
 0x516   :  { %v1644_v49 = vrot.slane %v1639_v47, %v2672_v48  ;;  %v1648_v53 = vrot.slane %v1639_v47, %v2674_v50  ;;  %v1652_v54 = vrot.slane %v1639_v47, %v2676_v51  ;;  %v1656_v55 = vrot.slane %v1639_v47, %v2678_v52 }
 0x518   :  { %v1661_v56 = vmul.f32 %v1644_v49, %v1589_v10  ;;  %v1662_v57 = vmul.f32 %v1648_v53, %v1590_v8  ;;  %v1663_v58 = vmul.f32 %v1652_v54, %v1591_v31  ;;  %v1664_v59 = vmul.f32 %v1656_v55, %v1592_v2 }
 0x519   :  { %v1692_v60 = vrot.slane %v1644_v49, %v2672_v48  ;;  %v1696_v61 = vrot.slane %v1648_v53, %v2672_v48  ;;  %v1700_v62 = vrot.slane %v1652_v54, %v2672_v48  ;;  %v1704_v33 = vrot.slane %v1656_v55, %v2672_v48 }
 0x51a   :  { %v1669_v29 = vcombine.low %v1661_v56, %v1662_v57  ;;  %v1670_v36 = vcombine.low %v1663_v58, %v1664_v59 }
 0x51b   :  { %v1705_v32 = vmul.f32 %v1692_v60, %v2814_v63  ;;  %v1706_v35 = vmul.f32 %v1696_v61, %v2824_v5  ;;  %v1707_v9 = vmul.f32 %v1700_v62, %v2816_v3  ;;  %v1708_v10 = vmul.f32 %v1704_v33, %v2826_v11 }
 0x51c   :  { %v1677_v31 = vrot.slane %v1669_v29, %v2668_v40  ;;  %v1684_v8 = vrot.slane %v1670_v36, %v2668_v40 }
 0x51e   :  { %v1685_v2 = vcombine.low %v1677_v31, %v1684_v8 }
 0x520   :  { %v1686_v17 = vrot.slane %v1685_v2, 7 }
 0x522   :  { %v1688_v12 = vsub.f32 %v1244_v45, %v1686_v17 }
 0x524   :  { %v1713_v18 = vrot.slane %v1688_v12, %v2694_v16  ;;  %v1717_v13 = vrot.slane %v1688_v12, %v2696_v6  ;;  %v1721_v19 = vrot.slane %v1688_v12, %v2698_v20  ;;  %v1725_v63 = vrot.slane %v1688_v12, %v2700_v21 }
 0x526   :  { %v1733_v5 = vrot.slane %v1713_v18, %v2694_v16  ;;  %v1737_v3 = vrot.slane %v1717_v13, %v2694_v16  ;;  %v1741_v11 = vrot.slane %v1721_v19, %v2694_v16  ;;  %v1745_v0 = vrot.slane %v1725_v63, %v2694_v16 }
 0x528   :  { %v1746_v14 = vadd.f32 %v1733_v5, %v1705_v32  ;;  %v1747_v1 = vadd.f32 %v1737_v3, %v1706_v35  ;;  %v1748_v15 = vadd.f32 %v1741_v11, %v1707_v9  ;;  %v1749_v22 = vadd.f32 %v1745_v0, %v1708_v10 }
 0x52a   :  { %v1750_v23 = vmax.f32 %v1746_v14, 0.0  ;;  %v1751_v4 = vmax.f32 %v1747_v1, 0.0  ;;  %v1752_v24 = vmax.f32 %v1748_v15, 0.0  ;;  %v1753_v25 = vmax.f32 %v1749_v22, 0.0 }
 0x52c   :  { %v2862_v26 = vpack.c.bf16 %v1750_v23, %v1750_v23  ;;  %v1755_v27 = vpack.c.bf16 %v1751_v4, %v1751_v4  ;;  %v2864_v7 = vpack.c.bf16 %v1752_v24, %v1752_v24  ;;  %v2866_v28 = vpack.c.bf16 %v1753_v25, %v1753_v25 }
 0x52d   :  { %2503 = dma.done.wait [#allocation3 + $0x1], 16384 }
 0x52e   :  { %2504 = vsyncadd [#allocation3 + $0x1], 4294950912  ;;  %1922 = vmatprep.mubr.bf16.mxu0 %v1755_v27  ;;  %2004 = vmatprep.mubr.bf16.mxu1 %v1755_v27  ;;  %v1763_v30 = vld [vmem:[#allocation2 + $0x408] sm:$0xff]  ;;  %v1765_v34 = vld [vmem:[#allocation2 + $0x418] sm:$0xff]  ;;  %vm2313_vm0 = vcmask 7168  }
 0x52f   :  { %v1762_v37 = vld [vmem:[#allocation2 + $0x400] sm:$0xff]  ;;  %1890 = vmatprep.subr.bf16.mxu0 %v1763_v30  ;;  %1972 = vmatprep.subr.bf16.mxu1 %v1765_v34  ;;  %v1764_v38 = vld [vmem:[#allocation2 + $0x410] sm:$0xff]  ;;  %v1767_v39 = vld [vmem:[#allocation2 + $0x428] sm:$0xff] }
 0x530   :  { %v1769_v41 = vld [vmem:[#allocation2 + $0x438] sm:$0xff]  ;;  %1891 = vmatpush1.bf16.msra.mxu0 %v1762_v37  ;;  %1973 = vmatpush1.bf16.msra.mxu1 %v1764_v38  ;;  %v1766_v42 = vld [vmem:[#allocation2 + $0x420] sm:$0xff]  ;;  %v1768_v43 = vld [vmem:[#allocation2 + $0x430] sm:$0xff] }
 0x531   :  { %1892 = vmatprep.subr.bf16.mxu0 %v1767_v39  ;;  %1974 = vmatprep.subr.bf16.mxu1 %v1769_v41  ;;  %v1771_v44 = vld [vmem:[#allocation2 + $0x448] sm:$0xff]  ;;  %v1773_v45 = vld [vmem:[#allocation2 + $0x458] sm:$0xff]  ;;  %v1770_v46 = vld [vmem:[#allocation2 + $0x440] sm:$0xff] }
 0x532   :  { %v1772_v47 = vld [vmem:[#allocation2 + $0x450] sm:$0xff]  ;;  %v1775_v49 = vld [vmem:[#allocation2 + $0x468] sm:$0xff]  ;;  %v1777_v53 = vld [vmem:[#allocation2 + $0x478] sm:$0xff] }
 0x533   :  { %v1774_v54 = vld [vmem:[#allocation2 + $0x460] sm:$0xff]  ;;  %v1776_v55 = vld [vmem:[#allocation2 + $0x470] sm:$0xff]  ;;  %v1779_v56 = vld [vmem:[#allocation2 + $0x488] sm:$0xff] }
 0x534   :  { %1893 = vmatpush1.bf16.msra.mxu0 %v1766_v42  ;;  %1975 = vmatpush1.bf16.msra.mxu1 %v1768_v43  ;;  %v1781_v57 = vld [vmem:[#allocation2 + $0x498] sm:$0xff]  ;;  %v1778_v58 = vld [vmem:[#allocation2 + $0x480] sm:$0xff]  ;;  %v1780_v59 = vld [vmem:[#allocation2 + $0x490] sm:$0xff] }
 0x535   :  { %1894 = vmatprep.subr.bf16.mxu0 %v1771_v44  ;;  %1976 = vmatprep.subr.bf16.mxu1 %v1773_v45  ;;  %v1783_v60 = vld [vmem:[#allocation2 + $0x4a8] sm:$0xff]  ;;  %v1785_v61 = vld [vmem:[#allocation2 + $0x4b8] sm:$0xff]  ;;  %v1782_v62 = vld [vmem:[#allocation2 + $0x4a0] sm:$0xff] }
 0x536   :  { %v1784_v33 = vld [vmem:[#allocation2 + $0x4b0] sm:$0xff]  ;;  %v1787_v29 = vld [vmem:[#allocation2 + $0x4c8] sm:$0xff]  ;;  %v1789_v36 = vld [vmem:[#allocation2 + $0x4d8] sm:$0xff] }
 0x537   :  { %v1786_v32 = vld [vmem:[#allocation2 + $0x4c0] sm:$0xff]  ;;  %v1788_v35 = vld [vmem:[#allocation2 + $0x4d0] sm:$0xff]  ;;  %v1791_v9 = vld [vmem:[#allocation2 + $0x4e8] sm:$0xff] }
 0x538   :  { %1895 = vmatpush1.bf16.msra.mxu0 %v1770_v46  ;;  %1977 = vmatpush1.bf16.msra.mxu1 %v1772_v47  ;;  %v1793_v10 = vld [vmem:[#allocation2 + $0x4f8] sm:$0xff]  ;;  %v1790_v31 = vld [vmem:[#allocation2 + $0x4e0] sm:$0xff]  ;;  %v1792_v8 = vld [vmem:[#allocation2 + $0x4f0] sm:$0xff] }
 0x539   :  { %1896 = vmatprep.subr.bf16.mxu0 %v1775_v49  ;;  %1978 = vmatprep.subr.bf16.mxu1 %v1777_v53  ;;  %v1795_v2 = vld [vmem:[#allocation2 + $0x508] sm:$0xff]  ;;  %v1797_v17 = vld [vmem:[#allocation2 + $0x518] sm:$0xff]  ;;  %v1794_v12 = vld [vmem:[#allocation2 + $0x500] sm:$0xff] }
 0x53a   :  { %v1796_v18 = vld [vmem:[#allocation2 + $0x510] sm:$0xff]  ;;  %v1799_v13 = vld [vmem:[#allocation2 + $0x528] sm:$0xff]  ;;  %v1801_v19 = vld [vmem:[#allocation2 + $0x538] sm:$0xff] }
 0x53b   :  { %v1798_v63 = vld [vmem:[#allocation2 + $0x520] sm:$0xff]  ;;  %v1800_v5 = vld [vmem:[#allocation2 + $0x530] sm:$0xff]  ;;  %v1803_v3 = vld [vmem:[#allocation2 + $0x548] sm:$0xff] }
 0x53c   :  { %1897 = vmatpush1.bf16.msra.mxu0 %v1774_v54  ;;  %1979 = vmatpush1.bf16.msra.mxu1 %v1776_v55  ;;  %v1805_v11 = vld [vmem:[#allocation2 + $0x558] sm:$0xff]  ;;  %v1802_v0 = vld [vmem:[#allocation2 + $0x540] sm:$0xff]  ;;  %v1804_v14 = vld [vmem:[#allocation2 + $0x550] sm:$0xff] }
 0x53d   :  { %1898 = vmatprep.subr.bf16.mxu0 %v1779_v56  ;;  %1980 = vmatprep.subr.bf16.mxu1 %v1781_v57  ;;  %v1807_v1 = vld [vmem:[#allocation2 + $0x568] sm:$0xff]  ;;  %v1809_v15 = vld [vmem:[#allocation2 + $0x578] sm:$0xff]  ;;  %v1806_v22 = vld [vmem:[#allocation2 + $0x560] sm:$0xff] }
 0x53e   :  { %v1808_v23 = vld [vmem:[#allocation2 + $0x570] sm:$0xff]  ;;  %v1811_v4 = vld [vmem:[#allocation2 + $0x588] sm:$0xff]  ;;  %v1813_v24 = vld [vmem:[#allocation2 + $0x598] sm:$0xff] }
 0x53f   :  { %v1810_v25 = vld [vmem:[#allocation2 + $0x580] sm:$0xff]  ;;  %v1812_v27 = vld [vmem:[#allocation2 + $0x590] sm:$0xff]  ;;  %v1815_v30 = vld [vmem:[#allocation2 + $0x5a8] sm:$0xff] }
 0x540   :  { %1899 = vmatpush1.bf16.msra.mxu0 %v1778_v58  ;;  %1981 = vmatpush1.bf16.msra.mxu1 %v1780_v59  ;;  %v1817_v34 = vld [vmem:[#allocation2 + $0x5b8] sm:$0xff]  ;;  %v1814_v37 = vld [vmem:[#allocation2 + $0x5a0] sm:$0xff]  ;;  %v1816_v38 = vld [vmem:[#allocation2 + $0x5b0] sm:$0xff] }
 0x541   :  { %1900 = vmatprep.subr.bf16.mxu0 %v1783_v60  ;;  %1982 = vmatprep.subr.bf16.mxu1 %v1785_v61  ;;  %v1819_v39 = vld [vmem:[#allocation2 + $0x5c8] sm:$0xff]  ;;  %v1821_v41 = vld [vmem:[#allocation2 + $0x5d8] sm:$0xff]  ;;  %v1818_v42 = vld [vmem:[#allocation2 + $0x5c0] sm:$0xff] }
 0x542   :  { %v1820_v43 = vld [vmem:[#allocation2 + $0x5d0] sm:$0xff]  ;;  %v1823_v44 = vld [vmem:[#allocation2 + $0x5e8] sm:$0xff]  ;;  %v1825_v45 = vld [vmem:[#allocation2 + $0x5f8] sm:$0xff] }
 0x543   :  { %v1822_v46 = vld [vmem:[#allocation2 + $0x5e0] sm:$0xff]  ;;  %v1824_v47 = vld [vmem:[#allocation2 + $0x5f0] sm:$0xff]  ;;  %v1827_v49 = vld [vmem:[#allocation2 + $0x608] sm:$0xff] }
 0x544   :  { %1901 = vmatpush1.bf16.msra.mxu0 %v1782_v62  ;;  %1983 = vmatpush1.bf16.msra.mxu1 %v1784_v33  ;;  %v1829_v53 = vld [vmem:[#allocation2 + $0x618] sm:$0xff]  ;;  %v1826_v54 = vld [vmem:[#allocation2 + $0x600] sm:$0xff]  ;;  %v1828_v55 = vld [vmem:[#allocation2 + $0x610] sm:$0xff] }
 0x545   :  { %1902 = vmatprep.subr.bf16.mxu0 %v1787_v29  ;;  %1984 = vmatprep.subr.bf16.mxu1 %v1789_v36  ;;  %v1831_v56 = vld [vmem:[#allocation2 + $0x628] sm:$0xff]  ;;  %v1833_v57 = vld [vmem:[#allocation2 + $0x638] sm:$0xff]  ;;  %v1830_v58 = vld [vmem:[#allocation2 + $0x620] sm:$0xff] }
 0x546   :  { %v1832_v59 = vld [vmem:[#allocation2 + $0x630] sm:$0xff]  ;;  %v1835_v60 = vld [vmem:[#allocation2 + $0x648] sm:$0xff]  ;;  %v1837_v61 = vld [vmem:[#allocation2 + $0x658] sm:$0xff] }
 0x547   :  { %v1834_v62 = vld [vmem:[#allocation2 + $0x640] sm:$0xff]  ;;  %v1836_v33 = vld [vmem:[#allocation2 + $0x650] sm:$0xff]  ;;  %v1839_v29 = vld [vmem:[#allocation2 + $0x668] sm:$0xff] }
 0x548   :  { %1903 = vmatpush1.bf16.msra.mxu0 %v1786_v32  ;;  %1985 = vmatpush1.bf16.msra.mxu1 %v1788_v35  ;;  %v1838_v36 = vld [vmem:[#allocation2 + $0x660] sm:$0xff]  ;;  %v1840_v32 = vld [vmem:[#allocation2 + $0x670] sm:$0xff]  ;;  %v1843_v35 = vld [vmem:[#allocation2 + $0x688] sm:$0xff] }
 0x549   :  { %1904 = vmatprep.subr.bf16.mxu0 %v1791_v9  ;;  %1986 = vmatprep.subr.bf16.mxu1 %v1793_v10  ;;  %v1845_v9 = vld [vmem:[#allocation2 + $0x698] sm:$0xff]  ;;  %v1844_v10 = vld [vmem:[#allocation2 + $0x690] sm:$0xff] }
 0x54c   :  { %1905 = vmatpush1.bf16.msra.mxu0 %v1790_v31  ;;  %1987 = vmatpush1.bf16.msra.mxu1 %v1792_v8  ;;  %v1847_v31 = vld [vmem:[#allocation2 + $0x6a8] sm:$0xff]  ;;  %v1849_v8 = vld [vmem:[#allocation2 + $0x6b8] sm:$0xff] }
 0x54d   :  { %1906 = vmatprep.subr.bf16.mxu0 %v1795_v2  ;;  %1988 = vmatprep.subr.bf16.mxu1 %v1797_v17  ;;  %v1846_v2 = vld [vmem:[#allocation2 + $0x6a0] sm:$0xff]  ;;  %v1848_v17 = vld [vmem:[#allocation2 + $0x6b0] sm:$0xff] }
 0x550   :  { %1907 = vmatpush1.bf16.msra.mxu0 %v1794_v12  ;;  %1989 = vmatpush1.bf16.msra.mxu1 %v1796_v18  ;;  %v1851_v12 = vld [vmem:[#allocation2 + $0x6c8] sm:$0xff]  ;;  %v1853_v18 = vld [vmem:[#allocation2 + $0x6d8] sm:$0xff] }
 0x551   :  { %1908 = vmatprep.subr.bf16.mxu0 %v1799_v13  ;;  %1990 = vmatprep.subr.bf16.mxu1 %v1801_v19  ;;  %v1850_v13 = vld [vmem:[#allocation2 + $0x6c0] sm:$0xff]  ;;  %v1852_v19 = vld [vmem:[#allocation2 + $0x6d0] sm:$0xff] }
 0x554   :  { %1909 = vmatpush1.bf16.msra.mxu0 %v1798_v63  ;;  %1991 = vmatpush1.bf16.msra.mxu1 %v1800_v5  ;;  %v1855_v63 = vld [vmem:[#allocation2 + $0x6e8] sm:$0xff]  ;;  %v1857_v5 = vld [vmem:[#allocation2 + $0x6f8] sm:$0xff] }
 0x555   :  { %1910 = vmatprep.subr.bf16.mxu0 %v1803_v3  ;;  %1992 = vmatprep.subr.bf16.mxu1 %v1805_v11  ;;  %v1854_v3 = vld [vmem:[#allocation2 + $0x6e0] sm:$0xff]  ;;  %v1856_v11 = vld [vmem:[#allocation2 + $0x6f0] sm:$0xff] }
 0x558   :  { %1911 = vmatpush1.bf16.msra.mxu0 %v1802_v0  ;;  %1993 = vmatpush1.bf16.msra.mxu1 %v1804_v14  ;;  %v1859_v0 = vld [vmem:[#allocation2 + $0x708] sm:$0xff]  ;;  %v1861_v14 = vld [vmem:[#allocation2 + $0x718] sm:$0xff] }
 0x559   :  { %1912 = vmatprep.subr.bf16.mxu0 %v1807_v1  ;;  %1994 = vmatprep.subr.bf16.mxu1 %v1809_v15  ;;  %v1858_v1 = vld [vmem:[#allocation2 + $0x700] sm:$0xff]  ;;  %v1860_v15 = vld [vmem:[#allocation2 + $0x710] sm:$0xff] }
 0x55c   :  { %1913 = vmatpush1.bf16.msra.mxu0 %v1806_v22  ;;  %1995 = vmatpush1.bf16.msra.mxu1 %v1808_v23  ;;  %v1863_v22 = vld [vmem:[#allocation2 + $0x728] sm:$0xff]  ;;  %v1865_v23 = vld [vmem:[#allocation2 + $0x738] sm:$0xff] }
 0x55d   :  { %1914 = vmatprep.subr.bf16.mxu0 %v1811_v4  ;;  %1996 = vmatprep.subr.bf16.mxu1 %v1813_v24  ;;  %v1862_v4 = vld [vmem:[#allocation2 + $0x720] sm:$0xff]  ;;  %v1864_v24 = vld [vmem:[#allocation2 + $0x730] sm:$0xff] }
 0x560   :  { %1915 = vmatpush1.bf16.msra.mxu0 %v1810_v25  ;;  %1997 = vmatpush1.bf16.msra.mxu1 %v1812_v27  ;;  %v1867_v25 = vld [vmem:[#allocation2 + $0x748] sm:$0xff]  ;;  %v1869_v27 = vld [vmem:[#allocation2 + $0x758] sm:$0xff] }
 0x561   :  { %1916 = vmatprep.subr.bf16.mxu0 %v1815_v30  ;;  %1998 = vmatprep.subr.bf16.mxu1 %v1817_v34  ;;  %v1866_v30 = vld [vmem:[#allocation2 + $0x740] sm:$0xff]  ;;  %v1868_v34 = vld [vmem:[#allocation2 + $0x750] sm:$0xff] }
 0x564   :  { %1917 = vmatpush1.bf16.msra.mxu0 %v1814_v37  ;;  %1999 = vmatpush1.bf16.msra.mxu1 %v1816_v38  ;;  %v1871_v37 = vld [vmem:[#allocation2 + $0x768] sm:$0xff]  ;;  %v1873_v38 = vld [vmem:[#allocation2 + $0x778] sm:$0xff] }
 0x565   :  { %1918 = vmatprep.subr.bf16.mxu0 %v1819_v39  ;;  %2000 = vmatprep.subr.bf16.mxu1 %v1821_v41  ;;  %v1870_v39 = vld [vmem:[#allocation2 + $0x760] sm:$0xff]  ;;  %v1872_v41 = vld [vmem:[#allocation2 + $0x770] sm:$0xff] }
 0x568   :  { %1919 = vmatpush1.bf16.msra.mxu0 %v1818_v42  ;;  %2001 = vmatpush1.bf16.msra.mxu1 %v1820_v43  ;;  %v1875_v42 = vld [vmem:[#allocation2 + $0x788] sm:$0xff]  ;;  %v1877_v43 = vld [vmem:[#allocation2 + $0x798] sm:$0xff] }
 0x569   :  { %1920 = vmatprep.subr.bf16.mxu0 %v1823_v44  ;;  %2002 = vmatprep.subr.bf16.mxu1 %v1825_v45  ;;  %v1874_v44 = vld [vmem:[#allocation2 + $0x780] sm:$0xff]  ;;  %v1876_v45 = vld [vmem:[#allocation2 + $0x790] sm:$0xff] }
 0x56c   :  { %1921 = vmatpush1.bf16.msra.mxu0 %v1822_v46  ;;  %2003 = vmatpush1.bf16.msra.mxu1 %v1824_v47  ;;  %v1879_v46 = vld [vmem:[#allocation2 + $0x7a8] sm:$0xff]  ;;  %v1881_v47 = vld [vmem:[#allocation2 + $0x7b8] sm:$0xff] }
 0x56d   :  { %1931 = vmatprep.subr.bf16.mxu0 %v1827_v49  ;;  %2013 = vmatprep.subr.bf16.mxu1 %v1829_v53  ;;  %v1878_v49 = vld [vmem:[#allocation2 + $0x7a0] sm:$0xff]  ;;  %v1880_v53 = vld [vmem:[#allocation2 + $0x7b0] sm:$0xff] }
 0x56f   :  { %1923 = vmatmul.mubr.bf16.vlgmr.msra.gmra.mrb[12].mxu0 %v2862_v26  ;;  %2005 = vmatmul.mubr.bf16.vlgmr.msra.gmra.mrb[12].mxu1 %v2862_v26  ;;  %v1841_v26 = vld [vmem:[#allocation2 + $0x678] sm:$0xff] }
 0x570   :  { %1932 = vmatpush1.bf16.msra.mxu0 %v1826_v54  ;;  %2014 = vmatpush1.bf16.msra.mxu1 %v1828_v55  ;;  %v1883_v54 = vld [vmem:[#allocation2 + $0x7c8] sm:$0xff]  ;;  %v1885_v55 = vld [vmem:[#allocation2 + $0x7d8] sm:$0xff] }
 0x571   :  { %1933 = vmatprep.subr.bf16.mxu0 %v1831_v56  ;;  %2015 = vmatprep.subr.bf16.mxu1 %v1833_v57  ;;  %v1882_v56 = vld [vmem:[#allocation2 + $0x7c0] sm:$0xff]  ;;  %v1884_v57 = vld [vmem:[#allocation2 + $0x7d0] sm:$0xff] }
 0x572   :  { %1963 = vmatprep.mubr.bf16.mxu0 %v2866_v28  ;;  %2045 = vmatprep.mubr.bf16.mxu1 %v2866_v28  ;;  %v1842_v28 = vld [vmem:[#allocation2 + $0x680] sm:$0xff] }
 0x574   :  { %1934 = vmatpush1.bf16.msra.mxu0 %v1830_v58  ;;  %2016 = vmatpush1.bf16.msra.mxu1 %v1832_v59  ;;  %v1887_v58 = vld [vmem:[#allocation2 + $0x7e8] sm:$0xff]  ;;  %v1889_v59 = vld [vmem:[#allocation2 + $0x7f8] sm:$0xff] }
 0x575   :  { %1935 = vmatprep.subr.bf16.mxu0 %v1835_v60  ;;  %2017 = vmatprep.subr.bf16.mxu1 %v1837_v61  ;;  %v1886_v60 = vld [vmem:[#allocation2 + $0x7e0] sm:$0xff]  ;;  %v1888_v61 = vld [vmem:[#allocation2 + $0x7f0] sm:$0xff] }
 0x578   :  { %1936 = vmatpush1.bf16.msra.mxu0 %v1834_v62  ;;  %2018 = vmatpush1.bf16.msra.mxu1 %v1836_v33 }
 0x579   :  { %1937 = vmatprep.subr.bf16.mxu0 %v1839_v29  ;;  %2019 = vmatprep.subr.bf16.mxu1 %v1841_v26 }
 0x57c   :  { %1938 = vmatpush1.bf16.msra.mxu0 %v1838_v36  ;;  %2020 = vmatpush1.bf16.msra.mxu1 %v1840_v32 }
 0x57d   :  { %1939 = vmatprep.subr.bf16.mxu0 %v1843_v35  ;;  %2021 = vmatprep.subr.bf16.mxu1 %v1845_v9 }
 0x580   :  { %1940 = vmatpush1.bf16.msra.mxu0 %v1842_v28  ;;  %2022 = vmatpush1.bf16.msra.mxu1 %v1844_v10 }
 0x581   :  { %1941 = vmatprep.subr.bf16.mxu0 %v1847_v31  ;;  %2023 = vmatprep.subr.bf16.mxu1 %v1849_v8 }
 0x584   :  { %1942 = vmatpush1.bf16.msra.mxu0 %v1846_v2  ;;  %2024 = vmatpush1.bf16.msra.mxu1 %v1848_v17 }
 0x585   :  { %1943 = vmatprep.subr.bf16.mxu0 %v1851_v12  ;;  %2025 = vmatprep.subr.bf16.mxu1 %v1853_v18 }
 0x588   :  { %1944 = vmatpush1.bf16.msra.mxu0 %v1850_v13  ;;  %2026 = vmatpush1.bf16.msra.mxu1 %v1852_v19 }
 0x589   :  { %1945 = vmatprep.subr.bf16.mxu0 %v1855_v63  ;;  %2027 = vmatprep.subr.bf16.mxu1 %v1857_v5 }
 0x58c   :  { %1946 = vmatpush1.bf16.msra.mxu0 %v1854_v3  ;;  %2028 = vmatpush1.bf16.msra.mxu1 %v1856_v11 }
 0x58d   :  { %1947 = vmatprep.subr.bf16.mxu0 %v1859_v0  ;;  %2029 = vmatprep.subr.bf16.mxu1 %v1861_v14 }
 0x590   :  { %1948 = vmatpush1.bf16.msra.mxu0 %v1858_v1  ;;  %2030 = vmatpush1.bf16.msra.mxu1 %v1860_v15 }
 0x591   :  { %1949 = vmatprep.subr.bf16.mxu0 %v1863_v22  ;;  %2031 = vmatprep.subr.bf16.mxu1 %v1865_v23 }
 0x594   :  { %1950 = vmatpush1.bf16.msra.mxu0 %v1862_v4  ;;  %2032 = vmatpush1.bf16.msra.mxu1 %v1864_v24 }
 0x595   :  { %1951 = vmatprep.subr.bf16.mxu0 %v1867_v25  ;;  %2033 = vmatprep.subr.bf16.mxu1 %v1869_v27 }
 0x598   :  { %1952 = vmatpush1.bf16.msra.mxu0 %v1866_v30  ;;  %2034 = vmatpush1.bf16.msra.mxu1 %v1868_v34 }
 0x599   :  { %1953 = vmatprep.subr.bf16.mxu0 %v1871_v37  ;;  %2035 = vmatprep.subr.bf16.mxu1 %v1873_v38 }
 0x59c   :  { %1954 = vmatpush1.bf16.msra.mxu0 %v1870_v39  ;;  %2036 = vmatpush1.bf16.msra.mxu1 %v1872_v41 }
 0x59d   :  { %1955 = vmatprep.subr.bf16.mxu0 %v1875_v42  ;;  %2037 = vmatprep.subr.bf16.mxu1 %v1877_v43 }
 0x5a0   :  { %1956 = vmatpush1.bf16.msra.mxu0 %v1874_v44  ;;  %2038 = vmatpush1.bf16.msra.mxu1 %v1876_v45 }
 0x5a1   :  { %1957 = vmatprep.subr.bf16.mxu0 %v1879_v46  ;;  %2039 = vmatprep.subr.bf16.mxu1 %v1881_v47 }
 0x5a4   :  { %1958 = vmatpush1.bf16.msra.mxu0 %v1878_v49  ;;  %2040 = vmatpush1.bf16.msra.mxu1 %v1880_v53 }
 0x5a5   :  { %1959 = vmatprep.subr.bf16.mxu0 %v1883_v54  ;;  %2041 = vmatprep.subr.bf16.mxu1 %v1885_v55 }
 0x5a8   :  { %1960 = vmatpush1.bf16.msra.mxu0 %v1882_v56  ;;  %2042 = vmatpush1.bf16.msra.mxu1 %v1884_v57 }
 0x5a9   :  { %1961 = vmatprep.subr.bf16.mxu0 %v1887_v58  ;;  %2043 = vmatprep.subr.bf16.mxu1 %v1889_v59 }
 0x5ac   :  { %1962 = vmatpush1.bf16.msra.mxu0 %v1886_v60  ;;  %2044 = vmatpush1.bf16.msra.mxu1 %v1888_v61 }
 0x5af   :  { %1964 = vmatmul.mubr.bf16.vlgmr.msra.gmra.mrb[12].mxu0 %v2864_v7  ;;  %2046 = vmatmul.mubr.bf16.vlgmr.msra.gmra.mrb[12].mxu1 %v2864_v7 }
 0x682   :  { %v2874_v62 = vpop.f32.mrb[12].mxu0  ;;  %v2876_v33 = vpop.f32.mrb[12].mxu1 }
 0x683   :  { %v2054_v29 = vrot.slane %v2874_v62, 4  ;;  %v2078_v26 = vmul.f32 %v2874_v62, %v2874_v62  ;;  %v2066_v36 = vrot.slane %v2876_v33, 4  ;;  %v2080_v32 = vmul.f32 %v2876_v33, %v2876_v33  ;;  %v2884_v35 = vpop.f32.mrb[13].mxu0  ;;  %v2886_v9 = vpop.f32.mrb[13].mxu1 }
 0x684   :  { %v2060_v7 = vrot.slane %v2884_v35, 4  ;;  %v2079_v28 = vmul.f32 %v2884_v35, %v2884_v35  ;;  %v2072_v10 = vrot.slane %v2886_v9, 4  ;;  %v2081_v31 = vmul.f32 %v2886_v9, %v2886_v9  ;;  %v1969_v8 = vpop.f32.mrb[14].mxu0  ;;  %v2051_v2 = vpop.f32.mrb[14].mxu1 }
 0x685   :  { %v2055_v17 = vadd.f32 %v2054_v29, %v2874_v62  ;;  %v2082_v12 = vrot.slane %v2078_v26, 4  ;;  %v2067_v18 = vadd.f32 %v2066_v36, %v2876_v33  ;;  %v2094_v13 = vrot.slane %v2080_v32, 4  ;;  %v1970_v19 = vpop.f32.mrb[15].mxu0  ;;  %v2052_v63 = vpop.f32.mrb[15].mxu1 }
 0x686   :  { %v2061_v5 = vadd.f32 %v2060_v7, %v2884_v35  ;;  %v2088_v3 = vrot.slane %v2079_v28, 4  ;;  %v2073_v11 = vadd.f32 %v2072_v10, %v2886_v9  ;;  %v2100_v0 = vrot.slane %v2081_v31, 4 }
 0x687   :  { %v2056_v14 = vrot.slane %v2055_v17, 2  ;;  %v2083_v1 = vadd.f32 %v2082_v12, %v2078_v26  ;;  %v2068_v15 = vrot.slane %v2067_v18, 2  ;;  %v2095_v22 = vadd.f32 %v2094_v13, %v2080_v32 }
 0x688   :  { %v2062_v23 = vrot.slane %v2061_v5, 2  ;;  %v2089_v4 = vadd.f32 %v2088_v3, %v2079_v28  ;;  %v2074_v24 = vrot.slane %v2073_v11, 2  ;;  %v2101_v25 = vadd.f32 %v2100_v0, %v2081_v31 }
 0x689   :  { %v2057_v27 = vadd.f32 %v2056_v14, %v2055_v17  ;;  %v2084_v30 = vrot.slane %v2083_v1, 2  ;;  %v2069_v34 = vadd.f32 %v2068_v15, %v2067_v18  ;;  %v2096_v37 = vrot.slane %v2095_v22, 2 }
 0x68a   :  { %v2063_v38 = vadd.f32 %v2062_v23, %v2061_v5  ;;  %v2090_v39 = vrot.slane %v2089_v4, 2  ;;  %v2075_v41 = vadd.f32 %v2074_v24, %v2073_v11  ;;  %v2102_v42 = vrot.slane %v2101_v25, 2 }
 0x68b   :  { %v2058_v43 = vrot.slane %v2057_v27, 1  ;;  %v2085_v44 = vadd.f32 %v2084_v30, %v2083_v1  ;;  %v2070_v45 = vrot.slane %v2069_v34, 1  ;;  %v2097_v46 = vadd.f32 %v2096_v37, %v2095_v22 }
 0x68c   :  { %v2064_v47 = vrot.slane %v2063_v38, 1  ;;  %v2091_v49 = vadd.f32 %v2090_v39, %v2089_v4  ;;  %v2076_v53 = vrot.slane %v2075_v41, 1  ;;  %v2103_v54 = vadd.f32 %v2102_v42, %v2101_v25 }
 0x68d   :  { %v2059_v55 = vadd.f32 %v2058_v43, %v2057_v27  ;;  %v2086_v56 = vrot.slane %v2085_v44, 1  ;;  %v2071_v57 = vadd.f32 %v2070_v45, %v2069_v34  ;;  %v2098_v58 = vrot.slane %v2097_v46, 1 }
 0x68e   :  { %v2065_v59 = vadd.f32 %v2064_v47, %v2063_v38  ;;  %v2092_v60 = vrot.slane %v2091_v49, 1  ;;  %v2077_v61 = vadd.f32 %v2076_v53, %v2075_v41  ;;  %v2104_v29 = vrot.slane %v2103_v54, 1 }
 0x68f   :  { %v2087_v26 = vadd.f32 %v2086_v56, %v2085_v44  ;;  %v2106_v36 = vmul.f32 0.125, %v2059_v55  ;;  %v2099_v32 = vadd.f32 %v2098_v58, %v2097_v46  ;;  %v2108_v7 = vmul.f32 0.125, %v2071_v57  ;;  %v1761_v44 = vld [vmem:[#allocation7 + $0x18] sm:$0xff] }
 0x690   :  { %v2093_v28 = vadd.f32 %v2092_v60, %v2091_v49  ;;  %v2107_v10 = vmul.f32 0.125, %v2065_v59  ;;  %v2105_v31 = vadd.f32 %v2104_v29, %v2103_v54  ;;  %v2109_v8 = vmul.f32 0.125, %v2077_v61 }
 0x691   :  { %v2110_v2 = vmul.f32 0.125, %v2087_v26  ;;  %v2114_v17 = vmul.f32 %v2106_v36, %v2106_v36  ;;  %v2112_v12 = vmul.f32 0.125, %v2099_v32  ;;  %v2116_v18 = vmul.f32 %v2108_v7, %v2108_v7 }
 0x692   :  { %v2111_v13 = vmul.f32 0.125, %v2093_v28  ;;  %v2115_v19 = vmul.f32 %v2107_v10, %v2107_v10  ;;  %v2113_v63 = vmul.f32 0.125, %v2105_v31  ;;  %v2117_v5 = vmul.f32 %v2109_v8, %v2109_v8 }
 0x693   :  { %v2118_v3 = vsub.f32 %v2110_v2, %v2114_v17  ;;  %v2120_v11 = vsub.f32 %v2112_v12, %v2116_v18 }
 0x694   :  { %v2119_v0 = vsub.f32 %v2111_v13, %v2115_v19  ;;  %v2121_v14 = vsub.f32 %v2113_v63, %v2117_v5 }
 0x695   :  { %v2122_v1 = vmax.f32 %v2118_v3, 0.0  ;;  %v2124_v15 = vmax.f32 %v2120_v11, 0.0  ;;  %v2279_v3 = vld [vmem:[#allocation9] sm:$0xf] }
 0x696   :  { %v2123_v22 = vmax.f32 %v2119_v0, 0.0  ;;  %v2125_v23 = vmax.f32 %v2121_v14, 0.0 }
 0x697   :  { %v2126_v4 = vadd.f32 1e-05, %v2122_v1  ;;  %v2128_v24 = vadd.f32 1e-05, %v2124_v15 }
 0x698   :  { %v2127_v25 = vadd.f32 1e-05, %v2123_v22  ;;  %v2129_v27 = vadd.f32 1e-05, %v2125_v23 }
 0x699   :  { %2419 = vrsqrt.f32 %v2126_v4 }
 0x69a   :  { %2421 = vrsqrt.f32 %v2128_v24 }
 0x69b   :  { %2423 = vrsqrt.f32 %v2127_v25 }
 0x69c   :  { %2425 = vrsqrt.f32 %v2129_v27 }
 0x6a3   :  { %v2420_v30 = vpop.eup %2419 }
 0x6a4   :  { %v2422_v34 = vpop.eup %2421 }
 0x6a5   :  { %v2424_v37 = vpop.eup %2423 }
 0x6a6   :  { %v2426_v38 = vpop.eup %2425  ;;  %v2138_v39 = vcombine.low %v2420_v30, %v2424_v37  ;;  %v2292_v30 = vrot.slane %v2279_v3, %v2674_v50  ;;  %v2296_v37 = vrot.slane %v2279_v3, %v2696_v6 }
 0x6a7   :  { %v2139_v41 = vcombine.low %v2422_v34, %v2426_v38 }
 0x6a8   :  { %v2146_v42 = vrot.slane %v2138_v39, %v2668_v40 }
 0x6a9   :  { %v2153_v43 = vrot.slane %v2139_v41, %v2668_v40 }
 0x6ab   :  { %v2154_v45 = vcombine.low %v2146_v42, %v2153_v43 }
 0x6ad   :  { %v2156_v46 = vmul.f32 %v2154_v45, %v1761_v44 }
 0x6af   :  { %v2173_v47 = vrot.slane %v2156_v46, %v2678_v52  ;;  %v2161_v49 = vrot.slane %v2156_v46, %v2672_v48  ;;  %v2165_v53 = vrot.slane %v2156_v46, %v2674_v50  ;;  %v2169_v54 = vrot.slane %v2156_v46, %v2676_v51 }
 0x6b1   :  { %v2181_v55 = vmul.f32 %v2173_v47, %v2109_v8  ;;  %v2221_v56 = vrot.slane %v2173_v47, %v2672_v48  ;;  %v2178_v57 = vmul.f32 %v2161_v49, %v2106_v36  ;;  %v2179_v58 = vmul.f32 %v2165_v53, %v2107_v10 }
 0x6b2   :  { %v2180_v59 = vmul.f32 %v2169_v54, %v2108_v7  ;;  %v2209_v60 = vrot.slane %v2161_v49, %v2672_v48  ;;  %v2213_v61 = vrot.slane %v2165_v53, %v2672_v48  ;;  %v2217_v29 = vrot.slane %v2169_v54, %v2672_v48 }
 0x6b3   :  { %v2225_v52 = vmul.f32 %v2221_v56, %v2886_v9  ;;  %v2186_v26 = vcombine.low %v2178_v57, %v2179_v58 }
 0x6b4   :  { %v2187_v32 = vcombine.low %v2180_v59, %v2181_v55  ;;  %v2222_v28 = vmul.f32 %v2209_v60, %v2874_v62  ;;  %v2223_v51 = vmul.f32 %v2213_v61, %v2884_v35  ;;  %v2224_v31 = vmul.f32 %v2217_v29, %v2876_v33 }
 0x6b5   :  { %v2194_v36 = vrot.slane %v2186_v26, %v2668_v40 }
 0x6b6   :  { %v2201_v7 = vrot.slane %v2187_v32, %v2668_v40 }
 0x6b8   :  { %v2202_v10 = vcombine.low %v2194_v36, %v2201_v7 }
 0x6ba   :  { %v2203_v8 = vrot.slane %v2202_v10, 7 }
 0x6bc   :  { %v2205_v2 = vsub.f32 %v1761_v44, %v2203_v8 }
 0x6be   :  { %v2230_v17 = vrot.slane %v2205_v2, %v2694_v16  ;;  %v2234_v12 = vrot.slane %v2205_v2, %v2696_v6  ;;  %v2238_v9 = vrot.slane %v2205_v2, %v2698_v20  ;;  %v2242_v18 = vrot.slane %v2205_v2, %v2700_v21 }
 0x6bf   :  { %v2284_v20 = vrot.slane %v2279_v3, %v2672_v48  ;;  %v2288_v21 = vrot.slane %v2279_v3, %v2694_v16 }
 0x6c0   :  { %v2250_v62 = vrot.slane %v2230_v17, %v2694_v16  ;;  %v2254_v35 = vrot.slane %v2234_v12, %v2694_v16  ;;  %v2258_v33 = vrot.slane %v2238_v9, %v2694_v16  ;;  %v2262_v13 = vrot.slane %v2242_v18, %v2694_v16 }
 0x6c1   :  { %v2311_v16 = vstv %s2936_s4 }
 0x6c2   :  { %v2263_v40 = vadd.f32 %v2250_v62, %v2222_v28  ;;  %v2264_v19 = vadd.f32 %v2254_v35, %v2223_v51  ;;  %v2265_v63 = vadd.f32 %v2258_v33, %v2224_v31  ;;  %v2266_v5 = vadd.f32 %v2262_v13, %v2225_v52 }
 0x6c4   :  { %v2267_v11 = vmax.f32 %v2263_v40, 0.0  ;;  %v2268_v0 = vmax.f32 %v2264_v19, 0.0  ;;  %v2269_v14 = vmax.f32 %v2265_v63, 0.0  ;;  %v2270_v1 = vmax.f32 %v2266_v5, 0.0 }
 0x6c6   :  { %v2271_v15 = vpack.c.bf16 %v2267_v11, %v2267_v11  ;;  %v2272_v22 = vpack.c.bf16 %v2268_v0, %v2268_v0  ;;  %v2273_v23 = vpack.c.bf16 %v2269_v14, %v2269_v14  ;;  %v2274_v4 = vpack.c.bf16 %v2270_v1, %v2270_v1 }
 0x6c8   :  { %v2275_v24 = vunpack.c.l.bf16 %v2271_v15  ;;  %v2276_v25 = vunpack.c.l.bf16 %v2272_v22  ;;  %v2277_v27 = vunpack.c.l.bf16 %v2273_v23  ;;  %v2278_v34 = vunpack.c.l.bf16 %v2274_v4 }
 0x6ca   :  { %v2301_v38 = vmul.f32 %v2284_v20, %v2275_v24  ;;  %v2302_v39 = vmul.f32 %v2288_v21, %v2276_v25  ;;  %v2303_v41 = vmul.f32 %v2292_v30, %v2277_v27  ;;  %v2304_v43 = vmul.f32 %v2296_v37, %v2278_v34 }
 0x6cc   :  { %v2305_v42 = vadd.f32 %v2302_v39, %v2301_v38 }
 0x6ce   :  { %v2306_v48 = vadd.f32 %v2305_v42, %v2303_v41 }
 0x6d0   :  { %v2307_v44 = vadd.f32 %v2306_v48, %v2304_v43 }
 0x6d2   :  { %2308 = vadd.xlane.f32.xlu0 %v2307_v44 }
 0x75f   :  { %v2309_v45 = vpop.xlane.xlu0 %2308 }
 0x760   :  { %v2312_v46 = vadd.f32 %v2311_v16, %v2309_v45 }
 0x762   :  { %2314 = vst.msk [vmem:[%s2937_s5] sm:$0xff] %vm2313_vm0, %v2312_v46 }
 0x763   :  { %2319 = vsyncpa [#allocation6], 1 }
 0x764   :  { %2320 = vsyncpa [#allocation8], 1 }
 0x765   :  { %2321 = vsyncmov [#allocation3] }
 0x768   :  { %s2322_s8 = vpop.sfrf %2321 }
 0x769   :  { %p2342_p10 = scmp.ne.s32.totalorder %s2322_s8, 0 }
 0x76b   :  { %2326 = shalt.err (%p2342_p10)  }
 0x76c   :  { %2328 = vsyncmov [#allocation3 + $0x1] }
 0x76f   :  { %s2329_s9 = vpop.sfrf %2328 }
 0x770   :  { %p2343_p11 = scmp.ne.s32.totalorder %s2329_s9, 0 }
 0x772   :  { %2333 = shalt.err (%p2343_p11)  }

</bundles_post_ra>
